<compile_context>
chip_gen: v7x
topology: tpu7x:2x2x1
jax: 0.10.0
libtpu: 0.0.40
codegen_flags: <defaults>
</compile_context>

<pallas_src>
import numpy as np
import jax
import jax.numpy as jnp
from jax.experimental import pallas as pl
from jax.experimental.pallas import tpu as pltpu


# ---------------------------------------------------------------------------
# VMEM budgeting helpers
# ---------------------------------------------------------------------------

def _vmem_limit_bytes():
    """Scoped-VMEM limit: ~3/4 of physical VMEM, capped at 100 MiB (v5e/v6e); smaller on v7x."""
    try:
        cap = int(pltpu.get_tpu_info().vmem_capacity_bytes)
    except Exception:
        cap = 64 << 20
    return int(min(cap * 3 // 4, 100 << 20))


def _rows_for_budget(bytes_per_row, n_rows, budget, floor=8):
    """Largest row tile (multiple of `floor`, or full) whose footprint fits `budget`."""
    r = int(budget // max(int(bytes_per_row), 1))
    if r >= n_rows:
        return int(n_rows)
    r = max(floor, (r // floor) * floor)
    return int(min(r, n_rows))


# ---------------------------------------------------------------------------
# Pallas kernels
# ---------------------------------------------------------------------------

def linear_kernel(x_ref, w_ref, b_ref, o_ref):
    """o = x @ W + b  (classifier head; tiny, kept in f32)."""
    o_ref[...] = (jnp.dot(x_ref[...], w_ref[...], preferred_element_type=jnp.float32)
                  + b_ref[...])


def gru_chunk_kernel(x_ref, wih_ref, bih_ref, whh_ref, bhh_ref, out_ref, h_ref):
    """Fused bidirectional GRU: input projection + recurrence over one (Bt, Tc) chunk.

    x_ref  : (Bt, Tc, 2*in) bf16   [x | x_rev] features
    wih_ref: (2*in, 6H) bf16       block-diagonal input weights, gate-major [r_f r_b|z_f z_b|n_f n_b]
    bih_ref: (1, 6H) f32
    whh_ref: (2H, 6H) bf16         block-diagonal recurrent weights (same layout)
    bhh_ref: (1, 6H) f32
    out_ref: (Bt, Tc, 2H) f32      hidden states [h_fwd | h_bwd] (bwd in reversed time order)
    h_ref  : (Bt, 2H) f32          carried hidden state (VMEM scratch, persists over time chunks)
    """
    c = pl.program_id(1)                      # time-chunk axis (innermost, "arbitrary")

    @pl.when(c == 0)
    def _():
        h_ref[...] = jnp.zeros_like(h_ref)

    x = x_ref[...]
    Bt, Tc, In2 = x.shape
    H2 = whh_ref.shape[0]                     # 2H
    G6 = whh_ref.shape[1]                     # 6H

    # Hoisted input projection for the whole chunk: one MXU GEMM, b_ih folded in.  Stays in VMEM.
    gi = (jnp.dot(x.reshape(Bt * Tc, In2), wih_ref[...],
                  preferred_element_type=jnp.float32)
          + bih_ref[...])                     # (Bt*Tc, 6H) f32
    gi = gi.reshape(Bt, Tc, G6)

    whh = whh_ref[...]
    bhh = bhh_ref[...]

    h = h_ref[...]                            # f32 carried state
    for tc in range(Tc):                      # small static unroll (Tc <= 8)
        g = gi[:, tc, :]                                                      # (Bt, 6H)
        gh = jnp.dot(h.astype(jnp.bfloat16), whh,
                     preferred_element_type=jnp.float32) + bhh                # (Bt, 6H)
        r = jax.nn.sigmoid(g[:, :H2] + gh[:, :H2])
        z = jax.nn.sigmoid(g[:, H2:2 * H2] + gh[:, H2:2 * H2])
        n = jnp.tanh(g[:, 2 * H2:] + r * gh[:, 2 * H2:])
        h = (1.0 - z) * n + z * h
        out_ref[:, tc, :] = h
    h_ref[...] = h


def att_pool_kernel(h_ref, len_ref, w_ref, b_ref, c_ref, alpha_ref, pooled_ref):
    """Fused attention: scores = tanh(h @ W + b) . c, masked softmax over T, weighted pooling.

    h_ref   : (Nt, T, D) f32
    len_ref : (Nt, 1) int32  valid lengths (mask built in-kernel)
    w_ref   : (D, A) bf16, b_ref: (1, A) f32, c_ref: (1, A) f32
    alpha_ref : (Nt, T) f32  attention weights
    pooled_ref: (Nt, D) f32  attention-pooled embeddings
    """
    h = h_ref[...]
    Nt, T, D = h.shape
    A = w_ref.shape[1]

    u = jnp.tanh(jnp.dot(h.reshape(Nt * T, D).astype(jnp.bfloat16), w_ref[...],
                         preferred_element_type=jnp.float32) + b_ref[...])    # (Nt*T, A) f32
    s = jnp.sum(u.reshape(Nt, T, A) * c_ref[...], axis=-1)                    # VPU reduce -> (Nt, T)

    t_iota = jax.lax.broadcasted_iota(jnp.int32, (Nt, T), 1)
    m = t_iota < len_ref[...]                                                 # (Nt, T) bool
    s = jnp.where(m, s, -1e30)
    smax = jnp.max(s, axis=-1, keepdims=True)                                 # (Nt, 1)
    e = jnp.where(m, jnp.exp(s - smax), 0.0)
    denom = jnp.sum(e, axis=-1, keepdims=True)                                # (Nt, 1)
    inv = pl.reciprocal(jnp.maximum(denom, 1e-30), approx=True)               # EUP slot

    alpha_ref[...] = e * inv                                                  # (Nt, T)
    pooled_ref[...] = jnp.sum(h * e[:, :, None], axis=1) * inv                # (Nt, D)


# ---------------------------------------------------------------------------
# Pallas wrappers
# ---------------------------------------------------------------------------

def linear(x, w_t, b, vmem_limit, tile_m=256):
    """x: (M, K) @ w_t: (K, N) + b: (1, N) -> (M, N), tiled over rows."""
    M, K = x.shape
    N = w_t.shape[1]
    Mt = min(M, tile_m)
    return pl.pallas_call(
        linear_kernel,
        out_shape=jax.ShapeDtypeStruct((M, N), jnp.float32),
        grid=(pl.cdiv(M, Mt),),
        in_specs=[
            pl.BlockSpec((Mt, K), lambda i: (i, 0)),
            pl.BlockSpec((K, N), lambda i: (0, 0)),
            pl.BlockSpec((1, N), lambda i: (0, 0)),
        ],
        out_specs=pl.BlockSpec((Mt, N), lambda i: (i, 0)),
        compiler_params=pltpu.CompilerParams(
            dimension_semantics=("parallel",), vmem_limit_bytes=vmem_limit),
    )(x, w_t, b)


def gru_recurrent(x_cat, wih, bih, whh, bhh, vmem_limit, tc_target=8):
    """x_cat: (B, T, 2*in) bf16 -> (B, T, 2H) f32 hidden states (bwd half in reversed time)."""
    B, T, In2 = x_cat.shape
    H2, G6 = whh.shape

    Tc = min(T, tc_target)
    Tpad = pl.cdiv(T, Tc) * Tc
    if Tpad != T:
        x_cat = jnp.pad(x_cat, ((0, 0), (0, Tpad - T), (0, 0)))

    # batch tile sized from the VMEM budget: bf16 x chunk + f32 out chunk (double-buffered)
    # + in-kernel f32 gi intermediate + h scratch, per batch row.
    per_row = Tc * (In2 * 2 * 2 + H2 * 4 * 2 + G6 * 4) + H2 * 4
    Bt = _rows_for_budget(per_row, B, vmem_limit // 2)

    h_seq = pl.pallas_call(
        gru_chunk_kernel,
        out_shape=jax.ShapeDtypeStruct((B, Tpad, H2), jnp.float32),
        grid=(pl.cdiv(B, Bt), Tpad // Tc),
        in_specs=[
            pl.BlockSpec((Bt, Tc, In2), lambda b, c: (b, c, 0)),
            pl.BlockSpec((In2, G6), lambda b, c: (0, 0)),   # VMEM-resident across the sequence
            pl.BlockSpec((1, G6), lambda b, c: (0, 0)),
            pl.BlockSpec((H2, G6), lambda b, c: (0, 0)),
            pl.BlockSpec((1, G6), lambda b, c: (0, 0)),
        ],
        out_specs=pl.BlockSpec((Bt, Tc, H2), lambda b, c: (b, c, 0)),
        scratch_shapes=[pltpu.VMEM((Bt, H2), jnp.float32)],
        compiler_params=pltpu.CompilerParams(
            dimension_semantics=("parallel", "arbitrary"),
            vmem_limit_bytes=vmem_limit),
    )(x_cat, wih, bih, whh, bhh)
    return h_seq[:, :T, :]


def att_pool(h, lengths, w_t, b, c_row, vmem_limit):
    """Fused attention score + masked softmax + pooling. h: (N, T, D) -> ((N, T), (N, D))."""
    N, T, D = h.shape
    A = w_t.shape[1]
    lens = lengths.reshape(N, 1).astype(jnp.int32)

    per_row = T * D * 4 * 2 + T * 4 * 2 + D * 4 * 2 + T * A * 4   # h, alpha, pooled, u temps
    Nt = _rows_for_budget(per_row, N, vmem_limit // 2)

    return pl.pallas_call(
        att_pool_kernel,
        out_shape=(
            jax.ShapeDtypeStruct((N, T), jnp.float32),
            jax.ShapeDtypeStruct((N, D), jnp.float32),
        ),
        grid=(pl.cdiv(N, Nt),),
        in_specs=[
            pl.BlockSpec((Nt, T, D), lambda i: (i, 0, 0)),
            pl.BlockSpec((Nt, 1), lambda i: (i, 0)),
            pl.BlockSpec((D, A), lambda i: (0, 0)),
            pl.BlockSpec((1, A), lambda i: (0, 0)),
            pl.BlockSpec((1, A), lambda i: (0, 0)),
        ],
        out_specs=(
            pl.BlockSpec((Nt, T), lambda i: (i, 0)),
            pl.BlockSpec((Nt, D), lambda i: (i, 0)),
        ),
        compiler_params=pltpu.CompilerParams(
            dimension_semantics=("parallel",), vmem_limit_bytes=vmem_limit),
    )(h, lens, w_t, b, c_row)


# ---------------------------------------------------------------------------
# Glue: length-aware fused bidirectional multi-layer GRU (batch-major throughout)
# ---------------------------------------------------------------------------

def bi_gru(x, lengths, layer_params, vmem_limit):
    """x: (B, T, in_feat) f32, lengths: (B,) -> (B, T, 2H) f32.

    Both directions are fused: input is [x | x_reversed_within_length] along features, the
    recurrent kernel carries [h_fwd | h_bwd], and the backward half is un-reversed afterwards
    (PackedSequence semantics at all valid positions).
    """
    B, T, _ = x.shape
    t_idx = jnp.arange(T)
    rev_idx = jnp.clip(lengths[:, None] - 1 - t_idx[None, :], 0, T - 1)      # (B, T)

    out = x
    for (wih_bd, bih_cat, whh_bd, bhh_cat) in layer_params:
        H = whh_bd.shape[0] // 2

        idx = jnp.broadcast_to(rev_idx[:, :, None], out.shape)
        x_rev = jnp.take_along_axis(out, idx, axis=1)
        x_cat = jnp.concatenate([out, x_rev], axis=-1).astype(jnp.bfloat16)  # (B, T, 2*in) bf16

        h_seq = gru_recurrent(x_cat, wih_bd, bih_cat, whh_bd, bhh_cat, vmem_limit)  # (B, T, 2H)

        h_fwd = h_seq[..., :H]
        idx_h = jnp.broadcast_to(rev_idx[:, :, None], h_fwd.shape)
        h_bwd = jnp.take_along_axis(h_seq[..., H:], idx_h, axis=1)           # un-reverse in length
        out = jnp.concatenate([h_fwd, h_bwd], axis=-1)                       # (B, T, 2H) f32
    return out


# ---------------------------------------------------------------------------
# Full HAN forward
# ---------------------------------------------------------------------------

def han_forward(params, documents, sentences_per_document, words_per_sentence):
    n_docs, sent_pad, word_pad = documents.shape
    vmem_limit = _vmem_limit_bytes()

    # ---- word level ----
    emb = params["embedding"][documents].astype(jnp.float32)        # (n_docs, sent_pad, word_pad, E)
    n_sents = n_docs * sent_pad
    sents = emb.reshape(n_sents, word_pad, emb.shape[-1])
    wlens = words_per_sentence.reshape(n_sents)

    word_h = bi_gru(sents, wlens, params["word_gru"], vmem_limit)    # (n_sents, word_pad, 2*word_rnn)
    word_alpha, sent_emb = att_pool(word_h, wlens,
                                    params["w_att_w_t"], params["w_att_b"],
                                    params["w_ctx_row"], vmem_limit)

    # ---- sentence level ----
    sent_emb = sent_emb.reshape(n_docs, sent_pad, sent_emb.shape[-1])
    sent_h = bi_gru(sent_emb, sentences_per_document, params["sent_gru"], vmem_limit)
    sent_alpha, doc_emb = att_pool(sent_h, sentences_per_document,
                                   params["s_att_w_t"], params["s_att_b"],
                                   params["s_ctx_row"], vmem_limit)

    # ---- classifier ----
    scores = linear(doc_emb, params["fc_w_t"], params["fc_b"], vmem_limit)   # (n_docs, n_classes)

    sent_mask = (jnp.arange(sent_pad)[None, :]
                 < sentences_per_document[:, None]).astype(jnp.float32)
    word_alphas = (word_alpha.reshape(n_docs, sent_pad, word_pad)
                   * sent_mask[:, :, None])                          # zero padded sentences (pad_packed)
    sentence_alphas = sent_alpha                                     # (n_docs, sent_pad)
    return scores, word_alphas, sentence_alphas


# ---------------------------------------------------------------------------
# Deterministic parameter construction (weights pre-fused for the kernels)
# ---------------------------------------------------------------------------

def _fuse_bidir_gru(fwd, bwd, H):
    """Fuse per-direction GRU weights into block-diagonal, gate-major layout.

    fwd/bwd: (W_ih^T (in, 3H), W_hh^T (H, 3H), b_ih (1, 3H), b_hh (1, 3H)), columns [r|z|n].
    Returns (W_ih_bd (2*in, 6H), b_ih_cat (1, 6H), W_hh_bd (2H, 6H), b_hh_cat (1, 6H)),
    columns ordered [r_f r_b | z_f z_b | n_f n_b].  Matmul weights are cast to bf16.

    NOTE: the block-diagonal fusion is only worthwhile while 2H fits one MXU tile; at the sizes
    used here (2H <= 128) it halves the number of serial recurrent matmuls for free.
    """
    wih_f, whh_f, bih_f, bhh_f = fwd
    wih_b, whh_b, bih_b, bhh_b = bwd

    def blockdiag_gate_major(wf, wb):
        in_dim = wf.shape[0]
        wf3 = wf.reshape(in_dim, 3, H)
        wb3 = wb.reshape(in_dim, 3, H)
        z = jnp.zeros_like(wf3)
        top = jnp.stack([wf3, z], axis=2).reshape(in_dim, 6 * H)    # [r_f, 0, z_f, 0, n_f, 0]
        bot = jnp.stack([z, wb3], axis=2).reshape(in_dim, 6 * H)    # [0, r_b, 0, z_b, 0, n_b]
        return jnp.concatenate([top, bot], axis=0)

    def bias_gate_major(bf, bb):
        return jnp.stack([bf.reshape(3, H), bb.reshape(3, H)], axis=1).reshape(1, 6 * H)

    return (blockdiag_gate_major(wih_f, wih_b).astype(jnp.bfloat16),
            bias_gate_major(bih_f, bih_b),
            blockdiag_gate_major(whh_f, whh_b).astype(jnp.bfloat16),
            bias_gate_major(bhh_f, bhh_b))


def make_params(key, n_classes, vocab_size, emb_size, word_rnn_size, sentence_rnn_size,
                word_rnn_layers, sentence_rnn_layers, word_att_size, sentence_att_size):
    keys = iter(jax.random.split(key, 256))

    def uniform(shape, bound):
        return jax.random.uniform(next(keys), shape, jnp.float32, -bound, bound)

    params = {}
    params["embedding"] = jax.random.normal(next(keys), (vocab_size, emb_size), jnp.float32)

    def fused_gru_params(input_size, hidden, layers):
        bound = 1.0 / np.sqrt(hidden)
        lp, in_sz = [], input_size
        for _ in range(layers):
            dirs = []
            for _ in range(2):  # forward, backward
                dirs.append((uniform((in_sz, 3 * hidden), bound),   # W_ih^T, columns [r|z|n]
                             uniform((hidden, 3 * hidden), bound),  # W_hh^T
                             uniform((1, 3 * hidden), bound),       # b_ih
                             uniform((1, 3 * hidden), bound)))      # b_hh
            lp.append(_fuse_bidir_gru(dirs[0], dirs[1], hidden))
            in_sz = 2 * hidden
        return lp

    params["word_gru"] = fused_gru_params(emb_size, word_rnn_size, word_rnn_layers)
    params["sent_gru"] = fused_gru_params(2 * word_rnn_size, sentence_rnn_size,
                                          sentence_rnn_layers)

    bw = 1.0 / np.sqrt(2 * word_rnn_size)
    params["w_att_w_t"] = uniform((2 * word_rnn_size, word_att_size), bw).astype(jnp.bfloat16)
    params["w_att_b"] = uniform((1, word_att_size), bw)
    params["w_ctx_row"] = uniform((1, word_att_size), 1.0 / np.sqrt(word_att_size))

    bs = 1.0 / np.sqrt(2 * sentence_rnn_size)
    params["s_att_w_t"] = uniform((2 * sentence_rnn_size, sentence_att_size), bs).astype(jnp.bfloat16)
    params["s_att_b"] = uniform((1, sentence_att_size), bs)
    params["s_ctx_row"] = uniform((1, sentence_att_size), 1.0 / np.sqrt(sentence_att_size))

    bf = 1.0 / np.sqrt(2 * sentence_rnn_size)
    params["fc_w_t"] = uniform((2 * sentence_rnn_size, n_classes), bf)
    params["fc_b"] = uniform((1, n_classes), bf)
    return params


# ---------------------------------------------------------------------------
# Main
# ---------------------------------------------------------------------------

if __name__ == "__main__":
    n_docs, sent_pad, word_pad = 2, 4, 8
    vocab_size, emb_size = 50, 16
    word_rnn_size, sentence_rnn_size = 16, 16
    word_rnn_layers, sentence_rnn_layers = 1, 1
    word_att_size, sentence_att_size = 16, 16
    n_classes = 5

    key = jax.random.PRNGKey(0)
    k_param, k_doc, k_wps = jax.random.split(key, 3)

    params = make_params(k_param, n_classes, vocab_size, emb_size, word_rnn_size,
                         sentence_rnn_size, word_rnn_layers, sentence_rnn_layers,
                         word_att_size, sentence_att_size)

    documents = jax.random.randint(k_doc, (n_docs, sent_pad, word_pad), 0, vocab_size,
                                   dtype=jnp.int32)
    sentences_per_document = jnp.array([4, 3], dtype=jnp.int32)
    words_per_sentence = jax.random.randint(k_wps, (n_docs, sent_pad), 1, word_pad + 1,
                                            dtype=jnp.int32)
    # make the max valid lengths equal the pad lengths so output shapes match pad_packed_sequence
    words_per_sentence = words_per_sentence.at[0, 0].set(word_pad)

    han_fwd = jax.jit(han_forward)
    scores, word_alphas, sentence_alphas = han_fwd(
        params, documents, sentences_per_document, words_per_sentence)

    jax.block_until_ready((scores, word_alphas, sentence_alphas))
    assert scores.shape == (n_docs, n_classes)
    assert word_alphas.shape == (n_docs, sent_pad, word_pad)
    assert sentence_alphas.shape == (n_docs, sent_pad)
    assert bool(jnp.all(jnp.isfinite(scores)))
    assert bool(jnp.all(jnp.isfinite(word_alphas)))
    assert bool(jnp.all(jnp.isfinite(sentence_alphas)))
    print("KERNEL_OK")
</pallas_src>

<mosaic_0001>
module attributes {stable_mosaic.version = 11 : i64} {
  func.func @gru_chunk_kernel(%arg0: i32, %arg1: i32, %arg2: memref<8x8x32xbf16, #tpu.memory_space<vmem>>, %arg3: memref<32x96xbf16, #tpu.memory_space<vmem>>, %arg4: memref<1x96xf32, #tpu.memory_space<vmem>>, %arg5: memref<32x96xbf16, #tpu.memory_space<vmem>>, %arg6: memref<1x96xf32, #tpu.memory_space<vmem>>, %arg7: memref<8x8x32xf32, #tpu.memory_space<vmem>>, %arg8: memref<8x32xf32, #tpu.memory_space<vmem>>) attributes {dimension_semantics = [#tpu.dimension_semantics<parallel>, #tpu.dimension_semantics<arbitrary>], iteration_bounds = array<i64: 1, 1>, scalar_prefetch = 0 : i64, scratch_operands = 1 : i64, tpu.core_type = #tpu.core_type<tc>, window_params = [{transform_indices = @transform_0, window_bounds = array<i64: 8, 8, 32>}, {pipeline_mode = #tpu.pipeline_mode<synchronous>, transform_indices = @transform_1, window_bounds = array<i64: 32, 96>}, {pipeline_mode = #tpu.pipeline_mode<synchronous>, transform_indices = @transform_2, window_bounds = array<i64: 1, 96>}, {pipeline_mode = #tpu.pipeline_mode<synchronous>, transform_indices = @transform_3, window_bounds = array<i64: 32, 96>}, {pipeline_mode = #tpu.pipeline_mode<synchronous>, transform_indices = @transform_4, window_bounds = array<i64: 1, 96>}, {transform_indices = @transform_5, window_bounds = array<i64: 8, 8, 32>}]} {
    %c0_i32 = arith.constant 0 : i32
    %0 = arith.cmpi eq, %arg1, %c0_i32 : i32
    %1 = arith.extui %0 : i1 to i32
    %c0_i32_0 = arith.constant 0 : i32
    %2 = arith.cmpi ne, %1, %c0_i32_0 : i32
    scf.if %2 {
      %cst_64 = arith.constant 0.000000e+00 : f32
      %295 = vector.broadcast %cst_64 : f32 to vector<8x32xf32>
      %c0_65 = arith.constant 0 : index
      %c0_66 = arith.constant 0 : index
      %296 = vector.load %arg8[%c0_65, %c0_66] : memref<8x32xf32, #tpu.memory_space<vmem>>, vector<8x32xf32>
      tpu.vector_store %arg8[%c0_65, %c0_66], %295 {strides = array<i32>} : memref<8x32xf32, #tpu.memory_space<vmem>>, vector<8x32xf32>,
    } else {
    }
    %c0 = arith.constant 0 : index
    %c0_1 = arith.constant 0 : index
    %c0_2 = arith.constant 0 : index
    %3 = vector.load %arg2[%c0, %c0_1, %c0_2] : memref<8x8x32xbf16, #tpu.memory_space<vmem>>, vector<8x8x32xbf16>
    %4 = vector.shape_cast %3 : vector<8x8x32xbf16> to vector<64x32xbf16>
    %c0_3 = arith.constant 0 : index
    %c0_4 = arith.constant 0 : index
    %5 = vector.load %arg3[%c0_3, %c0_4] : memref<32x96xbf16, #tpu.memory_space<vmem>>, vector<32x96xbf16>
    %cst = arith.constant dense<0.000000e+00> : vector<64x96xf32>
    %6 = tpu.matmul %4, %5, %cst {dimension_numbers = #tpu.dot_dimension_numbers<[1], [0], [0], [1], [0, 0, 1, 1], [], []>} : vector<64x32xbf16>, vector<32x96xbf16>, vector<64x96xf32> -> vector<64x96xf32>
    %c0_5 = arith.constant 0 : index
    %c0_6 = arith.constant 0 : index
    %7 = vector.load %arg4[%c0_5, %c0_6] : memref<1x96xf32, #tpu.memory_space<vmem>>, vector<1x96xf32>
    %8 = vector.broadcast %7 : vector<1x96xf32> to vector<64x96xf32>
    %9 = arith.addf %6, %8 : vector<64x96xf32>
    %10 = vector.shape_cast %9 : vector<64x96xf32> to vector<8x8x96xf32>
    %c0_7 = arith.constant 0 : index
    %c0_8 = arith.constant 0 : index
    %11 = vector.load %arg5[%c0_7, %c0_8] : memref<32x96xbf16, #tpu.memory_space<vmem>>, vector<32x96xbf16>
    %c0_9 = arith.constant 0 : index
    %c0_10 = arith.constant 0 : index
    %12 = vector.load %arg6[%c0_9, %c0_10] : memref<1x96xf32, #tpu.memory_space<vmem>>, vector<1x96xf32>
    %c0_11 = arith.constant 0 : index
    %c0_12 = arith.constant 0 : index
    %13 = vector.load %arg8[%c0_11, %c0_12] : memref<8x32xf32, #tpu.memory_space<vmem>>, vector<8x32xf32>
    %14 = vector.extract_strided_slice %10 {offsets = [0, 0, 0], sizes = [8, 1, 96], strides = [1, 1, 1]} : vector<8x8x96xf32> to vector<8x1x96xf32>
    %15 = vector.shape_cast %14 : vector<8x1x96xf32> to vector<8x96xf32>
    %16 = arith.truncf %13 : vector<8x32xf32> to vector<8x32xbf16>
    %cst_13 = arith.constant dense<0.000000e+00> : vector<8x96xf32>
    %17 = tpu.matmul %16, %11, %cst_13 {dimension_numbers = #tpu.dot_dimension_numbers<[1], [0], [0], [1], [0, 0, 1, 1], [], []>} : vector<8x32xbf16>, vector<32x96xbf16>, vector<8x96xf32> -> vector<8x96xf32>
    %18 = vector.broadcast %12 : vector<1x96xf32> to vector<8x96xf32>
    %19 = arith.addf %17, %18 : vector<8x96xf32>
    %20 = vector.extract_strided_slice %15 {offsets = [0, 0], sizes = [8, 32], strides = [1, 1]} : vector<8x96xf32> to vector<8x32xf32>
    %21 = vector.extract_strided_slice %19 {offsets = [0, 0], sizes = [8, 32], strides = [1, 1]} : vector<8x96xf32> to vector<8x32xf32>
    %22 = arith.addf %20, %21 : vector<8x32xf32>
    %23 = arith.negf %22 : vector<8x32xf32>
    %24 = math.exp %23 : vector<8x32xf32>
    %cst_14 = arith.constant 1.000000e+00 : f32
    %25 = vector.broadcast %cst_14 : f32 to vector<8x32xf32>
    %26 = arith.addf %25, %24 : vector<8x32xf32>
    %27 = arith.divf %25, %26 : vector<8x32xf32>
    %28 = vector.extract_strided_slice %15 {offsets = [0, 32], sizes = [8, 32], strides = [1, 1]} : vector<8x96xf32> to vector<8x32xf32>
    %29 = vector.extract_strided_slice %19 {offsets = [0, 32], sizes = [8, 32], strides = [1, 1]} : vector<8x96xf32> to vector<8x32xf32>
    %30 = arith.addf %28, %29 : vector<8x32xf32>
    %31 = arith.negf %30 : vector<8x32xf32>
    %32 = math.exp %31 : vector<8x32xf32>
    %cst_15 = arith.constant 1.000000e+00 : f32
    %33 = vector.broadcast %cst_15 : f32 to vector<8x32xf32>
    %34 = arith.addf %33, %32 : vector<8x32xf32>
    %35 = arith.divf %33, %34 : vector<8x32xf32>
    %36 = vector.extract_strided_slice %15 {offsets = [0, 64], sizes = [8, 32], strides = [1, 1]} : vector<8x96xf32> to vector<8x32xf32>
    %37 = vector.extract_strided_slice %19 {offsets = [0, 64], sizes = [8, 32], strides = [1, 1]} : vector<8x96xf32> to vector<8x32xf32>
    %38 = arith.mulf %27, %37 : vector<8x32xf32>
    %39 = arith.addf %36, %38 : vector<8x32xf32>
    %40 = math.tanh %39 : vector<8x32xf32>
    %cst_16 = arith.constant 1.000000e+00 : f32
    %41 = vector.broadcast %cst_16 : f32 to vector<8x32xf32>
    %42 = arith.subf %41, %35 : vector<8x32xf32>
    %43 = arith.mulf %42, %40 : vector<8x32xf32>
    %44 = arith.mulf %35, %13 : vector<8x32xf32>
    %45 = arith.addf %43, %44 : vector<8x32xf32>
    %c0_17 = arith.constant 0 : index
    %c0_18 = arith.constant 0 : index
    %c0_19 = arith.constant 0 : index
    %46 = vector.load %arg7[%c0_17, %c0_18, %c0_19] : memref<8x8x32xf32, #tpu.memory_space<vmem>>, vector<8x1x32xf32>
    %47 = vector.shape_cast %46 : vector<8x1x32xf32> to vector<8x32xf32>
    %48 = vector.shape_cast %45 : vector<8x32xf32> to vector<8x1x32xf32>
    tpu.vector_store %arg7[%c0_17, %c0_18, %c0_19], %48 {strides = array<i32>} : memref<8x8x32xf32, #tpu.memory_space<vmem>>, vector<8x1x32xf32>,
    %49 = vector.extract_strided_slice %10 {offsets = [0, 1, 0], sizes = [8, 1, 96], strides = [1, 1, 1]} : vector<8x8x96xf32> to vector<8x1x96xf32>
    %50 = vector.shape_cast %49 : vector<8x1x96xf32> to vector<8x96xf32>
    %51 = arith.truncf %45 : vector<8x32xf32> to vector<8x32xbf16>
    %cst_20 = arith.constant dense<0.000000e+00> : vector<8x96xf32>
    %52 = tpu.matmul %51, %11, %cst_20 {dimension_numbers = #tpu.dot_dimension_numbers<[1], [0], [0], [1], [0, 0, 1, 1], [], []>} : vector<8x32xbf16>, vector<32x96xbf16>, vector<8x96xf32> -> vector<8x96xf32>
    %53 = vector.broadcast %12 : vector<1x96xf32> to vector<8x96xf32>
    %54 = arith.addf %52, %53 : vector<8x96xf32>
    %55 = vector.extract_strided_slice %50 {offsets = [0, 0], sizes = [8, 32], strides = [1, 1]} : vector<8x96xf32> to vector<8x32xf32>
    %56 = vector.extract_strided_slice %54 {offsets = [0, 0], sizes = [8, 32], strides = [1, 1]} : vector<8x96xf32> to vector<8x32xf32>
    %57 = arith.addf %55, %56 : vector<8x32xf32>
    %58 = arith.negf %57 : vector<8x32xf32>
    %59 = math.exp %58 : vector<8x32xf32>
    %cst_21 = arith.constant 1.000000e+00 : f32
    %60 = vector.broadcast %cst_21 : f32 to vector<8x32xf32>
    %61 = arith.addf %60, %59 : vector<8x32xf32>
    %62 = arith.divf %60, %61 : vector<8x32xf32>
    %63 = vector.extract_strided_slice %50 {offsets = [0, 32], sizes = [8, 32], strides = [1, 1]} : vector<8x96xf32> to vector<8x32xf32>
    %64 = vector.extract_strided_slice %54 {offsets = [0, 32], sizes = [8, 32], strides = [1, 1]} : vector<8x96xf32> to vector<8x32xf32>
    %65 = arith.addf %63, %64 : vector<8x32xf32>
    %66 = arith.negf %65 : vector<8x32xf32>
    %67 = math.exp %66 : vector<8x32xf32>
    %cst_22 = arith.constant 1.000000e+00 : f32
    %68 = vector.broadcast %cst_22 : f32 to vector<8x32xf32>
    %69 = arith.addf %68, %67 : vector<8x32xf32>
    %70 = arith.divf %68, %69 : vector<8x32xf32>
    %71 = vector.extract_strided_slice %50 {offsets = [0, 64], sizes = [8, 32], strides = [1, 1]} : vector<8x96xf32> to vector<8x32xf32>
    %72 = vector.extract_strided_slice %54 {offsets = [0, 64], sizes = [8, 32], strides = [1, 1]} : vector<8x96xf32> to vector<8x32xf32>
    %73 = arith.mulf %62, %72 : vector<8x32xf32>
    %74 = arith.addf %71, %73 : vector<8x32xf32>
    %75 = math.tanh %74 : vector<8x32xf32>
    %cst_23 = arith.constant 1.000000e+00 : f32
    %76 = vector.broadcast %cst_23 : f32 to vector<8x32xf32>
    %77 = arith.subf %76, %70 : vector<8x32xf32>
    %78 = arith.mulf %77, %75 : vector<8x32xf32>
    %79 = arith.mulf %70, %45 : vector<8x32xf32>
    %80 = arith.addf %78, %79 : vector<8x32xf32>
    %c0_24 = arith.constant 0 : index
    %c1 = arith.constant 1 : index
    %c0_25 = arith.constant 0 : index
    %81 = vector.load %arg7[%c0_24, %c1, %c0_25] : memref<8x8x32xf32, #tpu.memory_space<vmem>>, vector<8x1x32xf32>
    %82 = vector.shape_cast %81 : vector<8x1x32xf32> to vector<8x32xf32>
    %83 = vector.shape_cast %80 : vector<8x32xf32> to vector<8x1x32xf32>
    tpu.vector_store %arg7[%c0_24, %c1, %c0_25], %83 {strides = array<i32>} : memref<8x8x32xf32, #tpu.memory_space<vmem>>, vector<8x1x32xf32>,
    %84 = vector.extract_strided_slice %10 {offsets = [0, 2, 0], sizes = [8, 1, 96], strides = [1, 1, 1]} : vector<8x8x96xf32> to vector<8x1x96xf32>
    %85 = vector.shape_cast %84 : vector<8x1x96xf32> to vector<8x96xf32>
    %86 = arith.truncf %80 : vector<8x32xf32> to vector<8x32xbf16>
    %cst_26 = arith.constant dense<0.000000e+00> : vector<8x96xf32>
    %87 = tpu.matmul %86, %11, %cst_26 {dimension_numbers = #tpu.dot_dimension_numbers<[1], [0], [0], [1], [0, 0, 1, 1], [], []>} : vector<8x32xbf16>, vector<32x96xbf16>, vector<8x96xf32> -> vector<8x96xf32>
    %88 = vector.broadcast %12 : vector<1x96xf32> to vector<8x96xf32>
    %89 = arith.addf %87, %88 : vector<8x96xf32>
    %90 = vector.extract_strided_slice %85 {offsets = [0, 0], sizes = [8, 32], strides = [1, 1]} : vector<8x96xf32> to vector<8x32xf32>
    %91 = vector.extract_strided_slice %89 {offsets = [0, 0], sizes = [8, 32], strides = [1, 1]} : vector<8x96xf32> to vector<8x32xf32>
    %92 = arith.addf %90, %91 : vector<8x32xf32>
    %93 = arith.negf %92 : vector<8x32xf32>
    %94 = math.exp %93 : vector<8x32xf32>
    %cst_27 = arith.constant 1.000000e+00 : f32
    %95 = vector.broadcast %cst_27 : f32 to vector<8x32xf32>
    %96 = arith.addf %95, %94 : vector<8x32xf32>
    %97 = arith.divf %95, %96 : vector<8x32xf32>
    %98 = vector.extract_strided_slice %85 {offsets = [0, 32], sizes = [8, 32], strides = [1, 1]} : vector<8x96xf32> to vector<8x32xf32>
    %99 = vector.extract_strided_slice %89 {offsets = [0, 32], sizes = [8, 32], strides = [1, 1]} : vector<8x96xf32> to vector<8x32xf32>
    %100 = arith.addf %98, %99 : vector<8x32xf32>
    %101 = arith.negf %100 : vector<8x32xf32>
    %102 = math.exp %101 : vector<8x32xf32>
    %cst_28 = arith.constant 1.000000e+00 : f32
    %103 = vector.broadcast %cst_28 : f32 to vector<8x32xf32>
    %104 = arith.addf %103, %102 : vector<8x32xf32>
    %105 = arith.divf %103, %104 : vector<8x32xf32>
    %106 = vector.extract_strided_slice %85 {offsets = [0, 64], sizes = [8, 32], strides = [1, 1]} : vector<8x96xf32> to vector<8x32xf32>
    %107 = vector.extract_strided_slice %89 {offsets = [0, 64], sizes = [8, 32], strides = [1, 1]} : vector<8x96xf32> to vector<8x32xf32>
    %108 = arith.mulf %97, %107 : vector<8x32xf32>
    %109 = arith.addf %106, %108 : vector<8x32xf32>
    %110 = math.tanh %109 : vector<8x32xf32>
    %cst_29 = arith.constant 1.000000e+00 : f32
    %111 = vector.broadcast %cst_29 : f32 to vector<8x32xf32>
    %112 = arith.subf %111, %105 : vector<8x32xf32>
    %113 = arith.mulf %112, %110 : vector<8x32xf32>
    %114 = arith.mulf %105, %80 : vector<8x32xf32>
    %115 = arith.addf %113, %114 : vector<8x32xf32>
    %c0_30 = arith.constant 0 : index
    %c2 = arith.constant 2 : index
    %c0_31 = arith.constant 0 : index
    %116 = vector.load %arg7[%c0_30, %c2, %c0_31] : memref<8x8x32xf32, #tpu.memory_space<vmem>>, vector<8x1x32xf32>
    %117 = vector.shape_cast %116 : vector<8x1x32xf32> to vector<8x32xf32>
    %118 = vector.shape_cast %115 : vector<8x32xf32> to vector<8x1x32xf32>
    tpu.vector_store %arg7[%c0_30, %c2, %c0_31], %118 {strides = array<i32>} : memref<8x8x32xf32, #tpu.memory_space<vmem>>, vector<8x1x32xf32>,
    %119 = vector.extract_strided_slice %10 {offsets = [0, 3, 0], sizes = [8, 1, 96], strides = [1, 1, 1]} : vector<8x8x96xf32> to vector<8x1x96xf32>
    %120 = vector.shape_cast %119 : vector<8x1x96xf32> to vector<8x96xf32>
    %121 = arith.truncf %115 : vector<8x32xf32> to vector<8x32xbf16>
    %cst_32 = arith.constant dense<0.000000e+00> : vector<8x96xf32>
    %122 = tpu.matmul %121, %11, %cst_32 {dimension_numbers = #tpu.dot_dimension_numbers<[1], [0], [0], [1], [0, 0, 1, 1], [], []>} : vector<8x32xbf16>, vector<32x96xbf16>, vector<8x96xf32> -> vector<8x96xf32>
    %123 = vector.broadcast %12 : vector<1x96xf32> to vector<8x96xf32>
    %124 = arith.addf %122, %123 : vector<8x96xf32>
    %125 = vector.extract_strided_slice %120 {offsets = [0, 0], sizes = [8, 32], strides = [1, 1]} : vector<8x96xf32> to vector<8x32xf32>
    %126 = vector.extract_strided_slice %124 {offsets = [0, 0], sizes = [8, 32], strides = [1, 1]} : vector<8x96xf32> to vector<8x32xf32>
    %127 = arith.addf %125, %126 : vector<8x32xf32>
    %128 = arith.negf %127 : vector<8x32xf32>
    %129 = math.exp %128 : vector<8x32xf32>
    %cst_33 = arith.constant 1.000000e+00 : f32
    %130 = vector.broadcast %cst_33 : f32 to vector<8x32xf32>
    %131 = arith.addf %130, %129 : vector<8x32xf32>
    %132 = arith.divf %130, %131 : vector<8x32xf32>
    %133 = vector.extract_strided_slice %120 {offsets = [0, 32], sizes = [8, 32], strides = [1, 1]} : vector<8x96xf32> to vector<8x32xf32>
    %134 = vector.extract_strided_slice %124 {offsets = [0, 32], sizes = [8, 32], strides = [1, 1]} : vector<8x96xf32> to vector<8x32xf32>
    %135 = arith.addf %133, %134 : vector<8x32xf32>
    %136 = arith.negf %135 : vector<8x32xf32>
    %137 = math.exp %136 : vector<8x32xf32>
    %cst_34 = arith.constant 1.000000e+00 : f32
    %138 = vector.broadcast %cst_34 : f32 to vector<8x32xf32>
    %139 = arith.addf %138, %137 : vector<8x32xf32>
    %140 = arith.divf %138, %139 : vector<8x32xf32>
    %141 = vector.extract_strided_slice %120 {offsets = [0, 64], sizes = [8, 32], strides = [1, 1]} : vector<8x96xf32> to vector<8x32xf32>
    %142 = vector.extract_strided_slice %124 {offsets = [0, 64], sizes = [8, 32], strides = [1, 1]} : vector<8x96xf32> to vector<8x32xf32>
    %143 = arith.mulf %132, %142 : vector<8x32xf32>
    %144 = arith.addf %141, %143 : vector<8x32xf32>
    %145 = math.tanh %144 : vector<8x32xf32>
    %cst_35 = arith.constant 1.000000e+00 : f32
    %146 = vector.broadcast %cst_35 : f32 to vector<8x32xf32>
    %147 = arith.subf %146, %140 : vector<8x32xf32>
    %148 = arith.mulf %147, %145 : vector<8x32xf32>
    %149 = arith.mulf %140, %115 : vector<8x32xf32>
    %150 = arith.addf %148, %149 : vector<8x32xf32>
    %c0_36 = arith.constant 0 : index
    %c3 = arith.constant 3 : index
    %c0_37 = arith.constant 0 : index
    %151 = vector.load %arg7[%c0_36, %c3, %c0_37] : memref<8x8x32xf32, #tpu.memory_space<vmem>>, vector<8x1x32xf32>
    %152 = vector.shape_cast %151 : vector<8x1x32xf32> to vector<8x32xf32>
    %153 = vector.shape_cast %150 : vector<8x32xf32> to vector<8x1x32xf32>
    tpu.vector_store %arg7[%c0_36, %c3, %c0_37], %153 {strides = array<i32>} : memref<8x8x32xf32, #tpu.memory_space<vmem>>, vector<8x1x32xf32>,
    %154 = vector.extract_strided_slice %10 {offsets = [0, 4, 0], sizes = [8, 1, 96], strides = [1, 1, 1]} : vector<8x8x96xf32> to vector<8x1x96xf32>
    %155 = vector.shape_cast %154 : vector<8x1x96xf32> to vector<8x96xf32>
    %156 = arith.truncf %150 : vector<8x32xf32> to vector<8x32xbf16>
    %cst_38 = arith.constant dense<0.000000e+00> : vector<8x96xf32>
    %157 = tpu.matmul %156, %11, %cst_38 {dimension_numbers = #tpu.dot_dimension_numbers<[1], [0], [0], [1], [0, 0, 1, 1], [], []>} : vector<8x32xbf16>, vector<32x96xbf16>, vector<8x96xf32> -> vector<8x96xf32>
    %158 = vector.broadcast %12 : vector<1x96xf32> to vector<8x96xf32>
    %159 = arith.addf %157, %158 : vector<8x96xf32>
    %160 = vector.extract_strided_slice %155 {offsets = [0, 0], sizes = [8, 32], strides = [1, 1]} : vector<8x96xf32> to vector<8x32xf32>
    %161 = vector.extract_strided_slice %159 {offsets = [0, 0], sizes = [8, 32], strides = [1, 1]} : vector<8x96xf32> to vector<8x32xf32>
    %162 = arith.addf %160, %161 : vector<8x32xf32>
    %163 = arith.negf %162 : vector<8x32xf32>
    %164 = math.exp %163 : vector<8x32xf32>
    %cst_39 = arith.constant 1.000000e+00 : f32
    %165 = vector.broadcast %cst_39 : f32 to vector<8x32xf32>
    %166 = arith.addf %165, %164 : vector<8x32xf32>
    %167 = arith.divf %165, %166 : vector<8x32xf32>
    %168 = vector.extract_strided_slice %155 {offsets = [0, 32], sizes = [8, 32], strides = [1, 1]} : vector<8x96xf32> to vector<8x32xf32>
    %169 = vector.extract_strided_slice %159 {offsets = [0, 32], sizes = [8, 32], strides = [1, 1]} : vector<8x96xf32> to vector<8x32xf32>
    %170 = arith.addf %168, %169 : vector<8x32xf32>
    %171 = arith.negf %170 : vector<8x32xf32>
    %172 = math.exp %171 : vector<8x32xf32>
    %cst_40 = arith.constant 1.000000e+00 : f32
    %173 = vector.broadcast %cst_40 : f32 to vector<8x32xf32>
    %174 = arith.addf %173, %172 : vector<8x32xf32>
    %175 = arith.divf %173, %174 : vector<8x32xf32>
    %176 = vector.extract_strided_slice %155 {offsets = [0, 64], sizes = [8, 32], strides = [1, 1]} : vector<8x96xf32> to vector<8x32xf32>
    %177 = vector.extract_strided_slice %159 {offsets = [0, 64], sizes = [8, 32], strides = [1, 1]} : vector<8x96xf32> to vector<8x32xf32>
    %178 = arith.mulf %167, %177 : vector<8x32xf32>
    %179 = arith.addf %176, %178 : vector<8x32xf32>
    %180 = math.tanh %179 : vector<8x32xf32>
    %cst_41 = arith.constant 1.000000e+00 : f32
    %181 = vector.broadcast %cst_41 : f32 to vector<8x32xf32>
    %182 = arith.subf %181, %175 : vector<8x32xf32>
    %183 = arith.mulf %182, %180 : vector<8x32xf32>
    %184 = arith.mulf %175, %150 : vector<8x32xf32>
    %185 = arith.addf %183, %184 : vector<8x32xf32>
    %c0_42 = arith.constant 0 : index
    %c4 = arith.constant 4 : index
    %c0_43 = arith.constant 0 : index
    %186 = vector.load %arg7[%c0_42, %c4, %c0_43] : memref<8x8x32xf32, #tpu.memory_space<vmem>>, vector<8x1x32xf32>
    %187 = vector.shape_cast %186 : vector<8x1x32xf32> to vector<8x32xf32>
    %188 = vector.shape_cast %185 : vector<8x32xf32> to vector<8x1x32xf32>
    tpu.vector_store %arg7[%c0_42, %c4, %c0_43], %188 {strides = array<i32>} : memref<8x8x32xf32, #tpu.memory_space<vmem>>, vector<8x1x32xf32>,
    %189 = vector.extract_strided_slice %10 {offsets = [0, 5, 0], sizes = [8, 1, 96], strides = [1, 1, 1]} : vector<8x8x96xf32> to vector<8x1x96xf32>
    %190 = vector.shape_cast %189 : vector<8x1x96xf32> to vector<8x96xf32>
    %191 = arith.truncf %185 : vector<8x32xf32> to vector<8x32xbf16>
    %cst_44 = arith.constant dense<0.000000e+00> : vector<8x96xf32>
    %192 = tpu.matmul %191, %11, %cst_44 {dimension_numbers = #tpu.dot_dimension_numbers<[1], [0], [0], [1], [0, 0, 1, 1], [], []>} : vector<8x32xbf16>, vector<32x96xbf16>, vector<8x96xf32> -> vector<8x96xf32>
    %193 = vector.broadcast %12 : vector<1x96xf32> to vector<8x96xf32>
    %194 = arith.addf %192, %193 : vector<8x96xf32>
    %195 = vector.extract_strided_slice %190 {offsets = [0, 0], sizes = [8, 32], strides = [1, 1]} : vector<8x96xf32> to vector<8x32xf32>
    %196 = vector.extract_strided_slice %194 {offsets = [0, 0], sizes = [8, 32], strides = [1, 1]} : vector<8x96xf32> to vector<8x32xf32>
    %197 = arith.addf %195, %196 : vector<8x32xf32>
    %198 = arith.negf %197 : vector<8x32xf32>
    %199 = math.exp %198 : vector<8x32xf32>
    %cst_45 = arith.constant 1.000000e+00 : f32
    %200 = vector.broadcast %cst_45 : f32 to vector<8x32xf32>
    %201 = arith.addf %200, %199 : vector<8x32xf32>
    %202 = arith.divf %200, %201 : vector<8x32xf32>
    %203 = vector.extract_strided_slice %190 {offsets = [0, 32], sizes = [8, 32], strides = [1, 1]} : vector<8x96xf32> to vector<8x32xf32>
    %204 = vector.extract_strided_slice %194 {offsets = [0, 32], sizes = [8, 32], strides = [1, 1]} : vector<8x96xf32> to vector<8x32xf32>
    %205 = arith.addf %203, %204 : vector<8x32xf32>
    %206 = arith.negf %205 : vector<8x32xf32>
    %207 = math.exp %206 : vector<8x32xf32>
    %cst_46 = arith.constant 1.000000e+00 : f32
    %208 = vector.broadcast %cst_46 : f32 to vector<8x32xf32>
    %209 = arith.addf %208, %207 : vector<8x32xf32>
    %210 = arith.divf %208, %209 : vector<8x32xf32>
    %211 = vector.extract_strided_slice %190 {offsets = [0, 64], sizes = [8, 32], strides = [1, 1]} : vector<8x96xf32> to vector<8x32xf32>
    %212 = vector.extract_strided_slice %194 {offsets = [0, 64], sizes = [8, 32], strides = [1, 1]} : vector<8x96xf32> to vector<8x32xf32>
    %213 = arith.mulf %202, %212 : vector<8x32xf32>
    %214 = arith.addf %211, %213 : vector<8x32xf32>
    %215 = math.tanh %214 : vector<8x32xf32>
    %cst_47 = arith.constant 1.000000e+00 : f32
    %216 = vector.broadcast %cst_47 : f32 to vector<8x32xf32>
    %217 = arith.subf %216, %210 : vector<8x32xf32>
    %218 = arith.mulf %217, %215 : vector<8x32xf32>
    %219 = arith.mulf %210, %185 : vector<8x32xf32>
    %220 = arith.addf %218, %219 : vector<8x32xf32>
    %c0_48 = arith.constant 0 : index
    %c5 = arith.constant 5 : index
    %c0_49 = arith.constant 0 : index
    %221 = vector.load %arg7[%c0_48, %c5, %c0_49] : memref<8x8x32xf32, #tpu.memory_space<vmem>>, vector<8x1x32xf32>
    %222 = vector.shape_cast %221 : vector<8x1x32xf32> to vector<8x32xf32>
    %223 = vector.shape_cast %220 : vector<8x32xf32> to vector<8x1x32xf32>
    tpu.vector_store %arg7[%c0_48, %c5, %c0_49], %223 {strides = array<i32>} : memref<8x8x32xf32, #tpu.memory_space<vmem>>, vector<8x1x32xf32>,
    %224 = vector.extract_strided_slice %10 {offsets = [0, 6, 0], sizes = [8, 1, 96], strides = [1, 1, 1]} : vector<8x8x96xf32> to vector<8x1x96xf32>
    %225 = vector.shape_cast %224 : vector<8x1x96xf32> to vector<8x96xf32>
    %226 = arith.truncf %220 : vector<8x32xf32> to vector<8x32xbf16>
    %cst_50 = arith.constant dense<0.000000e+00> : vector<8x96xf32>
    %227 = tpu.matmul %226, %11, %cst_50 {dimension_numbers = #tpu.dot_dimension_numbers<[1], [0], [0], [1], [0, 0, 1, 1], [], []>} : vector<8x32xbf16>, vector<32x96xbf16>, vector<8x96xf32> -> vector<8x96xf32>
    %228 = vector.broadcast %12 : vector<1x96xf32> to vector<8x96xf32>
    %229 = arith.addf %227, %228 : vector<8x96xf32>
    %230 = vector.extract_strided_slice %225 {offsets = [0, 0], sizes = [8, 32], strides = [1, 1]} : vector<8x96xf32> to vector<8x32xf32>
    %231 = vector.extract_strided_slice %229 {offsets = [0, 0], sizes = [8, 32], strides = [1, 1]} : vector<8x96xf32> to vector<8x32xf32>
    %232 = arith.addf %230, %231 : vector<8x32xf32>
    %233 = arith.negf %232 : vector<8x32xf32>
    %234 = math.exp %233 : vector<8x32xf32>
    %cst_51 = arith.constant 1.000000e+00 : f32
    %235 = vector.broadcast %cst_51 : f32 to vector<8x32xf32>
    %236 = arith.addf %235, %234 : vector<8x32xf32>
    %237 = arith.divf %235, %236 : vector<8x32xf32>
    %238 = vector.extract_strided_slice %225 {offsets = [0, 32], sizes = [8, 32], strides = [1, 1]} : vector<8x96xf32> to vector<8x32xf32>
    %239 = vector.extract_strided_slice %229 {offsets = [0, 32], sizes = [8, 32], strides = [1, 1]} : vector<8x96xf32> to vector<8x32xf32>
    %240 = arith.addf %238, %239 : vector<8x32xf32>
    %241 = arith.negf %240 : vector<8x32xf32>
    %242 = math.exp %241 : vector<8x32xf32>
    %cst_52 = arith.constant 1.000000e+00 : f32
    %243 = vector.broadcast %cst_52 : f32 to vector<8x32xf32>
    %244 = arith.addf %243, %242 : vector<8x32xf32>
    %245 = arith.divf %243, %244 : vector<8x32xf32>
    %246 = vector.extract_strided_slice %225 {offsets = [0, 64], sizes = [8, 32], strides = [1, 1]} : vector<8x96xf32> to vector<8x32xf32>
    %247 = vector.extract_strided_slice %229 {offsets = [0, 64], sizes = [8, 32], strides = [1, 1]} : vector<8x96xf32> to vector<8x32xf32>
    %248 = arith.mulf %237, %247 : vector<8x32xf32>
    %249 = arith.addf %246, %248 : vector<8x32xf32>
    %250 = math.tanh %249 : vector<8x32xf32>
    %cst_53 = arith.constant 1.000000e+00 : f32
    %251 = vector.broadcast %cst_53 : f32 to vector<8x32xf32>
    %252 = arith.subf %251, %245 : vector<8x32xf32>
    %253 = arith.mulf %252, %250 : vector<8x32xf32>
    %254 = arith.mulf %245, %220 : vector<8x32xf32>
    %255 = arith.addf %253, %254 : vector<8x32xf32>
    %c0_54 = arith.constant 0 : index
    %c6 = arith.constant 6 : index
    %c0_55 = arith.constant 0 : index
    %256 = vector.load %arg7[%c0_54, %c6, %c0_55] : memref<8x8x32xf32, #tpu.memory_space<vmem>>, vector<8x1x32xf32>
    %257 = vector.shape_cast %256 : vector<8x1x32xf32> to vector<8x32xf32>
    %258 = vector.shape_cast %255 : vector<8x32xf32> to vector<8x1x32xf32>
    tpu.vector_store %arg7[%c0_54, %c6, %c0_55], %258 {strides = array<i32>} : memref<8x8x32xf32, #tpu.memory_space<vmem>>, vector<8x1x32xf32>,
    %259 = vector.extract_strided_slice %10 {offsets = [0, 7, 0], sizes = [8, 1, 96], strides = [1, 1, 1]} : vector<8x8x96xf32> to vector<8x1x96xf32>
    %260 = vector.shape_cast %259 : vector<8x1x96xf32> to vector<8x96xf32>
    %261 = arith.truncf %255 : vector<8x32xf32> to vector<8x32xbf16>
    %cst_56 = arith.constant dense<0.000000e+00> : vector<8x96xf32>
    %262 = tpu.matmul %261, %11, %cst_56 {dimension_numbers = #tpu.dot_dimension_numbers<[1], [0], [0], [1], [0, 0, 1, 1], [], []>} : vector<8x32xbf16>, vector<32x96xbf16>, vector<8x96xf32> -> vector<8x96xf32>
    %263 = vector.broadcast %12 : vector<1x96xf32> to vector<8x96xf32>
    %264 = arith.addf %262, %263 : vector<8x96xf32>
    %265 = vector.extract_strided_slice %260 {offsets = [0, 0], sizes = [8, 32], strides = [1, 1]} : vector<8x96xf32> to vector<8x32xf32>
    %266 = vector.extract_strided_slice %264 {offsets = [0, 0], sizes = [8, 32], strides = [1, 1]} : vector<8x96xf32> to vector<8x32xf32>
    %267 = arith.addf %265, %266 : vector<8x32xf32>
    %268 = arith.negf %267 : vector<8x32xf32>
    %269 = math.exp %268 : vector<8x32xf32>
    %cst_57 = arith.constant 1.000000e+00 : f32
    %270 = vector.broadcast %cst_57 : f32 to vector<8x32xf32>
    %271 = arith.addf %270, %269 : vector<8x32xf32>
    %272 = arith.divf %270, %271 : vector<8x32xf32>
    %273 = vector.extract_strided_slice %260 {offsets = [0, 32], sizes = [8, 32], strides = [1, 1]} : vector<8x96xf32> to vector<8x32xf32>
    %274 = vector.extract_strided_slice %264 {offsets = [0, 32], sizes = [8, 32], strides = [1, 1]} : vector<8x96xf32> to vector<8x32xf32>
    %275 = arith.addf %273, %274 : vector<8x32xf32>
    %276 = arith.negf %275 : vector<8x32xf32>
    %277 = math.exp %276 : vector<8x32xf32>
    %cst_58 = arith.constant 1.000000e+00 : f32
    %278 = vector.broadcast %cst_58 : f32 to vector<8x32xf32>
    %279 = arith.addf %278, %277 : vector<8x32xf32>
    %280 = arith.divf %278, %279 : vector<8x32xf32>
    %281 = vector.extract_strided_slice %260 {offsets = [0, 64], sizes = [8, 32], strides = [1, 1]} : vector<8x96xf32> to vector<8x32xf32>
    %282 = vector.extract_strided_slice %264 {offsets = [0, 64], sizes = [8, 32], strides = [1, 1]} : vector<8x96xf32> to vector<8x32xf32>
    %283 = arith.mulf %272, %282 : vector<8x32xf32>
    %284 = arith.addf %281, %283 : vector<8x32xf32>
    %285 = math.tanh %284 : vector<8x32xf32>
    %cst_59 = arith.constant 1.000000e+00 : f32
    %286 = vector.broadcast %cst_59 : f32 to vector<8x32xf32>
    %287 = arith.subf %286, %280 : vector<8x32xf32>
    %288 = arith.mulf %287, %285 : vector<8x32xf32>
    %289 = arith.mulf %280, %255 : vector<8x32xf32>
    %290 = arith.addf %288, %289 : vector<8x32xf32>
    %c0_60 = arith.constant 0 : index
    %c7 = arith.constant 7 : index
    %c0_61 = arith.constant 0 : index
    %291 = vector.load %arg7[%c0_60, %c7, %c0_61] : memref<8x8x32xf32, #tpu.memory_space<vmem>>, vector<8x1x32xf32>
    %292 = vector.shape_cast %291 : vector<8x1x32xf32> to vector<8x32xf32>
    %293 = vector.shape_cast %290 : vector<8x32xf32> to vector<8x1x32xf32>
    tpu.vector_store %arg7[%c0_60, %c7, %c0_61], %293 {strides = array<i32>} : memref<8x8x32xf32, #tpu.memory_space<vmem>>, vector<8x1x32xf32>,
    %c0_62 = arith.constant 0 : index
    %c0_63 = arith.constant 0 : index
    %294 = vector.load %arg8[%c0_62, %c0_63] : memref<8x32xf32, #tpu.memory_space<vmem>>, vector<8x32xf32>
    tpu.vector_store %arg8[%c0_62, %c0_63], %290 {strides = array<i32>} : memref<8x32xf32, #tpu.memory_space<vmem>>, vector<8x32xf32>,
    return
  }
  func.func @transform_0(%arg0: i32, %arg1: i32) -> (i32, i32, i32) {
    %c0_i32 = arith.constant 0 : i32
    %c0_i32_0 = arith.constant 0 : i32
    return %arg0, %arg1, %c0_i32 : i32, i32, i32
  }
  func.func @transform_1(%arg0: i32, %arg1: i32) -> (i32, i32) {
    %c0_i32 = arith.constant 0 : i32
    %c0_i32_0 = arith.constant 0 : i32
    %c0_i32_1 = arith.constant 0 : i32
    return %c0_i32, %c0_i32_0 : i32, i32
  }
  func.func @transform_2(%arg0: i32, %arg1: i32) -> (i32, i32) {
    %c0_i32 = arith.constant 0 : i32
    %c0_i32_0 = arith.constant 0 : i32
    %c0_i32_1 = arith.constant 0 : i32
    return %c0_i32, %c0_i32_0 : i32, i32
  }
  func.func @transform_3(%arg0: i32, %arg1: i32) -> (i32, i32) {
    %c0_i32 = arith.constant 0 : i32
    %c0_i32_0 = arith.constant 0 : i32
    %c0_i32_1 = arith.constant 0 : i32
    return %c0_i32, %c0_i32_0 : i32, i32
  }
  func.func @transform_4(%arg0: i32, %arg1: i32) -> (i32, i32) {
    %c0_i32 = arith.constant 0 : i32
    %c0_i32_0 = arith.constant 0 : i32
    %c0_i32_1 = arith.constant 0 : i32
    return %c0_i32, %c0_i32_0 : i32, i32
  }
  func.func @transform_5(%arg0: i32, %arg1: i32) -> (i32, i32, i32) {
    %c0_i32 = arith.constant 0 : i32
    %c0_i32_0 = arith.constant 0 : i32
    return %arg0, %arg1, %c0_i32 : i32, i32, i32
  }
}

module attributes {stable_mosaic.version = 11 : i64} {
  func.func @att_pool_kernel(%arg0: i32, %arg1: memref<8x8x32xf32, #tpu.memory_space<vmem>>, %arg2: memref<8x1xi32, #tpu.memory_space<vmem>>, %arg3: memref<32x16xbf16, #tpu.memory_space<vmem>>, %arg4: memref<1x16xf32, #tpu.memory_space<vmem>>, %arg5: memref<1x16xf32, #tpu.memory_space<vmem>>, %arg6: memref<8x8xf32, #tpu.memory_space<vmem>>, %arg7: memref<8x32xf32, #tpu.memory_space<vmem>>) attributes {dimension_semantics = [#tpu.dimension_semantics<parallel>], iteration_bounds = array<i64: 1>, scalar_prefetch = 0 : i64, scratch_operands = 0 : i64, tpu.core_type = #tpu.core_type<tc>, window_params = [{transform_indices = @transform_0, window_bounds = array<i64: 8, 8, 32>}, {transform_indices = @transform_1, window_bounds = array<i64: 8, 1>}, {pipeline_mode = #tpu.pipeline_mode<synchronous>, transform_indices = @transform_2, window_bounds = array<i64: 32, 16>}, {pipeline_mode = #tpu.pipeline_mode<synchronous>, transform_indices = @transform_3, window_bounds = array<i64: 1, 16>}, {pipeline_mode = #tpu.pipeline_mode<synchronous>, transform_indices = @transform_4, window_bounds = array<i64: 1, 16>}, {transform_indices = @transform_5, window_bounds = array<i64: 8, 8>}, {transform_indices = @transform_6, window_bounds = array<i64: 8, 32>}]} {
    %c0 = arith.constant 0 : index
    %c0_0 = arith.constant 0 : index
    %c0_1 = arith.constant 0 : index
    %0 = vector.load %arg1[%c0, %c0_0, %c0_1] : memref<8x8x32xf32, #tpu.memory_space<vmem>>, vector<8x8x32xf32>
    %1 = vector.shape_cast %0 : vector<8x8x32xf32> to vector<64x32xf32>
    %2 = arith.truncf %1 : vector<64x32xf32> to vector<64x32xbf16>
    %c0_2 = arith.constant 0 : index
    %c0_3 = arith.constant 0 : index
    %3 = vector.load %arg3[%c0_2, %c0_3] : memref<32x16xbf16, #tpu.memory_space<vmem>>, vector<32x16xbf16>
    %cst = arith.constant dense<0.000000e+00> : vector<64x16xf32>
    %4 = tpu.matmul %2, %3, %cst {dimension_numbers = #tpu.dot_dimension_numbers<[1], [0], [0], [1], [0, 0, 1, 1], [], []>} : vector<64x32xbf16>, vector<32x16xbf16>, vector<64x16xf32> -> vector<64x16xf32>
    %c0_4 = arith.constant 0 : index
    %c0_5 = arith.constant 0 : index
    %5 = vector.load %arg4[%c0_4, %c0_5] : memref<1x16xf32, #tpu.memory_space<vmem>>, vector<1x16xf32>
    %6 = vector.broadcast %5 : vector<1x16xf32> to vector<64x16xf32>
    %7 = arith.addf %4, %6 : vector<64x16xf32>
    %8 = math.tanh %7 : vector<64x16xf32>
    %9 = vector.shape_cast %8 : vector<64x16xf32> to vector<8x8x16xf32>
    %c0_6 = arith.constant 0 : index
    %c0_7 = arith.constant 0 : index
    %10 = vector.load %arg5[%c0_6, %c0_7] : memref<1x16xf32, #tpu.memory_space<vmem>>, vector<1x16xf32>
    %11 = vector.shape_cast %10 : vector<1x16xf32> to vector<1x1x16xf32>
    %12 = vector.broadcast %11 : vector<1x1x16xf32> to vector<8x8x16xf32>
    %13 = arith.mulf %9, %12 : vector<8x8x16xf32>
    %cst_8 = arith.constant dense<0.000000e+00> : vector<8x8xf32>
    %14 = vector.multi_reduction <add>, %13, %cst_8 [2] : vector<8x8x16xf32> to vector<8x8xf32>
    %15 = tpu.iota {dimensions = array<i32: 1>} : vector<8x8xi32>
    %c0_9 = arith.constant 0 : index
    %c0_10 = arith.constant 0 : index
    %16 = vector.load %arg2[%c0_9, %c0_10] : memref<8x1xi32, #tpu.memory_space<vmem>>, vector<8x1xi32>
    %17 = vector.broadcast %16 : vector<8x1xi32> to vector<8x8xi32>
    %18 = arith.cmpi slt, %15, %17 : vector<8x8xi32>
    %cst_11 = arith.constant -1.000000e+30 : f32
    %19 = vector.broadcast %cst_11 : f32 to vector<8x8xf32>
    %20 = arith.select %18, %14, %19 : vector<8x8xi1>, vector<8x8xf32>
    %cst_12 = arith.constant dense<0xFF800000> : vector<8xf32>
    %21 = vector.multi_reduction <maximumf>, %20, %cst_12 [1] : vector<8x8xf32> to vector<8xf32>
    %22 = vector.shape_cast %21 : vector<8xf32> to vector<8x1xf32>
    %23 = vector.broadcast %22 : vector<8x1xf32> to vector<8x8xf32>
    %24 = arith.subf %20, %23 : vector<8x8xf32>
    %25 = math.exp %24 : vector<8x8xf32>
    %cst_13 = arith.constant 0.000000e+00 : f32
    %26 = vector.broadcast %cst_13 : f32 to vector<8x8xf32>
    %27 = arith.select %18, %25, %26 : vector<8x8xi1>, vector<8x8xf32>
    %cst_14 = arith.constant dense<0.000000e+00> : vector<8xf32>
    %28 = vector.multi_reduction <add>, %27, %cst_14 [1] : vector<8x8xf32> to vector<8xf32>
    %29 = vector.shape_cast %28 : vector<8xf32> to vector<8x1xf32>
    %cst_15 = arith.constant 1.000000e-30 : f32
    %30 = vector.broadcast %cst_15 : f32 to vector<8x1xf32>
    %31 = arith.maximumf %29, %30 : vector<8x1xf32>
    %32 = tpu.reciprocal %31 {approx = true} : vector<8x1xf32> -> vector<8x1xf32>
    %33 = vector.broadcast %32 : vector<8x1xf32> to vector<8x8xf32>
    %34 = arith.mulf %27, %33 : vector<8x8xf32>
    %c0_16 = arith.constant 0 : index
    %c0_17 = arith.constant 0 : index
    %35 = vector.load %arg6[%c0_16, %c0_17] : memref<8x8xf32, #tpu.memory_space<vmem>>, vector<8x8xf32>
    tpu.vector_store %arg6[%c0_16, %c0_17], %34 {strides = array<i32>} : memref<8x8xf32, #tpu.memory_space<vmem>>, vector<8x8xf32>,
    %36 = vector.shape_cast %27 : vector<8x8xf32> to vector<8x8x1xf32>
    %37 = vector.broadcast %36 : vector<8x8x1xf32> to vector<8x8x32xf32>
    %38 = arith.mulf %0, %37 : vector<8x8x32xf32>
    %cst_18 = arith.constant dense<0.000000e+00> : vector<8x32xf32>
    %39 = vector.multi_reduction <add>, %38, %cst_18 [1] : vector<8x8x32xf32> to vector<8x32xf32>
    %40 = vector.broadcast %32 : vector<8x1xf32> to vector<8x32xf32>
    %41 = arith.mulf %39, %40 : vector<8x32xf32>
    %c0_19 = arith.constant 0 : index
    %c0_20 = arith.constant 0 : index
    %42 = vector.load %arg7[%c0_19, %c0_20] : memref<8x32xf32, #tpu.memory_space<vmem>>, vector<8x32xf32>
    tpu.vector_store %arg7[%c0_19, %c0_20], %41 {strides = array<i32>} : memref<8x32xf32, #tpu.memory_space<vmem>>, vector<8x32xf32>,
    return
  }
  func.func @transform_0(%arg0: i32) -> (i32, i32, i32) {
    %c0_i32 = arith.constant 0 : i32
    %c0_i32_0 = arith.constant 0 : i32
    %c0_i32_1 = arith.constant 0 : i32
    return %arg0, %c0_i32, %c0_i32_0 : i32, i32, i32
  }
  func.func @transform_1(%arg0: i32) -> (i32, i32) {
    %c0_i32 = arith.constant 0 : i32
    %c0_i32_0 = arith.constant 0 : i32
    return %arg0, %c0_i32 : i32, i32
  }
  func.func @transform_2(%arg0: i32) -> (i32, i32) {
    %c0_i32 = arith.constant 0 : i32
    %c0_i32_0 = arith.constant 0 : i32
    %c0_i32_1 = arith.constant 0 : i32
    return %c0_i32, %c0_i32_0 : i32, i32
  }
  func.func @transform_3(%arg0: i32) -> (i32, i32) {
    %c0_i32 = arith.constant 0 : i32
    %c0_i32_0 = arith.constant 0 : i32
    %c0_i32_1 = arith.constant 0 : i32
    return %c0_i32, %c0_i32_0 : i32, i32
  }
  func.func @transform_4(%arg0: i32) -> (i32, i32) {
    %c0_i32 = arith.constant 0 : i32
    %c0_i32_0 = arith.constant 0 : i32
    %c0_i32_1 = arith.constant 0 : i32
    return %c0_i32, %c0_i32_0 : i32, i32
  }
  func.func @transform_5(%arg0: i32) -> (i32, i32) {
    %c0_i32 = arith.constant 0 : i32
    %c0_i32_0 = arith.constant 0 : i32
    return %arg0, %c0_i32 : i32, i32
  }
  func.func @transform_6(%arg0: i32) -> (i32, i32) {
    %c0_i32 = arith.constant 0 : i32
    %c0_i32_0 = arith.constant 0 : i32
    return %arg0, %c0_i32 : i32, i32
  }
}

module attributes {stable_mosaic.version = 11 : i64} {
  func.func @gru_chunk_kernel(%arg0: i32, %arg1: i32, %arg2: memref<2x4x64xbf16, #tpu.memory_space<vmem>>, %arg3: memref<64x96xbf16, #tpu.memory_space<vmem>>, %arg4: memref<1x96xf32, #tpu.memory_space<vmem>>, %arg5: memref<32x96xbf16, #tpu.memory_space<vmem>>, %arg6: memref<1x96xf32, #tpu.memory_space<vmem>>, %arg7: memref<2x4x32xf32, #tpu.memory_space<vmem>>, %arg8: memref<2x32xf32, #tpu.memory_space<vmem>>) attributes {dimension_semantics = [#tpu.dimension_semantics<parallel>, #tpu.dimension_semantics<arbitrary>], iteration_bounds = array<i64: 1, 1>, scalar_prefetch = 0 : i64, scratch_operands = 1 : i64, tpu.core_type = #tpu.core_type<tc>, window_params = [{transform_indices = @transform_0, window_bounds = array<i64: 2, 4, 64>}, {pipeline_mode = #tpu.pipeline_mode<synchronous>, transform_indices = @transform_1, window_bounds = array<i64: 64, 96>}, {pipeline_mode = #tpu.pipeline_mode<synchronous>, transform_indices = @transform_2, window_bounds = array<i64: 1, 96>}, {pipeline_mode = #tpu.pipeline_mode<synchronous>, transform_indices = @transform_3, window_bounds = array<i64: 32, 96>}, {pipeline_mode = #tpu.pipeline_mode<synchronous>, transform_indices = @transform_4, window_bounds = array<i64: 1, 96>}, {transform_indices = @transform_5, window_bounds = array<i64: 2, 4, 32>}]} {
    %c0_i32 = arith.constant 0 : i32
    %0 = arith.cmpi eq, %arg1, %c0_i32 : i32
    %1 = arith.extui %0 : i1 to i32
    %c0_i32_0 = arith.constant 0 : i32
    %2 = arith.cmpi ne, %1, %c0_i32_0 : i32
    scf.if %2 {
      %cst_40 = arith.constant 0.000000e+00 : f32
      %155 = vector.broadcast %cst_40 : f32 to vector<2x32xf32>
      %c0_41 = arith.constant 0 : index
      %c0_42 = arith.constant 0 : index
      %156 = vector.load %arg8[%c0_41, %c0_42] : memref<2x32xf32, #tpu.memory_space<vmem>>, vector<2x32xf32>
      tpu.vector_store %arg8[%c0_41, %c0_42], %155 {strides = array<i32>} : memref<2x32xf32, #tpu.memory_space<vmem>>, vector<2x32xf32>,
    } else {
    }
    %c0 = arith.constant 0 : index
    %c0_1 = arith.constant 0 : index
    %c0_2 = arith.constant 0 : index
    %3 = vector.load %arg2[%c0, %c0_1, %c0_2] : memref<2x4x64xbf16, #tpu.memory_space<vmem>>, vector<2x4x64xbf16>
    %4 = vector.shape_cast %3 : vector<2x4x64xbf16> to vector<8x64xbf16>
    %c0_3 = arith.constant 0 : index
    %c0_4 = arith.constant 0 : index
    %5 = vector.load %arg3[%c0_3, %c0_4] : memref<64x96xbf16, #tpu.memory_space<vmem>>, vector<64x96xbf16>
    %cst = arith.constant dense<0.000000e+00> : vector<8x96xf32>
    %6 = tpu.matmul %4, %5, %cst {dimension_numbers = #tpu.dot_dimension_numbers<[1], [0], [0], [1], [0, 0, 1, 1], [], []>} : vector<8x64xbf16>, vector<64x96xbf16>, vector<8x96xf32> -> vector<8x96xf32>
    %c0_5 = arith.constant 0 : index
    %c0_6 = arith.constant 0 : index
    %7 = vector.load %arg4[%c0_5, %c0_6] : memref<1x96xf32, #tpu.memory_space<vmem>>, vector<1x96xf32>
    %8 = vector.broadcast %7 : vector<1x96xf32> to vector<8x96xf32>
    %9 = arith.addf %6, %8 : vector<8x96xf32>
    %10 = vector.shape_cast %9 : vector<8x96xf32> to vector<2x4x96xf32>
    %c0_7 = arith.constant 0 : index
    %c0_8 = arith.constant 0 : index
    %11 = vector.load %arg5[%c0_7, %c0_8] : memref<32x96xbf16, #tpu.memory_space<vmem>>, vector<32x96xbf16>
    %c0_9 = arith.constant 0 : index
    %c0_10 = arith.constant 0 : index
    %12 = vector.load %arg6[%c0_9, %c0_10] : memref<1x96xf32, #tpu.memory_space<vmem>>, vector<1x96xf32>
    %c0_11 = arith.constant 0 : index
    %c0_12 = arith.constant 0 : index
    %13 = vector.load %arg8[%c0_11, %c0_12] : memref<2x32xf32, #tpu.memory_space<vmem>>, vector<2x32xf32>
    %14 = vector.extract_strided_slice %10 {offsets = [0, 0, 0], sizes = [2, 1, 96], strides = [1, 1, 1]} : vector<2x4x96xf32> to vector<2x1x96xf32>
    %15 = vector.shape_cast %14 : vector<2x1x96xf32> to vector<2x96xf32>
    %16 = arith.truncf %13 : vector<2x32xf32> to vector<2x32xbf16>
    %cst_13 = arith.constant dense<0.000000e+00> : vector<2x96xf32>
    %17 = tpu.matmul %16, %11, %cst_13 {dimension_numbers = #tpu.dot_dimension_numbers<[1], [0], [0], [1], [0, 0, 1, 1], [], []>} : vector<2x32xbf16>, vector<32x96xbf16>, vector<2x96xf32> -> vector<2x96xf32>
    %18 = vector.broadcast %12 : vector<1x96xf32> to vector<2x96xf32>
    %19 = arith.addf %17, %18 : vector<2x96xf32>
    %20 = vector.extract_strided_slice %15 {offsets = [0, 0], sizes = [2, 32], strides = [1, 1]} : vector<2x96xf32> to vector<2x32xf32>
    %21 = vector.extract_strided_slice %19 {offsets = [0, 0], sizes = [2, 32], strides = [1, 1]} : vector<2x96xf32> to vector<2x32xf32>
    %22 = arith.addf %20, %21 : vector<2x32xf32>
    %23 = arith.negf %22 : vector<2x32xf32>
    %24 = math.exp %23 : vector<2x32xf32>
    %cst_14 = arith.constant 1.000000e+00 : f32
    %25 = vector.broadcast %cst_14 : f32 to vector<2x32xf32>
    %26 = arith.addf %25, %24 : vector<2x32xf32>
    %27 = arith.divf %25, %26 : vector<2x32xf32>
    %28 = vector.extract_strided_slice %15 {offsets = [0, 32], sizes = [2, 32], strides = [1, 1]} : vector<2x96xf32> to vector<2x32xf32>
    %29 = vector.extract_strided_slice %19 {offsets = [0, 32], sizes = [2, 32], strides = [1, 1]} : vector<2x96xf32> to vector<2x32xf32>
    %30 = arith.addf %28, %29 : vector<2x32xf32>
    %31 = arith.negf %30 : vector<2x32xf32>
    %32 = math.exp %31 : vector<2x32xf32>
    %cst_15 = arith.constant 1.000000e+00 : f32
    %33 = vector.broadcast %cst_15 : f32 to vector<2x32xf32>
    %34 = arith.addf %33, %32 : vector<2x32xf32>
    %35 = arith.divf %33, %34 : vector<2x32xf32>
    %36 = vector.extract_strided_slice %15 {offsets = [0, 64], sizes = [2, 32], strides = [1, 1]} : vector<2x96xf32> to vector<2x32xf32>
    %37 = vector.extract_strided_slice %19 {offsets = [0, 64], sizes = [2, 32], strides = [1, 1]} : vector<2x96xf32> to vector<2x32xf32>
    %38 = arith.mulf %27, %37 : vector<2x32xf32>
    %39 = arith.addf %36, %38 : vector<2x32xf32>
    %40 = math.tanh %39 : vector<2x32xf32>
    %cst_16 = arith.constant 1.000000e+00 : f32
    %41 = vector.broadcast %cst_16 : f32 to vector<2x32xf32>
    %42 = arith.subf %41, %35 : vector<2x32xf32>
    %43 = arith.mulf %42, %40 : vector<2x32xf32>
    %44 = arith.mulf %35, %13 : vector<2x32xf32>
    %45 = arith.addf %43, %44 : vector<2x32xf32>
    %c0_17 = arith.constant 0 : index
    %c0_18 = arith.constant 0 : index
    %c0_19 = arith.constant 0 : index
    %46 = vector.load %arg7[%c0_17, %c0_18, %c0_19] : memref<2x4x32xf32, #tpu.memory_space<vmem>>, vector<2x1x32xf32>
    %47 = vector.shape_cast %46 : vector<2x1x32xf32> to vector<2x32xf32>
    %48 = vector.shape_cast %45 : vector<2x32xf32> to vector<2x1x32xf32>
    tpu.vector_store %arg7[%c0_17, %c0_18, %c0_19], %48 {strides = array<i32>} : memref<2x4x32xf32, #tpu.memory_space<vmem>>, vector<2x1x32xf32>,
    %49 = vector.extract_strided_slice %10 {offsets = [0, 1, 0], sizes = [2, 1, 96], strides = [1, 1, 1]} : vector<2x4x96xf32> to vector<2x1x96xf32>
    %50 = vector.shape_cast %49 : vector<2x1x96xf32> to vector<2x96xf32>
    %51 = arith.truncf %45 : vector<2x32xf32> to vector<2x32xbf16>
    %cst_20 = arith.constant dense<0.000000e+00> : vector<2x96xf32>
    %52 = tpu.matmul %51, %11, %cst_20 {dimension_numbers = #tpu.dot_dimension_numbers<[1], [0], [0], [1], [0, 0, 1, 1], [], []>} : vector<2x32xbf16>, vector<32x96xbf16>, vector<2x96xf32> -> vector<2x96xf32>
    %53 = vector.broadcast %12 : vector<1x96xf32> to vector<2x96xf32>
    %54 = arith.addf %52, %53 : vector<2x96xf32>
    %55 = vector.extract_strided_slice %50 {offsets = [0, 0], sizes = [2, 32], strides = [1, 1]} : vector<2x96xf32> to vector<2x32xf32>
    %56 = vector.extract_strided_slice %54 {offsets = [0, 0], sizes = [2, 32], strides = [1, 1]} : vector<2x96xf32> to vector<2x32xf32>
    %57 = arith.addf %55, %56 : vector<2x32xf32>
    %58 = arith.negf %57 : vector<2x32xf32>
    %59 = math.exp %58 : vector<2x32xf32>
    %cst_21 = arith.constant 1.000000e+00 : f32
    %60 = vector.broadcast %cst_21 : f32 to vector<2x32xf32>
    %61 = arith.addf %60, %59 : vector<2x32xf32>
    %62 = arith.divf %60, %61 : vector<2x32xf32>
    %63 = vector.extract_strided_slice %50 {offsets = [0, 32], sizes = [2, 32], strides = [1, 1]} : vector<2x96xf32> to vector<2x32xf32>
    %64 = vector.extract_strided_slice %54 {offsets = [0, 32], sizes = [2, 32], strides = [1, 1]} : vector<2x96xf32> to vector<2x32xf32>
    %65 = arith.addf %63, %64 : vector<2x32xf32>
    %66 = arith.negf %65 : vector<2x32xf32>
    %67 = math.exp %66 : vector<2x32xf32>
    %cst_22 = arith.constant 1.000000e+00 : f32
    %68 = vector.broadcast %cst_22 : f32 to vector<2x32xf32>
    %69 = arith.addf %68, %67 : vector<2x32xf32>
    %70 = arith.divf %68, %69 : vector<2x32xf32>
    %71 = vector.extract_strided_slice %50 {offsets = [0, 64], sizes = [2, 32], strides = [1, 1]} : vector<2x96xf32> to vector<2x32xf32>
    %72 = vector.extract_strided_slice %54 {offsets = [0, 64], sizes = [2, 32], strides = [1, 1]} : vector<2x96xf32> to vector<2x32xf32>
    %73 = arith.mulf %62, %72 : vector<2x32xf32>
    %74 = arith.addf %71, %73 : vector<2x32xf32>
    %75 = math.tanh %74 : vector<2x32xf32>
    %cst_23 = arith.constant 1.000000e+00 : f32
    %76 = vector.broadcast %cst_23 : f32 to vector<2x32xf32>
    %77 = arith.subf %76, %70 : vector<2x32xf32>
    %78 = arith.mulf %77, %75 : vector<2x32xf32>
    %79 = arith.mulf %70, %45 : vector<2x32xf32>
    %80 = arith.addf %78, %79 : vector<2x32xf32>
    %c0_24 = arith.constant 0 : index
    %c1 = arith.constant 1 : index
    %c0_25 = arith.constant 0 : index
    %81 = vector.load %arg7[%c0_24, %c1, %c0_25] : memref<2x4x32xf32, #tpu.memory_space<vmem>>, vector<2x1x32xf32>
    %82 = vector.shape_cast %81 : vector<2x1x32xf32> to vector<2x32xf32>
    %83 = vector.shape_cast %80 : vector<2x32xf32> to vector<2x1x32xf32>
    tpu.vector_store %arg7[%c0_24, %c1, %c0_25], %83 {strides = array<i32>} : memref<2x4x32xf32, #tpu.memory_space<vmem>>, vector<2x1x32xf32>,
    %84 = vector.extract_strided_slice %10 {offsets = [0, 2, 0], sizes = [2, 1, 96], strides = [1, 1, 1]} : vector<2x4x96xf32> to vector<2x1x96xf32>
    %85 = vector.shape_cast %84 : vector<2x1x96xf32> to vector<2x96xf32>
    %86 = arith.truncf %80 : vector<2x32xf32> to vector<2x32xbf16>
    %cst_26 = arith.constant dense<0.000000e+00> : vector<2x96xf32>
    %87 = tpu.matmul %86, %11, %cst_26 {dimension_numbers = #tpu.dot_dimension_numbers<[1], [0], [0], [1], [0, 0, 1, 1], [], []>} : vector<2x32xbf16>, vector<32x96xbf16>, vector<2x96xf32> -> vector<2x96xf32>
    %88 = vector.broadcast %12 : vector<1x96xf32> to vector<2x96xf32>
    %89 = arith.addf %87, %88 : vector<2x96xf32>
    %90 = vector.extract_strided_slice %85 {offsets = [0, 0], sizes = [2, 32], strides = [1, 1]} : vector<2x96xf32> to vector<2x32xf32>
    %91 = vector.extract_strided_slice %89 {offsets = [0, 0], sizes = [2, 32], strides = [1, 1]} : vector<2x96xf32> to vector<2x32xf32>
    %92 = arith.addf %90, %91 : vector<2x32xf32>
    %93 = arith.negf %92 : vector<2x32xf32>
    %94 = math.exp %93 : vector<2x32xf32>
    %cst_27 = arith.constant 1.000000e+00 : f32
    %95 = vector.broadcast %cst_27 : f32 to vector<2x32xf32>
    %96 = arith.addf %95, %94 : vector<2x32xf32>
    %97 = arith.divf %95, %96 : vector<2x32xf32>
    %98 = vector.extract_strided_slice %85 {offsets = [0, 32], sizes = [2, 32], strides = [1, 1]} : vector<2x96xf32> to vector<2x32xf32>
    %99 = vector.extract_strided_slice %89 {offsets = [0, 32], sizes = [2, 32], strides = [1, 1]} : vector<2x96xf32> to vector<2x32xf32>
    %100 = arith.addf %98, %99 : vector<2x32xf32>
    %101 = arith.negf %100 : vector<2x32xf32>
    %102 = math.exp %101 : vector<2x32xf32>
    %cst_28 = arith.constant 1.000000e+00 : f32
    %103 = vector.broadcast %cst_28 : f32 to vector<2x32xf32>
    %104 = arith.addf %103, %102 : vector<2x32xf32>
    %105 = arith.divf %103, %104 : vector<2x32xf32>
    %106 = vector.extract_strided_slice %85 {offsets = [0, 64], sizes = [2, 32], strides = [1, 1]} : vector<2x96xf32> to vector<2x32xf32>
    %107 = vector.extract_strided_slice %89 {offsets = [0, 64], sizes = [2, 32], strides = [1, 1]} : vector<2x96xf32> to vector<2x32xf32>
    %108 = arith.mulf %97, %107 : vector<2x32xf32>
    %109 = arith.addf %106, %108 : vector<2x32xf32>
    %110 = math.tanh %109 : vector<2x32xf32>
    %cst_29 = arith.constant 1.000000e+00 : f32
    %111 = vector.broadcast %cst_29 : f32 to vector<2x32xf32>
    %112 = arith.subf %111, %105 : vector<2x32xf32>
    %113 = arith.mulf %112, %110 : vector<2x32xf32>
    %114 = arith.mulf %105, %80 : vector<2x32xf32>
    %115 = arith.addf %113, %114 : vector<2x32xf32>
    %c0_30 = arith.constant 0 : index
    %c2 = arith.constant 2 : index
    %c0_31 = arith.constant 0 : index
    %116 = vector.load %arg7[%c0_30, %c2, %c0_31] : memref<2x4x32xf32, #tpu.memory_space<vmem>>, vector<2x1x32xf32>
    %117 = vector.shape_cast %116 : vector<2x1x32xf32> to vector<2x32xf32>
    %118 = vector.shape_cast %115 : vector<2x32xf32> to vector<2x1x32xf32>
    tpu.vector_store %arg7[%c0_30, %c2, %c0_31], %118 {strides = array<i32>} : memref<2x4x32xf32, #tpu.memory_space<vmem>>, vector<2x1x32xf32>,
    %119 = vector.extract_strided_slice %10 {offsets = [0, 3, 0], sizes = [2, 1, 96], strides = [1, 1, 1]} : vector<2x4x96xf32> to vector<2x1x96xf32>
    %120 = vector.shape_cast %119 : vector<2x1x96xf32> to vector<2x96xf32>
    %121 = arith.truncf %115 : vector<2x32xf32> to vector<2x32xbf16>
    %cst_32 = arith.constant dense<0.000000e+00> : vector<2x96xf32>
    %122 = tpu.matmul %121, %11, %cst_32 {dimension_numbers = #tpu.dot_dimension_numbers<[1], [0], [0], [1], [0, 0, 1, 1], [], []>} : vector<2x32xbf16>, vector<32x96xbf16>, vector<2x96xf32> -> vector<2x96xf32>
    %123 = vector.broadcast %12 : vector<1x96xf32> to vector<2x96xf32>
    %124 = arith.addf %122, %123 : vector<2x96xf32>
    %125 = vector.extract_strided_slice %120 {offsets = [0, 0], sizes = [2, 32], strides = [1, 1]} : vector<2x96xf32> to vector<2x32xf32>
    %126 = vector.extract_strided_slice %124 {offsets = [0, 0], sizes = [2, 32], strides = [1, 1]} : vector<2x96xf32> to vector<2x32xf32>
    %127 = arith.addf %125, %126 : vector<2x32xf32>
    %128 = arith.negf %127 : vector<2x32xf32>
    %129 = math.exp %128 : vector<2x32xf32>
    %cst_33 = arith.constant 1.000000e+00 : f32
    %130 = vector.broadcast %cst_33 : f32 to vector<2x32xf32>
    %131 = arith.addf %130, %129 : vector<2x32xf32>
    %132 = arith.divf %130, %131 : vector<2x32xf32>
    %133 = vector.extract_strided_slice %120 {offsets = [0, 32], sizes = [2, 32], strides = [1, 1]} : vector<2x96xf32> to vector<2x32xf32>
    %134 = vector.extract_strided_slice %124 {offsets = [0, 32], sizes = [2, 32], strides = [1, 1]} : vector<2x96xf32> to vector<2x32xf32>
    %135 = arith.addf %133, %134 : vector<2x32xf32>
    %136 = arith.negf %135 : vector<2x32xf32>
    %137 = math.exp %136 : vector<2x32xf32>
    %cst_34 = arith.constant 1.000000e+00 : f32
    %138 = vector.broadcast %cst_34 : f32 to vector<2x32xf32>
    %139 = arith.addf %138, %137 : vector<2x32xf32>
    %140 = arith.divf %138, %139 : vector<2x32xf32>
    %141 = vector.extract_strided_slice %120 {offsets = [0, 64], sizes = [2, 32], strides = [1, 1]} : vector<2x96xf32> to vector<2x32xf32>
    %142 = vector.extract_strided_slice %124 {offsets = [0, 64], sizes = [2, 32], strides = [1, 1]} : vector<2x96xf32> to vector<2x32xf32>
    %143 = arith.mulf %132, %142 : vector<2x32xf32>
    %144 = arith.addf %141, %143 : vector<2x32xf32>
    %145 = math.tanh %144 : vector<2x32xf32>
    %cst_35 = arith.constant 1.000000e+00 : f32
    %146 = vector.broadcast %cst_35 : f32 to vector<2x32xf32>
    %147 = arith.subf %146, %140 : vector<2x32xf32>
    %148 = arith.mulf %147, %145 : vector<2x32xf32>
    %149 = arith.mulf %140, %115 : vector<2x32xf32>
    %150 = arith.addf %148, %149 : vector<2x32xf32>
    %c0_36 = arith.constant 0 : index
    %c3 = arith.constant 3 : index
    %c0_37 = arith.constant 0 : index
    %151 = vector.load %arg7[%c0_36, %c3, %c0_37] : memref<2x4x32xf32, #tpu.memory_space<vmem>>, vector<2x1x32xf32>
    %152 = vector.shape_cast %151 : vector<2x1x32xf32> to vector<2x32xf32>
    %153 = vector.shape_cast %150 : vector<2x32xf32> to vector<2x1x32xf32>
    tpu.vector_store %arg7[%c0_36, %c3, %c0_37], %153 {strides = array<i32>} : memref<2x4x32xf32, #tpu.memory_space<vmem>>, vector<2x1x32xf32>,
    %c0_38 = arith.constant 0 : index
    %c0_39 = arith.constant 0 : index
    %154 = vector.load %arg8[%c0_38, %c0_39] : memref<2x32xf32, #tpu.memory_space<vmem>>, vector<2x32xf32>
    tpu.vector_store %arg8[%c0_38, %c0_39], %150 {strides = array<i32>} : memref<2x32xf32, #tpu.memory_space<vmem>>, vector<2x32xf32>,
    return
  }
  func.func @transform_0(%arg0: i32, %arg1: i32) -> (i32, i32, i32) {
    %c0_i32 = arith.constant 0 : i32
    %c0_i32_0 = arith.constant 0 : i32
    return %arg0, %arg1, %c0_i32 : i32, i32, i32
  }
  func.func @transform_1(%arg0: i32, %arg1: i32) -> (i32, i32) {
    %c0_i32 = arith.constant 0 : i32
    %c0_i32_0 = arith.constant 0 : i32
    %c0_i32_1 = arith.constant 0 : i32
    return %c0_i32, %c0_i32_0 : i32, i32
  }
  func.func @transform_2(%arg0: i32, %arg1: i32) -> (i32, i32) {
    %c0_i32 = arith.constant 0 : i32
    %c0_i32_0 = arith.constant 0 : i32
    %c0_i32_1 = arith.constant 0 : i32
    return %c0_i32, %c0_i32_0 : i32, i32
  }
  func.func @transform_3(%arg0: i32, %arg1: i32) -> (i32, i32) {
    %c0_i32 = arith.constant 0 : i32
    %c0_i32_0 = arith.constant 0 : i32
    %c0_i32_1 = arith.constant 0 : i32
    return %c0_i32, %c0_i32_0 : i32, i32
  }
  func.func @transform_4(%arg0: i32, %arg1: i32) -> (i32, i32) {
    %c0_i32 = arith.constant 0 : i32
    %c0_i32_0 = arith.constant 0 : i32
    %c0_i32_1 = arith.constant 0 : i32
    return %c0_i32, %c0_i32_0 : i32, i32
  }
  func.func @transform_5(%arg0: i32, %arg1: i32) -> (i32, i32, i32) {
    %c0_i32 = arith.constant 0 : i32
    %c0_i32_0 = arith.constant 0 : i32
    return %arg0, %arg1, %c0_i32 : i32, i32, i32
  }
}

module attributes {stable_mosaic.version = 11 : i64} {
  func.func @linear_kernel(%arg0: i32, %arg1: memref<2x32xf32, #tpu.memory_space<vmem>>, %arg2: memref<32x5xf32, #tpu.memory_space<vmem>>, %arg3: memref<1x5xf32, #tpu.memory_space<vmem>>, %arg4: memref<2x5xf32, #tpu.memory_space<vmem>>) attributes {dimension_semantics = [#tpu.dimension_semantics<parallel>], iteration_bounds = array<i64: 1>, scalar_prefetch = 0 : i64, scratch_operands = 0 : i64, tpu.core_type = #tpu.core_type<tc>, window_params = [{transform_indices = @transform_0, window_bounds = array<i64: 2, 32>}, {pipeline_mode = #tpu.pipeline_mode<synchronous>, transform_indices = @transform_1, window_bounds = array<i64: 32, 5>}, {pipeline_mode = #tpu.pipeline_mode<synchronous>, transform_indices = @transform_2, window_bounds = array<i64: 1, 5>}, {transform_indices = @transform_3, window_bounds = array<i64: 2, 5>}]} {
    %c0 = arith.constant 0 : index
    %c0_0 = arith.constant 0 : index
    %0 = vector.load %arg1[%c0, %c0_0] : memref<2x32xf32, #tpu.memory_space<vmem>>, vector<2x32xf32>
    %c0_1 = arith.constant 0 : index
    %c0_2 = arith.constant 0 : index
    %1 = vector.load %arg2[%c0_1, %c0_2] : memref<32x5xf32, #tpu.memory_space<vmem>>, vector<32x5xf32>
    %cst = arith.constant dense<0.000000e+00> : vector<2x5xf32>
    %2 = tpu.matmul %0, %1, %cst {dimension_numbers = #tpu.dot_dimension_numbers<[1], [0], [0], [1], [0, 0, 1, 1], [], []>} : vector<2x32xf32>, vector<32x5xf32>, vector<2x5xf32> -> vector<2x5xf32>
    %c0_3 = arith.constant 0 : index
    %c0_4 = arith.constant 0 : index
    %3 = vector.load %arg3[%c0_3, %c0_4] : memref<1x5xf32, #tpu.memory_space<vmem>>, vector<1x5xf32>
    %4 = vector.broadcast %3 : vector<1x5xf32> to vector<2x5xf32>
    %5 = arith.addf %2, %4 : vector<2x5xf32>
    %c0_5 = arith.constant 0 : index
    %c0_6 = arith.constant 0 : index
    %6 = vector.load %arg4[%c0_5, %c0_6] : memref<2x5xf32, #tpu.memory_space<vmem>>, vector<2x5xf32>
    tpu.vector_store %arg4[%c0_5, %c0_6], %5 {strides = array<i32>} : memref<2x5xf32, #tpu.memory_space<vmem>>, vector<2x5xf32>,
    return
  }
  func.func @transform_0(%arg0: i32) -> (i32, i32) {
    %c0_i32 = arith.constant 0 : i32
    %c0_i32_0 = arith.constant 0 : i32
    return %arg0, %c0_i32 : i32, i32
  }
  func.func @transform_1(%arg0: i32) -> (i32, i32) {
    %c0_i32 = arith.constant 0 : i32
    %c0_i32_0 = arith.constant 0 : i32
    %c0_i32_1 = arith.constant 0 : i32
    return %c0_i32, %c0_i32_0 : i32, i32
  }
  func.func @transform_2(%arg0: i32) -> (i32, i32) {
    %c0_i32 = arith.constant 0 : i32
    %c0_i32_0 = arith.constant 0 : i32
    %c0_i32_1 = arith.constant 0 : i32
    return %c0_i32, %c0_i32_0 : i32, i32
  }
  func.func @transform_3(%arg0: i32) -> (i32, i32) {
    %c0_i32 = arith.constant 0 : i32
    %c0_i32_0 = arith.constant 0 : i32
    return %arg0, %c0_i32 : i32, i32
  }
}

module attributes {stable_mosaic.version = 11 : i64} {
  func.func @att_pool_kernel(%arg0: i32, %arg1: memref<2x4x32xf32, #tpu.memory_space<vmem>>, %arg2: memref<2x1xi32, #tpu.memory_space<vmem>>, %arg3: memref<32x16xbf16, #tpu.memory_space<vmem>>, %arg4: memref<1x16xf32, #tpu.memory_space<vmem>>, %arg5: memref<1x16xf32, #tpu.memory_space<vmem>>, %arg6: memref<2x4xf32, #tpu.memory_space<vmem>>, %arg7: memref<2x32xf32, #tpu.memory_space<vmem>>) attributes {dimension_semantics = [#tpu.dimension_semantics<parallel>], iteration_bounds = array<i64: 1>, scalar_prefetch = 0 : i64, scratch_operands = 0 : i64, tpu.core_type = #tpu.core_type<tc>, window_params = [{transform_indices = @transform_0, window_bounds = array<i64: 2, 4, 32>}, {transform_indices = @transform_1, window_bounds = array<i64: 2, 1>}, {pipeline_mode = #tpu.pipeline_mode<synchronous>, transform_indices = @transform_2, window_bounds = array<i64: 32, 16>}, {pipeline_mode = #tpu.pipeline_mode<synchronous>, transform_indices = @transform_3, window_bounds = array<i64: 1, 16>}, {pipeline_mode = #tpu.pipeline_mode<synchronous>, transform_indices = @transform_4, window_bounds = array<i64: 1, 16>}, {transform_indices = @transform_5, window_bounds = array<i64: 2, 4>}, {transform_indices = @transform_6, window_bounds = array<i64: 2, 32>}]} {
    %c0 = arith.constant 0 : index
    %c0_0 = arith.constant 0 : index
    %c0_1 = arith.constant 0 : index
    %0 = vector.load %arg1[%c0, %c0_0, %c0_1] : memref<2x4x32xf32, #tpu.memory_space<vmem>>, vector<2x4x32xf32>
    %1 = vector.shape_cast %0 : vector<2x4x32xf32> to vector<8x32xf32>
    %2 = arith.truncf %1 : vector<8x32xf32> to vector<8x32xbf16>
    %c0_2 = arith.constant 0 : index
    %c0_3 = arith.constant 0 : index
    %3 = vector.load %arg3[%c0_2, %c0_3] : memref<32x16xbf16, #tpu.memory_space<vmem>>, vector<32x16xbf16>
    %cst = arith.constant dense<0.000000e+00> : vector<8x16xf32>
    %4 = tpu.matmul %2, %3, %cst {dimension_numbers = #tpu.dot_dimension_numbers<[1], [0], [0], [1], [0, 0, 1, 1], [], []>} : vector<8x32xbf16>, vector<32x16xbf16>, vector<8x16xf32> -> vector<8x16xf32>
    %c0_4 = arith.constant 0 : index
    %c0_5 = arith.constant 0 : index
    %5 = vector.load %arg4[%c0_4, %c0_5] : memref<1x16xf32, #tpu.memory_space<vmem>>, vector<1x16xf32>
    %6 = vector.broadcast %5 : vector<1x16xf32> to vector<8x16xf32>
    %7 = arith.addf %4, %6 : vector<8x16xf32>
    %8 = math.tanh %7 : vector<8x16xf32>
    %9 = vector.shape_cast %8 : vector<8x16xf32> to vector<2x4x16xf32>
    %c0_6 = arith.constant 0 : index
    %c0_7 = arith.constant 0 : index
    %10 = vector.load %arg5[%c0_6, %c0_7] : memref<1x16xf32, #tpu.memory_space<vmem>>, vector<1x16xf32>
    %11 = vector.shape_cast %10 : vector<1x16xf32> to vector<1x1x16xf32>
    %12 = vector.broadcast %11 : vector<1x1x16xf32> to vector<2x4x16xf32>
    %13 = arith.mulf %9, %12 : vector<2x4x16xf32>
    %cst_8 = arith.constant dense<0.000000e+00> : vector<2x4xf32>
    %14 = vector.multi_reduction <add>, %13, %cst_8 [2] : vector<2x4x16xf32> to vector<2x4xf32>
    %15 = tpu.iota {dimensions = array<i32: 1>} : vector<2x4xi32>
    %c0_9 = arith.constant 0 : index
    %c0_10 = arith.constant 0 : index
    %16 = vector.load %arg2[%c0_9, %c0_10] : memref<2x1xi32, #tpu.memory_space<vmem>>, vector<2x1xi32>
    %17 = vector.broadcast %16 : vector<2x1xi32> to vector<2x4xi32>
    %18 = arith.cmpi slt, %15, %17 : vector<2x4xi32>
    %cst_11 = arith.constant -1.000000e+30 : f32
    %19 = vector.broadcast %cst_11 : f32 to vector<2x4xf32>
    %20 = arith.select %18, %14, %19 : vector<2x4xi1>, vector<2x4xf32>
    %cst_12 = arith.constant dense<0xFF800000> : vector<2xf32>
    %21 = vector.multi_reduction <maximumf>, %20, %cst_12 [1] : vector<2x4xf32> to vector<2xf32>
    %22 = vector.shape_cast %21 : vector<2xf32> to vector<2x1xf32>
    %23 = vector.broadcast %22 : vector<2x1xf32> to vector<2x4xf32>
    %24 = arith.subf %20, %23 : vector<2x4xf32>
    %25 = math.exp %24 : vector<2x4xf32>
    %cst_13 = arith.constant 0.000000e+00 : f32
    %26 = vector.broadcast %cst_13 : f32 to vector<2x4xf32>
    %27 = arith.select %18, %25, %26 : vector<2x4xi1>, vector<2x4xf32>
    %cst_14 = arith.constant dense<0.000000e+00> : vector<2xf32>
    %28 = vector.multi_reduction <add>, %27, %cst_14 [1] : vector<2x4xf32> to vector<2xf32>
    %29 = vector.shape_cast %28 : vector<2xf32> to vector<2x1xf32>
    %cst_15 = arith.constant 1.000000e-30 : f32
    %30 = vector.broadcast %cst_15 : f32 to vector<2x1xf32>
    %31 = arith.maximumf %29, %30 : vector<2x1xf32>
    %32 = tpu.reciprocal %31 {approx = true} : vector<2x1xf32> -> vector<2x1xf32>
    %33 = vector.broadcast %32 : vector<2x1xf32> to vector<2x4xf32>
    %34 = arith.mulf %27, %33 : vector<2x4xf32>
    %c0_16 = arith.constant 0 : index
    %c0_17 = arith.constant 0 : index
    %35 = vector.load %arg6[%c0_16, %c0_17] : memref<2x4xf32, #tpu.memory_space<vmem>>, vector<2x4xf32>
    tpu.vector_store %arg6[%c0_16, %c0_17], %34 {strides = array<i32>} : memref<2x4xf32, #tpu.memory_space<vmem>>, vector<2x4xf32>,
    %36 = vector.shape_cast %27 : vector<2x4xf32> to vector<2x4x1xf32>
    %37 = vector.broadcast %36 : vector<2x4x1xf32> to vector<2x4x32xf32>
    %38 = arith.mulf %0, %37 : vector<2x4x32xf32>
    %cst_18 = arith.constant dense<0.000000e+00> : vector<2x32xf32>
    %39 = vector.multi_reduction <add>, %38, %cst_18 [1] : vector<2x4x32xf32> to vector<2x32xf32>
    %40 = vector.broadcast %32 : vector<2x1xf32> to vector<2x32xf32>
    %41 = arith.mulf %39, %40 : vector<2x32xf32>
    %c0_19 = arith.constant 0 : index
    %c0_20 = arith.constant 0 : index
    %42 = vector.load %arg7[%c0_19, %c0_20] : memref<2x32xf32, #tpu.memory_space<vmem>>, vector<2x32xf32>
    tpu.vector_store %arg7[%c0_19, %c0_20], %41 {strides = array<i32>} : memref<2x32xf32, #tpu.memory_space<vmem>>, vector<2x32xf32>,
    return
  }
  func.func @transform_0(%arg0: i32) -> (i32, i32, i32) {
    %c0_i32 = arith.constant 0 : i32
    %c0_i32_0 = arith.constant 0 : i32
    %c0_i32_1 = arith.constant 0 : i32
    return %arg0, %c0_i32, %c0_i32_0 : i32, i32, i32
  }
  func.func @transform_1(%arg0: i32) -> (i32, i32) {
    %c0_i32 = arith.constant 0 : i32
    %c0_i32_0 = arith.constant 0 : i32
    return %arg0, %c0_i32 : i32, i32
  }
  func.func @transform_2(%arg0: i32) -> (i32, i32) {
    %c0_i32 = arith.constant 0 : i32
    %c0_i32_0 = arith.constant 0 : i32
    %c0_i32_1 = arith.constant 0 : i32
    return %c0_i32, %c0_i32_0 : i32, i32
  }
  func.func @transform_3(%arg0: i32) -> (i32, i32) {
    %c0_i32 = arith.constant 0 : i32
    %c0_i32_0 = arith.constant 0 : i32
    %c0_i32_1 = arith.constant 0 : i32
    return %c0_i32, %c0_i32_0 : i32, i32
  }
  func.func @transform_4(%arg0: i32) -> (i32, i32) {
    %c0_i32 = arith.constant 0 : i32
    %c0_i32_0 = arith.constant 0 : i32
    %c0_i32_1 = arith.constant 0 : i32
    return %c0_i32, %c0_i32_0 : i32, i32
  }
  func.func @transform_5(%arg0: i32) -> (i32, i32) {
    %c0_i32 = arith.constant 0 : i32
    %c0_i32_0 = arith.constant 0 : i32
    return %arg0, %c0_i32 : i32, i32
  }
  func.func @transform_6(%arg0: i32) -> (i32, i32) {
    %c0_i32 = arith.constant 0 : i32
    %c0_i32_0 = arith.constant 0 : i32
    return %arg0, %c0_i32 : i32, i32
  }
}

</mosaic_0001>

<bundles_post_ra>
// kernel: han_forward.6
= control target key start
LH: loop header
LB: loop body
LE: loop exit
PB: predicated region body
PF: predicated region fallthrough
CT: control target
= control target key end

     0   :  { %vm58_vm0 = vcmask 261120   ;;  %v492_v14 = vmov 0   ;;  %vm159_vm1 = vcmask 130048   ;;  %v184_v60 = vlaneseq  ;;  %s665_s2 = inlined_call_operand.vmem [shape: bf16[32,16], index: 2, kind: input, shape index: {}]   ;;  %s666_s0 = inlined_call_operand.vmem [shape: f32[8,8,32], index: 0, kind: input, shape index: {}]   ;;  %s667_s3 = inlined_call_operand.vmem [shape: f32[1,16], index: 3, kind: input, shape index: {}]   ;;  %s668_s4 = inlined_call_operand.vmem [shape: f32[1,16], index: 4, kind: input, shape index: {}]   ;;  %s669_s1 = inlined_call_operand.vmem [shape: s32[8,1], index: 1, kind: input, shape index: {}]   ;;  %s670_s5 = inlined_call_operand.vmem [shape: f32[8,8], index: 5, kind: output, shape index: {0}]   ;;  %s671_s6 = inlined_call_operand.vmem [shape: f32[8,32], index: 6, kind: output, shape index: {1}]  }
   0x1   :  { %v470_v0 = vld [vmem:[%s665_s2] sm:$0xff]   ;;  %v471_v1 = vld [vmem:[%s665_s2 + $0x8] sm:$0xff]   ;;  %v559_v7 = vld [vmem:[%s666_s0 + $0x10] sm:$0xff]  ;;  %469 = vset.pattern.permute.xlu0 %v492_v14  ;;  %vm231_vm2 = vcmask 1041409   ;;  %vm233_vm3 = vcmask 1042434   ;;  %vm235_vm4 = vcmask 1043459  }
   0x2   :  { %452 = vmatprep.subr.bf16.mxu0 %v470_v0  ;;  %464 = vmatprep.subr.bf16.mxu1 %v470_v0  ;;  %v537_v2 = vld [vmem:[%s666_s0] sm:$0xff]  ;;  %v542_v3 = vld [vmem:[%s666_s0 + $0x8] sm:$0xff]  ;;  %v564_v8 = vld [vmem:[%s666_s0 + $0x18] sm:$0xff]  ;;  %v185_v63 = vand.u32 127, %v184_v60  ;;  %vm237_vm5 = vcmask 1044484   ;;  %vm239_vm6 = vcmask 1045509  }
   0x3   :  { %v547_v4 = vld [vmem:[%s666_s0 + $0x20] sm:$0xff]  ;;  %453 = vmatpush3.bf16.msra.mxu0 %v470_v0  ;;  %466 = vmatpush3.bf16.msra.mxu1 %v470_v0  ;;  %v31_v5 = vpack.c.bf16 %v542_v3, %v537_v2  ;;  %v554_v6 = vld [vmem:[%s666_s0 + $0x28] sm:$0xff]  ;;  %v571_v10 = vld [vmem:[%s666_s0 + $0x30] sm:$0xff]  ;;  %v32_v12 = vpack.c.bf16 %v564_v8, %v559_v7  ;;  %v603_v0 = vshrl.u32 %v184_v60, 7  ;;  %vm241_vm7 = vcmask 1046534  }
   0x4   :  { %454 = vmatprep.subr.bf16.mxu0 %v471_v1  ;;  %465 = vmatprep.subr.bf16.mxu1 %v471_v1  ;;  %v33_v9 = vpack.c.bf16 %v554_v6, %v547_v4  ;;  %v576_v11 = vld [vmem:[%s666_s0 + $0x38] sm:$0xff]  ;;  %v438_v15 = vld [vmem:[%s667_s3] ss:$0 sm:$0xff]  ;;  %vm243_vm8 = vcmask 1047559   ;;  %vm247_vm9 = vcmask 64512  }
   0x5   :  { %456 = vmatprep.mubr.msk.bf16.mxu0 %vm58_vm0, %v31_v5  ;;  %v34_v13 = vpack.c.bf16 %v576_v11, %v571_v10  ;;  %v445_v32 = vld [vmem:[%s668_s4] ss:$0 sm:$0xff] }
   0x6   :  { %460 = vmatprep.mubr.msk.bf16.mxu1 %vm58_vm0, %v33_v9  ;;  %v186_v57 = vld [vmem:[%s669_s1] sm:$0xff]  ;;  %v201_v9 = vsub.s32 %v185_v63, %v603_v0 }
   0x7   :  { %455 = vmatpush3.bf16.msra.mxu0 %v471_v1  ;;  %467 = vmatpush3.bf16.msra.mxu1 %v471_v1 }
   0xa   :  { %457 = vmatmul.mubr.msk.bf16.vlgmr.msra.gmra.mrb[0].mxu0 %vm58_vm0, %v32_v12  ;;  %461 = vmatmul.mubr.msk.bf16.vlgmr.msra.gmra.mrb[0].mxu1 %vm58_vm0, %v34_v13 }
  0xdd   :  { %v458_v16 = vpop.f32.mrb[0].mxu0  ;;  %v462_v17 = vpop.f32.mrb[0].mxu1 }
  0xde   :  { %v114_v18 = vadd.f32 %v458_v16, %v438_v15  ;;  %v130_v19 = vadd.f32 %v462_v17, %v438_v15  ;;  %v105_v20 = vpop.f32.mrb[1].mxu0  ;;  %v121_v21 = vpop.f32.mrb[1].mxu1 }
  0xdf   :  { %v106_v22 = vadd.f32 %v438_v15, %v105_v20  ;;  %v459_v23 = vpop.f32.mrb[2].mxu0  ;;  %v463_v24 = vpop.f32.mrb[2].mxu1  ;;  %v122_v28 = vadd.f32 %v438_v15, %v121_v21 }
  0xe0   :  { %472 = vtanh.f32 %v114_v18  ;;  %v117_v25 = vadd.f32 %v459_v23, %v438_v15  ;;  %v108_v26 = vpop.f32.mrb[3].mxu0  ;;  %v124_v27 = vpop.f32.mrb[3].mxu1  ;;  %v133_v30 = vadd.f32 %v463_v24, %v438_v15 }
  0xe1   :  { %474 = vtanh.f32 %v130_v19  ;;  %v125_v29 = vadd.f32 %v438_v15, %v124_v27  ;;  %v109_v31 = vadd.f32 %v438_v15, %v108_v26 }
  0xe2   :  { %476 = vtanh.f32 %v106_v22 }
  0xe3   :  { %478 = vtanh.f32 %v117_v25 }
  0xe4   :  { %480 = vtanh.f32 %v122_v28 }
  0xe5   :  { %482 = vtanh.f32 %v125_v29 }
  0xe6   :  { %484 = vtanh.f32 %v133_v30 }
  0xe7   :  { %486 = vtanh.f32 %v109_v31 }
  0xea   :  { %v473_v33 = vpop.eup %472 }
  0xeb   :  { %v475_v34 = vpop.eup %474  ;;  %v153_v35 = vmul.f32 %v473_v33, %v445_v32 }
  0xec   :  { %v477_v36 = vpop.eup %476  ;;  %v157_v37 = vmul.f32 %v475_v34, %v445_v32 }
  0xed   :  { %v166_v38 = vsel %vm159_vm1, %v153_v35, 0.0  ;;  %v151_v39 = vmul.f32 %v477_v36, %v445_v32  ;;  %v479_v40 = vpop.eup %478  ;;  %v306_v35 = vsub.s32 6, %v603_v0 }
  0xee   :  { %v178_v41 = vsel %vm159_vm1, %v157_v37, 0.0  ;;  %167 = vadd.xlane.f32.xlu1 %v166_v38  ;;  %v481_v42 = vpop.eup %480  ;;  %v154_v43 = vmul.f32 %v479_v40, %v445_v32  ;;  %v271_v40 = vsub.s32 1, %v603_v0 }
  0xef   :  { %179 = vadd.xlane.f32.xlu0 %v178_v41  ;;  %v160_v44 = vsel %vm159_vm1, %v151_v39, 0.0  ;;  %v483_v45 = vpop.eup %482  ;;  %v155_v49 = vmul.f32 %v481_v42, %v445_v32  ;;  %v278_v42 = vsub.s32 2, %v603_v0 }
  0xf0   :  { %v169_v46 = vsel %vm159_vm1, %v154_v43, 0.0  ;;  %v485_v47 = vpop.eup %484  ;;  %v156_v48 = vmul.f32 %v483_v45, %v445_v32 }
  0xf1   :  { %v487_v50 = vpop.eup %486  ;;  %v158_v52 = vmul.f32 %v485_v47, %v445_v32  ;;  %v172_v53 = vsel %vm159_vm1, %v155_v49, 0.0 }
  0xf2   :  { %170 = vadd.xlane.f32.xlu1 %v169_v46  ;;  %v175_v51 = vsel %vm159_vm1, %v156_v48, 0.0  ;;  %v152_v54 = vmul.f32 %v487_v50, %v445_v32  ;;  %v285_v46 = vsub.s32 3, %v603_v0  ;;  %v292_v48 = vsub.s32 4, %v603_v0 }
  0xf3   :  { %161 = vadd.xlane.f32.xlu0 %v160_v44  ;;  %v181_v55 = vsel %vm159_vm1, %v158_v52, 0.0  ;;  %v264_v44 = vsub.s32 0, %v603_v0  ;;  %v299_v50 = vsub.s32 5, %v603_v0  ;;  %v313_v52 = vsub.s32 7, %v603_v0 }
  0xf4   :  { %v163_v56 = vsel %vm159_vm1, %v152_v54, 0.0 }
  0xf6   :  { %176 = vadd.xlane.f32.xlu1 %v175_v51 }
  0xf7   :  { %173 = vadd.xlane.f32.xlu0 %v172_v53 }
  0xfa   :  { %182 = vadd.xlane.f32.xlu1 %v181_v55 }
  0xfb   :  { %164 = vadd.xlane.f32.xlu0 %v163_v56 }
 0x111   :  { %188 = vperm.xlu0 %469, %v186_v57  }
 0x17b   :  { %v168_v58 = vpop.xlane.xlu1 %167 }
 0x17c   :  { %v180_v59 = vpop.xlane.xlu0 %179  ;;  %v210_v15 = vrot.slane %v168_v58, %v201_v9 }
 0x17d   :  { %v226_v23 = vrot.slane %v180_v59, %v201_v9 }
 0x17f   :  { %v171_v61 = vpop.xlane.xlu1 %170 }
 0x180   :  { %v162_v62 = vpop.xlane.xlu0 %161  ;;  %v214_v16 = vrot.slane %v171_v61, %v201_v9 }
 0x181   :  { %v202_v13 = vrot.slane %v162_v62, %v201_v9 }
 0x183   :  { %v177_v5 = vpop.xlane.xlu1 %176 }
 0x184   :  { %v174_v1 = vpop.xlane.xlu0 %173  ;;  %v222_v21 = vrot.slane %v177_v5, %v201_v9 }
 0x185   :  { %v218_v18 = vrot.slane %v174_v1, %v201_v9 }
 0x187   :  { %v183_v19 = vpop.xlane.xlu1 %182 }
 0x188   :  { %v165_v12 = vpop.xlane.xlu0 %164  ;;  %v230_v25 = vrot.slane %v183_v19, %v201_v9 }
 0x189   :  { %v206_v14 = vrot.slane %v165_v12, %v201_v9 }
 0x18b   :  { %v232_v17 = vsel %vm231_vm2, %v206_v14, %v202_v13 }
 0x18c   :  { %v234_v20 = vsel %vm233_vm3, %v210_v15, %v232_v17 }
 0x18d   :  { %v236_v22 = vsel %vm235_vm4, %v214_v16, %v234_v20 }
 0x18e   :  { %v238_v24 = vsel %vm237_vm5, %v218_v18, %v236_v22 }
 0x18f   :  { %v240_v26 = vsel %vm239_vm6, %v222_v21, %v238_v24 }
 0x190   :  { %v189_v27 = vpop.permute.xlu0 %188  ;;  %v242_v28 = vsel %vm241_vm7, %v226_v23, %v240_v26 }
 0x191   :  { %vm190_vm10 = vcmp.lt.s32.totalorder %v185_v63, %v189_v27  ;;  %v244_v29 = vsel %vm243_vm8, %v230_v25, %v242_v28 }
 0x192   :  { %v246_v30 = vsel %vm190_vm10, %v244_v29, -1e+30 }
 0x193   :  { %v248_v31 = vsel %vm247_vm9, %v246_v30, -inf }
 0x194   :  { %249 = vmax.xlane.f32.xlu1 %v248_v31 }
 0x221   :  { %v250_v32 = vpop.xlane.xlu1 %249 }
 0x222   :  { %v251_v33 = vsub.f32 %v246_v30, %v250_v32 }
 0x224   :  { %v252_v34 = vmul.f32 1.442695, %v251_v33 }
 0x226   :  { %488 = vpow2.f32 %v252_v34 }
 0x230   :  { %v489_v36 = vpop.eup %488 }
 0x231   :  { %v254_v37 = vsel %vm190_vm10, %v489_v36, 0.0 }
 0x232   :  { %v255_v38 = vsel %vm247_vm9, %v254_v37, 0.0  ;;  %v307_v39 = vrot.slane %v254_v37, %v306_v35  ;;  %v272_v41 = vrot.slane %v254_v37, %v271_v40  ;;  %v279_v43 = vrot.slane %v254_v37, %v278_v42 }
 0x233   :  { %256 = vadd.xlane.f32.xlu1 %v255_v38  ;;  %v265_v45 = vrot.slane %v254_v37, %v264_v44  ;;  %v286_v47 = vrot.slane %v254_v37, %v285_v46  ;;  %v293_v49 = vrot.slane %v254_v37, %v292_v48  ;;  %v300_v51 = vrot.slane %v254_v37, %v299_v50 }
 0x234   :  { %309 = vbcast.lane.b32.xlu0 %v307_v39, 256  ;;  %v314_v53 = vrot.slane %v254_v37, %v313_v52 }
 0x244   :  { %274 = vbcast.lane.b32.xlu1 %v272_v41, 256 }
 0x248   :  { %281 = vbcast.lane.b32.xlu1 %v279_v43, 256 }
 0x24c   :  { %267 = vbcast.lane.b32.xlu1 %v265_v45, 256 }
 0x250   :  { %288 = vbcast.lane.b32.xlu1 %v286_v47, 256 }
 0x254   :  { %295 = vbcast.lane.b32.xlu1 %v293_v49, 256 }
 0x258   :  { %302 = vbcast.lane.b32.xlu1 %v300_v51, 256 }
 0x25c   :  { %316 = vbcast.lane.b32.xlu1 %v314_v53, 256 }
 0x2a6   :  { %v310_v61 = vpop.permute.xlu0 %309 }
 0x2a7   :  { %v324_v0 = vmul.f32 %v310_v61, %v571_v10 }
 0x2a9   :  { %v368_v16 = vsel %vm58_vm0, %v324_v0, 0.0 }
 0x2aa   :  { %v369_v20 = vrot.slane %v368_v16, 4 }
 0x2ac   :  { %v370_v29 = vadd.f32 %v369_v20, %v368_v16 }
 0x2ae   :  { %v371_v39 = vrot.slane %v370_v29, 2 }
 0x2c0   :  { %v257_v54 = vpop.xlane.xlu1 %256 }
 0x2c1   :  { %v258_v55 = vmax.f32 %v257_v54, 1e-30 }
 0x2c3   :  { %490 = vrcp.f32 %v258_v55 }
 0x2c4   :  { %v275_v56 = vpop.permute.xlu1 %274 }
 0x2c5   :  { %v319_v57 = vmul.f32 %v275_v56, %v542_v3 }
 0x2c7   :  { %v333_v58 = vsel %vm58_vm0, %v319_v57, 0.0 }
 0x2c8   :  { %v334_v59 = vrot.slane %v333_v58, 4  ;;  %v282_v60 = vpop.permute.xlu1 %281 }
 0x2c9   :  { %v320_v62 = vmul.f32 %v282_v60, %v559_v7 }
 0x2ca   :  { %v335_v1 = vadd.f32 %v334_v59, %v333_v58 }
 0x2cb   :  { %v340_v63 = vsel %vm58_vm0, %v320_v62, 0.0 }
 0x2cc   :  { %v341_v5 = vrot.slane %v340_v63, 4  ;;  %v268_v9 = vpop.permute.xlu1 %267  ;;  %v336_v7 = vrot.slane %v335_v1, 2 }
 0x2cd   :  { %v628_v12 = vpop.eup %490  ;;  %v318_v13 = vmul.f32 %v268_v9, %v537_v2 }
 0x2ce   :  { %v260_v3 = vmul.f32 %v628_v12, %v254_v37  ;;  %v342_v14 = vadd.f32 %v341_v5, %v340_v63  ;;  %v337_v22 = vadd.f32 %v336_v7, %v335_v1  ;;  %v383_v48 = vrot.slane %v628_v12, 1 }
 0x2cf   :  { %v326_v15 = vsel %vm58_vm0, %v318_v13, 0.0  ;;  %v385_v53 = vrot.slane %v628_v12, 3  ;;  %v384_v59 = vrot.slane %v628_v12, 2  ;;  %v388_v16 = vrot.slane %v628_v12, 6 }
 0x2d0   :  { %261 = vst.msk [vmem:[%s670_s5] sm:$0xff] %vm247_vm9, %v260_v3  ;;  %v327_v10 = vrot.slane %v326_v15, 4  ;;  %v289_v17 = vpop.permute.xlu1 %288  ;;  %v343_v2 = vrot.slane %v342_v14, 2  ;;  %v338_v32 = vrot.slane %v337_v22, 1 }
 0x2d1   :  { %v321_v18 = vmul.f32 %v289_v17, %v564_v8 }
 0x2d2   :  { %v328_v19 = vadd.f32 %v327_v10, %v326_v15  ;;  %v344_v30 = vadd.f32 %v343_v2, %v342_v14  ;;  %v387_v15 = vrot.slane %v628_v12, 5 }
 0x2d3   :  { %v347_v21 = vsel %vm58_vm0, %v321_v18, 0.0 }
 0x2d4   :  { %v329_v23 = vrot.slane %v328_v19, 2  ;;  %v348_v24 = vrot.slane %v347_v21, 4  ;;  %v296_v25 = vpop.permute.xlu1 %295  ;;  %v345_v40 = vrot.slane %v344_v30, 1 }
 0x2d5   :  { %v322_v26 = vmul.f32 %v296_v25, %v547_v4  ;;  %v339_v4 = vadd.f32 %v338_v32, %v337_v22 }
 0x2d6   :  { %v330_v27 = vadd.f32 %v329_v23, %v328_v19  ;;  %v349_v28 = vadd.f32 %v348_v24, %v347_v21  ;;  %v346_v52 = vadd.f32 %v345_v40, %v344_v30 }
 0x2d7   :  { %v354_v31 = vsel %vm58_vm0, %v322_v26, 0.0  ;;  %v399_v55 = vmul.f32 %v383_v48, %v339_v4 }
 0x2d8   :  { %v350_v33 = vrot.slane %v349_v28, 2  ;;  %v355_v8 = vrot.slane %v354_v31, 4  ;;  %v303_v34 = vpop.permute.xlu1 %302  ;;  %v331_v35 = vrot.slane %v330_v27, 1  ;;  %v400_v5 = vmul.f32 %v384_v59, %v346_v52 }
 0x2d9   :  { %v323_v36 = vmul.f32 %v303_v34, %v554_v6  ;;  %v372_v6 = vadd.f32 %v371_v39, %v370_v29  ;;  %v414_v9 = vrot.slane %v399_v55, 7 }
 0x2da   :  { %v351_v37 = vadd.f32 %v350_v33, %v349_v28  ;;  %v356_v38 = vadd.f32 %v355_v8, %v354_v31  ;;  %v332_v46 = vadd.f32 %v331_v35, %v330_v27  ;;  %v416_v20 = vrot.slane %v400_v5, 6 }
 0x2db   :  { %v361_v41 = vsel %vm58_vm0, %v323_v36, 0.0  ;;  %v373_v1 = vrot.slane %v372_v6, 1  ;;  %v389_v27 = vrot.slane %v628_v12, 7 }
 0x2dc   :  { %v352_v42 = vrot.slane %v351_v37, 1  ;;  %v357_v43 = vrot.slane %v356_v38, 2  ;;  %v362_v44 = vrot.slane %v361_v41, 4  ;;  %v317_v45 = vpop.permute.xlu1 %316  ;;  %v398_v60 = vmul.f32 %v628_v12, %v332_v46 }
 0x2dd   :  { %v325_v47 = vmul.f32 %v317_v45, %v576_v11  ;;  %v386_v11 = vrot.slane %v628_v12, 4  ;;  %v374_v19 = vadd.f32 %v373_v1, %v372_v6 }
 0x2de   :  { %v353_v49 = vadd.f32 %v352_v42, %v351_v37  ;;  %v358_v50 = vadd.f32 %v357_v43, %v356_v38  ;;  %v363_v51 = vadd.f32 %v362_v44, %v361_v41  ;;  %v415_v7 = vsel %vm231_vm2, %v414_v9, %v398_v60 }
 0x2df   :  { %v375_v54 = vsel %vm58_vm0, %v325_v47, 0.0  ;;  %v417_v23 = vsel %vm233_vm3, %v416_v20, %v415_v7  ;;  %v404_v24 = vmul.f32 %v388_v16, %v374_v19 }
 0x2e0   :  { %v359_v56 = vrot.slane %v358_v50, 1  ;;  %v364_v57 = vrot.slane %v363_v51, 2  ;;  %v376_v58 = vrot.slane %v375_v54, 4  ;;  %v401_v61 = vmul.f32 %v385_v53, %v353_v49 }
 0x2e1   :  { %v424_v32 = vrot.slane %v404_v24, 2 }
 0x2e2   :  { %v360_v62 = vadd.f32 %v359_v56, %v358_v50  ;;  %v365_v63 = vadd.f32 %v364_v57, %v363_v51  ;;  %v377_v0 = vadd.f32 %v376_v58, %v375_v54  ;;  %v418_v10 = vrot.slane %v401_v61, 5 }
 0x2e4   :  { %v402_v13 = vmul.f32 %v386_v11, %v360_v62  ;;  %v366_v3 = vrot.slane %v365_v63, 1  ;;  %v378_v14 = vrot.slane %v377_v0, 2  ;;  %v419_v25 = vsel %vm235_vm4, %v418_v10, %v417_v23 }
 0x2e6   :  { %v367_v17 = vadd.f32 %v366_v3, %v365_v63  ;;  %v379_v18 = vadd.f32 %v378_v14, %v377_v0  ;;  %v420_v2 = vrot.slane %v402_v13, 4 }
 0x2e8   :  { %v403_v21 = vmul.f32 %v387_v15, %v367_v17  ;;  %v380_v22 = vrot.slane %v379_v18, 1  ;;  %v421_v29 = vsel %vm237_vm5, %v420_v2, %v419_v25 }
 0x2ea   :  { %v422_v26 = vrot.slane %v403_v21, 3  ;;  %v381_v28 = vadd.f32 %v380_v22, %v379_v18 }
 0x2ec   :  { %v423_v30 = vsel %vm239_vm6, %v422_v26, %v421_v29  ;;  %v405_v31 = vmul.f32 %v389_v27, %v381_v28 }
 0x2ed   :  { %v425_v8 = vsel %vm241_vm7, %v424_v32, %v423_v30 }
 0x2ee   :  { %v426_v33 = vrot.slane %v405_v31, 1 }
 0x2f0   :  { %v427_v34 = vsel %vm243_vm8, %v426_v33, %v425_v8 }
 0x2f1   :  { %429 = vst.msk [vmem:[%s671_s6] sm:$0xff] %vm58_vm0, %v427_v34 }

// kernel: han_forward.5
= control target key start
LH: loop header
LB: loop body
LE: loop exit
PB: predicated region body
PF: predicated region fallthrough
CT: control target
= control target key end

     0   :  { %vm25_vm0 = vcmask 261120   ;;  %v5204_v0 = vmov 0.0   ;;  %vm3638_vm1 = vmmov 0   ;;  %s3641_s12 = smov 96   ;;  %vm538_vm2 = vcmask 1041409   ;;  %s5198_s1 = inlined_call_operand.vmem [shape: bf16[32,96], index: 1, kind: input, shape index: {}]   ;;  %s5199_s3 = inlined_call_operand.vmem [shape: bf16[32,96], index: 3, kind: input, shape index: {}]   ;;  %s5200_s0 = inlined_call_operand.vmem [shape: bf16[8,8,32], index: 0, kind: input, shape index: {}]   ;;  %s5201_s4 = inlined_call_operand.vmem [shape: f32[1,96], index: 4, kind: input, shape index: {}]   ;;  %s5202_s2 = inlined_call_operand.vmem [shape: f32[1,96], index: 2, kind: input, shape index: {}]   ;;  %s5203_s5 = inlined_call_operand.vmem [shape: f32[8,8,32], index: 5, kind: output, shape index: {}]  }
   0x1   :  { %3170 = vmatprep.subr.bf16.mxu1 %v5204_v0  ;;  %v3239_v1 = vld [vmem:[%s5198_s1] sm:$0xff]   ;;  %3174 = vmatprep.mubr.msk.bf16.mxu1 %vm3638_vm1, %v5204_v0  ;;  %26 = vst.msk [vmem:[#allocation2] sm:$0xff] %vm25_vm0, %v5204_v0  ;;  %v3241_v3 = vld [vmem:[%s5198_s1 + $0x8] sm:$0xff]   ;;  %v3245_v7 = vld [vmem:[%s5200_s0 + $0x10] sm:$0xff]   ;;  %vm541_vm3 = vcmask 1042434   ;;  %vm544_vm4 = vcmask 1043459  }
   0x2   :  { %v3683_v2 = vld [vmem:[%s5199_s3] sm:$0xff]   ;;  %3158 = vmatprep.subr.bf16.mxu0 %v3239_v1  ;;  %v3692_v4 = vld [vmem:[%s5199_s3 + $0x8] sm:$0xff]   ;;  %v3246_v10 = vld [vmem:[%s5200_s0 + $0x18] sm:$0xff]   ;;  %vm547_vm5 = vcmask 1044484   ;;  %vm550_vm6 = vcmask 1045509   ;;  %vm553_vm7 = vcmask 1046534  }
   0x3   :  { %3171 = vmatpush3.bf16.msra.mxu1 %v3683_v2  ;;  %3159 = vmatpush3.bf16.msra.mxu0 %v3239_v1  ;;  %v3243_v5 = vld [vmem:[%s5200_s0] sm:$0xff]   ;;  %v3244_v6 = vld [vmem:[%s5200_s0 + $0x8] sm:$0xff]   ;;  %s3639_s0 = smov 64   ;;  %vm556_vm8 = vcmask 1047559   ;;  %vm504_vm9 = vcmask 253952   ;;  %vm868_vm10 = vcmask 254977  }
   0x4   :  { %3172 = vmatprep.subr.bf16.mxu1 %v5204_v0  ;;  %3160 = vmatprep.subr.bf16.mxu0 %v3241_v3  ;;  %v3734_v11 = vld [vmem:[%s5201_s4] ss:$0 sm:$0xff]  ;;  %vm1225_vm11 = vcmask 256002   ;;  %vm1582_vm12 = vcmask 257027   ;;  %vm1939_vm13 = vcmask 258052   ;;  %vm2296_vm14 = vcmask 259077  }
   0x5   :  { %3162 = vmatprep.mubr.msk.bf16.mxu0 %vm25_vm0, %v3243_v5  ;;  %v3042_v32 = vld [vmem:[%s5202_s2] ss:$0 sm:$0xff]  ;;  %s3640_s2 = smov 32   ;;  %vm2653_vm15 = vcmask 260102  }
   0x7   :  { %3173 = vmatpush3.bf16.msra.mxu1 %v3692_v4  ;;  %3161 = vmatpush3.bf16.msra.mxu0 %v3241_v3 }
   0x8   :  { %v3706_v8 = vld [vmem:[#allocation2] sm:$0xff]  ;;  %3178 = vmatprep.subr.bf16.mxu1 %v5204_v0  ;;  %3186 = vmatprep.subr.bf16.mxu0 %v5204_v0 }
   0x9   :  { %v162_v9 = vpack.c.bf16 %v3706_v8, %v3706_v8 }
   0xa   :  { %3163 = vmatmul.mubr.msk.bf16.vlgmr.msra.gmra.mrb[0].mxu0 %vm25_vm0, %v3244_v6 }
   0xb   :  { %3175 = vmatmul.mubr.msk.bf16.vlgmr.msra.gmra.mrb[0].mxu1 %vm25_vm0, %v162_v9  ;;  %3166 = vmatprep.mubr.msk.bf16.mxu0 %vm25_vm0, %v3245_v7 }
   0xc   :  { %3179 = vmatpush3.bf16.msra.mxu1 %v3683_v2  ;;  %3182 = vmatprep.mubr.msk.bf16.mxu1 %vm3638_vm1, %v5204_v0 }
   0xd   :  { %3180 = vmatprep.subr.bf16.mxu1 %v5204_v0  ;;  %3187 = vmatpush3.bf16.msra.mxu0 %v3683_v2 }
   0xe   :  { %3188 = vmatprep.subr.bf16.mxu0 %v5204_v0 }
  0x10   :  { %3181 = vmatpush3.bf16.msra.mxu1 %v3692_v4 }
  0x11   :  { %3194 = vmatprep.subr.bf16.mxu1 %v5204_v0  ;;  %3189 = vmatpush3.bf16.msra.mxu0 %v3692_v4 }
  0x12   :  { %3167 = vmatmul.mubr.msk.bf16.gmra.mrb[4].mxu0 %vm25_vm0, %v3246_v10  ;;  %3202 = vmatprep.subr.bf16.mxu0 %v5204_v0 }
  0x13   :  { %3190 = vmatprep.mubr.msk.bf16.mxu0 %vm3638_vm1, %v5204_v0 }
  0xdd   :  { %v3164_v13 = vpop.f32.mrb[0].mxu0 }
  0xde   :  { %v218_v12 = vpop.f32.mrb[0].mxu1  ;;  %v125_v16 = vpop.f32.mrb[1].mxu0  ;;  %v3753_v36 = vadd.f32 %v3164_v13, %v3042_v32 }
  0xdf   :  { %v219_v14 = vadd.f32 %v3734_v11, %v218_v12  ;;  %v3176_v15 = vpop.f32.mrb[1].mxu1  ;;  %v3165_v18 = vpop.f32.mrb[2].mxu0  ;;  %v3748_v33 = vadd.f32 %v3042_v32, %v125_v16 }
  0xe0   :  { %v221_v17 = vpop.f32.mrb[2].mxu1  ;;  %v128_v20 = vpop.f32.mrb[3].mxu0  ;;  %v3756_v39 = vadd.f32 %v3165_v18, %v3042_v32 }
  0xe1   :  { %296 = vrot.lane.b32.xlu1 %v219_v14, %s3639_s0  ;;  %v3177_v19 = vpop.f32.mrb[3].mxu1  ;;  %v225_v21 = vrot.slane %v219_v14, 1  ;;  %v227_v22 = vrot.slane %v219_v14, 3  ;;  %v226_v23 = vrot.slane %v219_v14, 2  ;;  %v229_v26 = vrot.slane %v219_v14, 5 }
  0xe2   :  { %v228_v29 = vrot.slane %v219_v14, 4  ;;  %v231_v30 = vrot.slane %v219_v14, 7  ;;  %v230_v31 = vrot.slane %v219_v14, 6  ;;  %v3750_v34 = vadd.f32 %v3042_v32, %v128_v20 }
  0xe3   :  { %298 = vrot.lane.b32.xlu0 %v225_v21, %s3639_s0  ;;  %v240_v35 = vadd.f32 %v219_v14, %v3748_v33  ;;  %v242_v40 = vadd.f32 %v226_v23, %v3753_v36  ;;  %v243_v43 = vadd.f32 %v227_v22, %v3756_v39 }
  0xe4   :  { %v241_v37 = vadd.f32 %v225_v21, %v3750_v34 }
  0xe5   :  { %302 = vrot.lane.b32.xlu1 %v227_v22, %s3639_s0  ;;  %v3168_v24 = vpop.f32.mrb[4].mxu0  ;;  %v3057_v38 = vmul.f32 -1.442695, %v240_v35  ;;  %v3059_v45 = vmul.f32 -1.442695, %v242_v40 }
  0xe6   :  { %v141_v25 = vpop.f32.mrb[5].mxu0  ;;  %v3058_v42 = vmul.f32 -1.442695, %v241_v37  ;;  %v3762_v44 = vadd.f32 %v3168_v24, %v3042_v32  ;;  %v3060_v48 = vmul.f32 -1.442695, %v243_v43  ;;  %v425_v43 = vrot.slane %v3706_v8, 1 }
  0xe7   :  { %300 = vrot.lane.b32.xlu0 %v226_v23, %s3639_s0  ;;  %v3169_v27 = vpop.f32.mrb[6].mxu0  ;;  %v3759_v41 = vadd.f32 %v3042_v32, %v141_v25  ;;  %3247 = vpow2.f32 %v3057_v38 }
  0xe8   :  { %v144_v28 = vpop.f32.mrb[7].mxu0  ;;  %3249 = vpow2.f32 %v3058_v42  ;;  %v246_v49 = vadd.f32 %v230_v31, %v3762_v44  ;;  %v3768_v50 = vadd.f32 %v3169_v27, %v3042_v32 }
  0xe9   :  { %306 = vrot.lane.b32.xlu1 %v229_v26, %s3639_s0  ;;  %v3764_v46 = vadd.f32 %v3042_v32, %v144_v28  ;;  %v244_v47 = vadd.f32 %v228_v29, %v3759_v41  ;;  %3251 = vpow2.f32 %v3059_v45  ;;  %v426_v45 = vrot.slane %v3706_v8, 2 }
  0xea   :  { %3253 = vpow2.f32 %v3060_v48  ;;  %v3063_v53 = vmul.f32 -1.442695, %v246_v49  ;;  %v247_v55 = vadd.f32 %v231_v30, %v3768_v50  ;;  %v428_v48 = vrot.slane %v3706_v8, 4 }
  0xeb   :  { %304 = vrot.lane.b32.xlu0 %v228_v29, %s3639_s0  ;;  %v3061_v51 = vmul.f32 -1.442695, %v244_v47  ;;  %v245_v52 = vadd.f32 %v229_v26, %v3764_v46  ;;  %v427_v47 = vrot.slane %v3706_v8, 3  ;;  %v429_v49 = vrot.slane %v3706_v8, 5 }
  0xec   :  { %v3064_v59 = vmul.f32 -1.442695, %v247_v55 }
  0xed   :  { %310 = vrot.lane.b32.xlu1 %v231_v30, %s3639_s0  ;;  %3255 = vpow2.f32 %v3061_v51  ;;  %v3062_v56 = vmul.f32 -1.442695, %v245_v52  ;;  %v430_v51 = vrot.slane %v3706_v8, 6 }
  0xee   :  { %3257 = vpow2.f32 %v3063_v53 }
  0xef   :  { %308 = vrot.lane.b32.xlu0 %v230_v31, %s3639_s0  ;;  %3259 = vpow2.f32 %v3062_v56 }
  0xf1   :  { %v3248_v54 = vpop.eup %3247 }
  0xf2   :  { %v272_v57 = vadd.f32 1.0, %v3248_v54  ;;  %v3250_v58 = vpop.eup %3249 }
  0xf3   :  { %v3252_v60 = vpop.eup %3251  ;;  %v273_v61 = vadd.f32 1.0, %v3250_v58 }
  0xf4   :  { %3261 = vrcp.f32 %v272_v57  ;;  %v3254_v62 = vpop.eup %3253  ;;  %v274_v63 = vadd.f32 1.0, %v3252_v60 }
  0xf5   :  { %3263 = vpow2.f32 %v3064_v59  ;;  %v275_v3 = vadd.f32 1.0, %v3254_v62 }
  0xf6   :  { %3265 = vrcp.f32 %v273_v61 }
  0xf7   :  { %v3256_v1 = vpop.eup %3255  ;;  %3267 = vrcp.f32 %v274_v63 }
  0xf8   :  { %v3258_v5 = vpop.eup %3257  ;;  %v276_v6 = vadd.f32 1.0, %v3256_v1  ;;  %3269 = vrcp.f32 %v275_v3 }
  0xf9   :  { %v3260_v7 = vpop.eup %3259  ;;  %v278_v9 = vadd.f32 1.0, %v3258_v5 }
  0xfa   :  { %3271 = vrcp.f32 %v276_v6  ;;  %v277_v13 = vadd.f32 1.0, %v3260_v7 }
  0xfb   :  { %3273 = vrcp.f32 %v278_v9 }
  0xfc   :  { %3275 = vrcp.f32 %v277_v13 }
  0xfe   :  { %v3772_v10 = vpop.eup %3261 }
  0xff   :  { %v3264_v14 = vpop.eup %3263 }
 0x100   :  { %v3776_v17 = vpop.eup %3265  ;;  %v279_v18 = vadd.f32 1.0, %v3264_v14  ;;  %v431_v14 = vrot.slane %v3706_v8, 7 }
 0x101   :  { %v3779_v21 = vpop.eup %3267 }
 0x102   :  { %3277 = vrcp.f32 %v279_v18  ;;  %v3783_v24 = vpop.eup %3269 }
 0x104   :  { %v3786_v25 = vpop.eup %3271 }
 0x105   :  { %v3790_v30 = vpop.eup %3273 }
 0x106   :  { %v3794_v31 = vpop.eup %3275 }
 0x10c   :  { %v3800_v40 = vpop.eup %3277 }
 0x153   :  { %v297_v12 = vpop.permute.xlu1 %296 }
 0x154   :  { %v320_v15 = vmul.f32 %v3772_v10, %v297_v12 }
 0x155   :  { %v299_v16 = vpop.permute.xlu0 %298 }
 0x156   :  { %336 = vrot.lane.b32.xlu0 %v320_v15, %s3639_s0  ;;  %v321_v20 = vmul.f32 %v3776_v17, %v299_v16 }
 0x157   :  { %v303_v19 = vpop.permute.xlu1 %302 }
 0x158   :  { %v323_v28 = vmul.f32 %v3783_v24, %v303_v19 }
 0x159   :  { %v301_v22 = vpop.permute.xlu0 %300 }
 0x15a   :  { %v322_v23 = vmul.f32 %v3779_v21, %v301_v22  ;;  %338 = vrot.lane.b32.xlu0 %v321_v20, %s3639_s0 }
 0x15b   :  { %v307_v26 = vpop.permute.xlu1 %306 }
 0x15c   :  { %340 = vrot.lane.b32.xlu1 %v322_v23, %s3639_s0  ;;  %v325_v35 = vmul.f32 %v3794_v31, %v307_v26 }
 0x15d   :  { %v305_v27 = vpop.permute.xlu0 %304 }
 0x15e   :  { %v324_v29 = vmul.f32 %v3786_v25, %v305_v27 }
 0x15f   :  { %v311_v38 = vpop.permute.xlu1 %310 }
 0x160   :  { %342 = vrot.lane.b32.xlu1 %v323_v28, %s3639_s0  ;;  %344 = vrot.lane.b32.xlu0 %v324_v29, %s3639_s0  ;;  %v327_v42 = vmul.f32 %v3800_v40, %v311_v38  ;;  %v377_v29 = vsub.f32 1.0, %v3776_v17 }
 0x161   :  { %v309_v32 = vpop.permute.xlu0 %308 }
 0x162   :  { %v326_v37 = vmul.f32 %v3790_v30, %v309_v32 }
 0x164   :  { %346 = vrot.lane.b32.xlu1 %v325_v35, %s3639_s0  ;;  %348 = vrot.lane.b32.xlu0 %v326_v37, %s3639_s0 }
 0x168   :  { %350 = vrot.lane.b32.xlu1 %v327_v42, %s3639_s0  ;;  %432 = vrot.lane.b32.xlu0 %v3706_v8, %s3640_s2  ;;  %v378_v42 = vsub.f32 1.0, %v3779_v21 }
 0x16c   :  { %434 = vrot.lane.b32.xlu1 %v425_v43, %s3640_s2  ;;  %v376_v43 = vsub.f32 1.0, %v3772_v10 }
 0x170   :  { %436 = vrot.lane.b32.xlu1 %v426_v45, %s3640_s2 }
 0x174   :  { %438 = vrot.lane.b32.xlu1 %v427_v47, %s3640_s2 }
 0x178   :  { %440 = vrot.lane.b32.xlu1 %v428_v48, %s3640_s2 }
 0x17c   :  { %442 = vrot.lane.b32.xlu1 %v429_v49, %s3640_s2 }
 0x180   :  { %444 = vrot.lane.b32.xlu1 %v430_v51, %s3640_s2  ;;  %v379_v51 = vsub.f32 1.0, %v3783_v24 }
 0x1c8   :  { %v337_v52 = vpop.permute.xlu0 %336 }
 0x1c9   :  { %v360_v53 = vadd.f32 %v337_v52, %v3748_v33 }
 0x1cb   :  { %3279 = vtanh.f32 %v360_v53 }
 0x1cc   :  { %v339_v54 = vpop.permute.xlu0 %338 }
 0x1cd   :  { %v361_v55 = vadd.f32 %v339_v54, %v3750_v34 }
 0x1ce   :  { %v341_v56 = vpop.permute.xlu1 %340 }
 0x1cf   :  { %3281 = vtanh.f32 %v361_v55  ;;  %v362_v57 = vadd.f32 %v341_v56, %v3753_v36  ;;  %v380_v56 = vsub.f32 1.0, %v3786_v25 }
 0x1d1   :  { %3283 = vtanh.f32 %v362_v57 }
 0x1d2   :  { %v343_v58 = vpop.permute.xlu1 %342  ;;  %v345_v59 = vpop.permute.xlu0 %344 }
 0x1d3   :  { %v363_v60 = vadd.f32 %v343_v58, %v3756_v39  ;;  %v364_v61 = vadd.f32 %v345_v59, %v3759_v41 }
 0x1d5   :  { %v3280_v62 = vpop.eup %3279  ;;  %3285 = vtanh.f32 %v363_v60 }
 0x1d6   :  { %v347_v63 = vpop.permute.xlu1 %346  ;;  %392 = vrot.lane.b32.xlu0 %v3280_v62, %s3641_s12  ;;  %3287 = vtanh.f32 %v364_v61  ;;  %v349_v3 = vpop.permute.xlu0 %348 }
 0x1d7   :  { %v365_v1 = vadd.f32 %v347_v63, %v3764_v46  ;;  %v366_v6 = vadd.f32 %v349_v3, %v3762_v44  ;;  %v381_v63 = vsub.f32 1.0, %v3794_v31 }
 0x1d9   :  { %v3282_v5 = vpop.eup %3281  ;;  %3289 = vtanh.f32 %v365_v1 }
 0x1da   :  { %394 = vrot.lane.b32.xlu0 %v3282_v5, %s3641_s12  ;;  %v351_v7 = vpop.permute.xlu1 %350  ;;  %3291 = vtanh.f32 %v366_v6  ;;  %v433_v8 = vpop.permute.xlu0 %432 }
 0x1db   :  { %v3284_v9 = vpop.eup %3283  ;;  %v367_v13 = vadd.f32 %v351_v7, %v3768_v50  ;;  %v456_v57 = vmul.f32 %v3772_v10, %v433_v8 }
 0x1dd   :  { %3293 = vtanh.f32 %v367_v13  ;;  %v382_v13 = vsub.f32 1.0, %v3790_v30 }
 0x1de   :  { %396 = vrot.lane.b32.xlu0 %v3284_v9, %s3641_s12  ;;  %v435_v20 = vpop.permute.xlu1 %434 }
 0x1df   :  { %v3286_v12 = vpop.eup %3285  ;;  %v457_v37 = vmul.f32 %v3776_v17, %v435_v20 }
 0x1e0   :  { %398 = vrot.lane.b32.xlu1 %v3286_v12, %s3641_s12  ;;  %v3288_v15 = vpop.eup %3287 }
 0x1e2   :  { %400 = vrot.lane.b32.xlu0 %v3288_v15, %s3641_s12  ;;  %v437_v22 = vpop.permute.xlu1 %436 }
 0x1e3   :  { %v3290_v16 = vpop.eup %3289  ;;  %v458_v48 = vmul.f32 %v3779_v21, %v437_v22 }
 0x1e4   :  { %446 = vrot.lane.b32.xlu1 %v431_v14, %s3640_s2  ;;  %v3292_v18 = vpop.eup %3291 }
 0x1e6   :  { %402 = vrot.lane.b32.xlu0 %v3290_v16, %s3641_s12  ;;  %v439_v23 = vpop.permute.xlu1 %438 }
 0x1e7   :  { %v3294_v19 = vpop.eup %3293  ;;  %v459_v54 = vmul.f32 %v3783_v24, %v439_v23 }
 0x1ea   :  { %404 = vrot.lane.b32.xlu0 %v3292_v18, %s3641_s12  ;;  %v441_v26 = vpop.permute.xlu1 %440 }
 0x1eb   :  { %v460_v61 = vmul.f32 %v3786_v25, %v441_v26 }
 0x1ee   :  { %406 = vrot.lane.b32.xlu0 %v3294_v19, %s3641_s12  ;;  %v443_v27 = vpop.permute.xlu1 %442 }
 0x1ef   :  { %v461_v5 = vmul.f32 %v3794_v31, %v443_v27  ;;  %v383_v27 = vsub.f32 1.0, %v3800_v40 }
 0x1f2   :  { %v445_v38 = vpop.permute.xlu1 %444 }
 0x1f3   :  { %v462_v31 = vmul.f32 %v3790_v30, %v445_v38 }
 0x248   :  { %v393_v28 = vpop.permute.xlu0 %392 }
 0x249   :  { %v416_v52 = vmul.f32 %v393_v28, %v376_v43 }
 0x24b   :  { %v3854_v62 = vadd.f32 %v456_v57, %v416_v52 }
 0x24c   :  { %v395_v32 = vpop.permute.xlu0 %394 }
 0x24d   :  { %v417_v35 = vmul.f32 %v395_v32, %v377_v29  ;;  %v513_v25 = vpack.c.bf16 %v3854_v62, %v3854_v62 }
 0x24f   :  { %v3840_v45 = vadd.f32 %v457_v37, %v417_v35  ;;  %v529_v23 = vunpack.c.l.b16 %v513_v25 }
 0x250   :  { %v397_v47 = vpop.permute.xlu0 %396 }
 0x251   :  { %v418_v49 = vmul.f32 %v397_v47, %v378_v42  ;;  %v514_v58 = vpack.c.bf16 %v3840_v45, %v3840_v45 }
 0x252   :  { %v399_v53 = vpop.permute.xlu1 %398 }
 0x253   :  { %v3845_v55 = vadd.f32 %v458_v48, %v418_v49  ;;  %v419_v17 = vmul.f32 %v399_v53, %v379_v51  ;;  %v530_v1 = vunpack.c.l.b16 %v514_v58 }
 0x254   :  { %v401_v59 = vpop.permute.xlu0 %400 }
 0x255   :  { %v3851_v60 = vadd.f32 %v459_v54, %v419_v17  ;;  %v420_v21 = vmul.f32 %v401_v59, %v380_v56  ;;  %v515_v24 = vpack.c.bf16 %v3845_v55, %v3845_v55  ;;  %v537_v14 = vrot.slane %v530_v1, 7 }
 0x256   :  { %v447_v19 = vpop.permute.xlu1 %446 }
 0x257   :  { %v3859_v3 = vadd.f32 %v460_v61, %v420_v21  ;;  %v516_v6 = vpack.c.bf16 %v3851_v60, %v3851_v60  ;;  %v531_v9 = vunpack.c.l.b16 %v515_v24  ;;  %v539_v28 = vsel %vm538_vm2, %v537_v14, %v529_v23 }
 0x258   :  { %v403_v10 = vpop.permute.xlu0 %402  ;;  %v463_v32 = vmul.f32 %v3800_v40, %v447_v19 }
 0x259   :  { %v421_v7 = vmul.f32 %v403_v10, %v381_v63  ;;  %v517_v15 = vpack.c.bf16 %v3859_v3, %v3859_v3  ;;  %v532_v18 = vunpack.c.l.b16 %v516_v6  ;;  %v540_v26 = vrot.slane %v531_v9, 6 }
 0x25b   :  { %v3866_v12 = vadd.f32 %v461_v5, %v421_v7  ;;  %v533_v29 = vunpack.c.l.b16 %v517_v15  ;;  %v543_v30 = vrot.slane %v532_v18, 5  ;;  %v542_v43 = vsel %vm541_vm3, %v540_v26, %v539_v28 }
 0x25c   :  { %v405_v16 = vpop.permute.xlu0 %404 }
 0x25d   :  { %v518_v20 = vpack.c.bf16 %v3866_v12, %v3866_v12  ;;  %v422_v22 = vmul.f32 %v405_v16, %v382_v13  ;;  %v546_v49 = vrot.slane %v533_v29, 4  ;;  %v545_v40 = vsel %vm544_vm4, %v543_v30, %v542_v43 }
 0x25f   :  { %v3874_v8 = vadd.f32 %v462_v31, %v422_v22  ;;  %v534_v37 = vunpack.c.l.b16 %v518_v20  ;;  %v548_v17 = vsel %vm547_vm5, %v546_v49, %v545_v40 }
 0x260   :  { %v407_v35 = vpop.permute.xlu0 %406 }
 0x261   :  { %v519_v38 = vpack.c.bf16 %v3874_v8, %v3874_v8  ;;  %v423_v42 = vmul.f32 %v407_v35, %v383_v27  ;;  %v549_v51 = vrot.slane %v534_v37, 3 }
 0x263   :  { %v535_v47 = vunpack.c.l.b16 %v519_v38  ;;  %v3882_v48 = vadd.f32 %v463_v32, %v423_v42  ;;  %v551_v56 = vsel %vm550_vm6, %v549_v51, %v548_v17 }
 0x265   :  { %v520_v52 = vpack.c.bf16 %v3882_v48, %v3882_v48  ;;  %v552_v53 = vrot.slane %v535_v47, 2 }
 0x267   :  { %v536_v54 = vunpack.c.l.b16 %v520_v52  ;;  %v554_v58 = vsel %vm553_vm7, %v552_v53, %v551_v56 }
 0x269   :  { %v555_v57 = vrot.slane %v536_v54, 1 }
 0x26b   :  { %v557_v59 = vsel %vm556_vm8, %v555_v57, %v554_v58 }
 0x26c   :  { %v558_v21 = vpack.c.b16 %v557_v59, %v557_v59 }
 0x26e   :  { %559 = vrot.lane.b32.xlu0 %v558_v21, %s3641_s12 }
 0x2e0   :  { %v560_v61 = vpop.permute.xlu0 %559 }
 0x2e1   :  { %3183 = vmatmul.mubr.msk.bf16.vlgmr.msra.gmra.mrb[4].mxu1 %vm25_vm0, %v560_v61 }
 0x2e2   :  { %3195 = vmatpush3.bf16.msra.mxu1 %v3683_v2  ;;  %3198 = vmatprep.mubr.msk.bf16.mxu1 %vm3638_vm1, %v5204_v0 }
 0x2e3   :  { %3196 = vmatprep.subr.bf16.mxu1 %v5204_v0 }
 0x2e6   :  { %3197 = vmatpush3.bf16.msra.mxu1 %v3692_v4 }
 0x2e7   :  { %3210 = vmatprep.subr.bf16.mxu1 %v5204_v0 }
 0x3b4   :  { %v598_v24 = vpop.f32.mrb[4].mxu1 }
 0x3b5   :  { %v599_v63 = vadd.f32 %v3734_v11, %v598_v24  ;;  %v3184_v1 = vpop.f32.mrb[5].mxu1 }
 0x3b6   :  { %v601_v10 = vpop.f32.mrb[6].mxu1 }
 0x3b7   :  { %678 = vrot.lane.b32.xlu1 %v599_v63, %s3639_s0  ;;  %v3185_v5 = vpop.f32.mrb[7].mxu1  ;;  %v606_v6 = vrot.slane %v599_v63, 1  ;;  %v605_v2 = vrot.slane %v599_v63, 7  ;;  %v607_v7 = vrot.slane %v599_v63, 2  ;;  %v608_v4 = vrot.slane %v599_v63, 3 }
 0x3b8   :  { %v609_v25 = vrot.slane %v599_v63, 4  ;;  %v610_v9 = vrot.slane %v599_v63, 5  ;;  %v611_v13 = vrot.slane %v599_v63, 6  ;;  %v621_v14 = vadd.f32 %v599_v63, %v3750_v34 }
 0x3b9   :  { %680 = vrot.lane.b32.xlu0 %v606_v6, %s3639_s0  ;;  %v622_v15 = vadd.f32 %v606_v6, %v3753_v36  ;;  %v620_v16 = vadd.f32 %v605_v2, %v3748_v33  ;;  %v623_v19 = vadd.f32 %v607_v7, %v3756_v39  ;;  %v624_v22 = vadd.f32 %v608_v4, %v3759_v41 }
 0x3ba   :  { %v3067_v31 = vmul.f32 -1.442695, %v621_v14  ;;  %v625_v26 = vadd.f32 %v609_v25, %v3764_v46  ;;  %v626_v28 = vadd.f32 %v610_v9, %v3762_v44  ;;  %v627_v32 = vadd.f32 %v611_v13, %v3768_v50 }
 0x3bb   :  { %676 = vrot.lane.b32.xlu1 %v605_v2, %s3639_s0  ;;  %v3068_v18 = vmul.f32 -1.442695, %v622_v15  ;;  %v3066_v20 = vmul.f32 -1.442695, %v620_v16  ;;  %v3069_v23 = vmul.f32 -1.442695, %v623_v19 }
 0x3bc   :  { %3295 = vpow2.f32 %v3067_v31  ;;  %v3070_v27 = vmul.f32 -1.442695, %v624_v22  ;;  %v3071_v29 = vmul.f32 -1.442695, %v625_v26  ;;  %v3072_v35 = vmul.f32 -1.442695, %v626_v28 }
 0x3bd   :  { %682 = vrot.lane.b32.xlu0 %v607_v7, %s3639_s0  ;;  %3297 = vpow2.f32 %v3068_v18  ;;  %v3073_v37 = vmul.f32 -1.442695, %v627_v32 }
 0x3be   :  { %3299 = vpow2.f32 %v3066_v20 }
 0x3bf   :  { %684 = vrot.lane.b32.xlu1 %v608_v4, %s3639_s0  ;;  %3301 = vpow2.f32 %v3069_v23 }
 0x3c0   :  { %3303 = vpow2.f32 %v3070_v27 }
 0x3c1   :  { %686 = vrot.lane.b32.xlu0 %v609_v25, %s3639_s0  ;;  %3305 = vpow2.f32 %v3071_v29 }
 0x3c2   :  { %3307 = vpow2.f32 %v3072_v35 }
 0x3c3   :  { %688 = vrot.lane.b32.xlu1 %v610_v9, %s3639_s0  ;;  %3309 = vpow2.f32 %v3073_v37 }
 0x3c5   :  { %690 = vrot.lane.b32.xlu0 %v611_v13, %s3639_s0 }
 0x3c6   :  { %v3296_v30 = vpop.eup %3295 }
 0x3c7   :  { %v3298_v38 = vpop.eup %3297  ;;  %v653_v42 = vadd.f32 1.0, %v3296_v30 }
 0x3c8   :  { %v3300_v43 = vpop.eup %3299  ;;  %v654_v47 = vadd.f32 1.0, %v3298_v38 }
 0x3c9   :  { %v3302_v49 = vpop.eup %3301  ;;  %v652_v51 = vadd.f32 1.0, %v3300_v43  ;;  %3311 = vrcp.f32 %v653_v42 }
 0x3ca   :  { %v3304_v52 = vpop.eup %3303  ;;  %3313 = vrcp.f32 %v654_v47  ;;  %v655_v40 = vadd.f32 1.0, %v3302_v49 }
 0x3cb   :  { %v3306_v53 = vpop.eup %3305  ;;  %3315 = vrcp.f32 %v652_v51  ;;  %v656_v54 = vadd.f32 1.0, %v3304_v52 }
 0x3cc   :  { %v3308_v17 = vpop.eup %3307  ;;  %3317 = vrcp.f32 %v655_v40  ;;  %v657_v56 = vadd.f32 1.0, %v3306_v53 }
 0x3cd   :  { %v3310_v57 = vpop.eup %3309  ;;  %3319 = vrcp.f32 %v656_v54  ;;  %v658_v58 = vadd.f32 1.0, %v3308_v17 }
 0x3ce   :  { %3321 = vrcp.f32 %v657_v56  ;;  %v659_v21 = vadd.f32 1.0, %v3310_v57 }
 0x3cf   :  { %3323 = vrcp.f32 %v658_v58 }
 0x3d0   :  { %3325 = vrcp.f32 %v659_v21 }
 0x3d3   :  { %v3916_v59 = vpop.eup %3311 }
 0x3d4   :  { %v3919_v63 = vpop.eup %3313 }
 0x3d5   :  { %v3923_v5 = vpop.eup %3315 }
 0x3d6   :  { %v3927_v7 = vpop.eup %3317 }
 0x3d7   :  { %v3931_v9 = vpop.eup %3319 }
 0x3d8   :  { %v3935_v15 = vpop.eup %3321 }
 0x3d9   :  { %v3939_v18 = vpop.eup %3323 }
 0x3da   :  { %v3943_v22 = vpop.eup %3325 }
 0x429   :  { %v679_v61 = vpop.permute.xlu1 %678 }
 0x42a   :  { %v701_v24 = vmul.f32 %v3916_v59, %v679_v61 }
 0x42b   :  { %v681_v1 = vpop.permute.xlu0 %680 }
 0x42c   :  { %v702_v10 = vmul.f32 %v3919_v63, %v681_v1  ;;  %718 = vrot.lane.b32.xlu1 %v701_v24, %s3639_s0  ;;  %v757_v1 = vsub.f32 1.0, %v3916_v59 }
 0x42d   :  { %v677_v6 = vpop.permute.xlu1 %676 }
 0x42e   :  { %v700_v2 = vmul.f32 %v3923_v5, %v677_v6  ;;  %720 = vrot.lane.b32.xlu0 %v702_v10, %s3639_s0  ;;  %v805_v10 = vrot.slane %v3840_v45, 7 }
 0x42f   :  { %v683_v4 = vpop.permute.xlu0 %682 }
 0x430   :  { %v703_v25 = vmul.f32 %v3927_v7, %v683_v4  ;;  %716 = vrot.lane.b32.xlu1 %v700_v2, %s3639_s0  ;;  %v758_v4 = vsub.f32 1.0, %v3919_v63 }
 0x431   :  { %v685_v13 = vpop.permute.xlu1 %684 }
 0x432   :  { %v704_v14 = vmul.f32 %v3931_v9, %v685_v13  ;;  %722 = vrot.lane.b32.xlu0 %v703_v25, %s3639_s0  ;;  %v806_v25 = vrot.slane %v3845_v55, 7  ;;  %v821_v13 = vmul.f32 %v3916_v59, %v805_v10  ;;  %v759_v59 = vsub.f32 1.0, %v3927_v7 }
 0x433   :  { %v687_v16 = vpop.permute.xlu0 %686 }
 0x434   :  { %v705_v31 = vmul.f32 %v3935_v15, %v687_v16  ;;  %724 = vrot.lane.b32.xlu1 %v704_v14, %s3639_s0  ;;  %v822_v16 = vmul.f32 %v3919_v63, %v806_v25 }
 0x435   :  { %v689_v19 = vpop.permute.xlu1 %688 }
 0x436   :  { %v706_v20 = vmul.f32 %v3939_v18, %v689_v19  ;;  %726 = vrot.lane.b32.xlu0 %v705_v31, %s3639_s0  ;;  %v756_v19 = vsub.f32 1.0, %v3923_v5 }
 0x437   :  { %v691_v23 = vpop.permute.xlu0 %690 }
 0x438   :  { %v707_v26 = vmul.f32 %v3943_v22, %v691_v23  ;;  %728 = vrot.lane.b32.xlu1 %v706_v20, %s3639_s0  ;;  %v804_v20 = vrot.slane %v3854_v62, 7 }
 0x43a   :  { %730 = vrot.lane.b32.xlu0 %v707_v26, %s3639_s0 }
 0x49e   :  { %v719_v27 = vpop.permute.xlu1 %718 }
 0x49f   :  { %v741_v28 = vadd.f32 %v719_v27, %v3750_v34  ;;  %v807_v27 = vrot.slane %v3851_v60, 7 }
 0x4a0   :  { %v721_v29 = vpop.permute.xlu0 %720 }
 0x4a1   :  { %3327 = vtanh.f32 %v741_v28  ;;  %v742_v32 = vadd.f32 %v721_v29, %v3753_v36  ;;  %v820_v29 = vmul.f32 %v3923_v5, %v804_v20 }
 0x4a2   :  { %v717_v35 = vpop.permute.xlu1 %716 }
 0x4a3   :  { %3329 = vtanh.f32 %v742_v32  ;;  %v740_v30 = vadd.f32 %v717_v35, %v3748_v33  ;;  %v823_v35 = vmul.f32 %v3927_v7, %v807_v27 }
 0x4a4   :  { %v723_v37 = vpop.permute.xlu0 %722 }
 0x4a5   :  { %3331 = vtanh.f32 %v740_v30  ;;  %v743_v38 = vadd.f32 %v723_v37, %v3756_v39  ;;  %v808_v30 = vrot.slane %v3859_v3, 7 }
 0x4a6   :  { %v725_v42 = vpop.permute.xlu1 %724 }
 0x4a7   :  { %3333 = vtanh.f32 %v743_v38  ;;  %v744_v43 = vadd.f32 %v725_v42, %v3759_v41  ;;  %v824_v7 = vmul.f32 %v3931_v9, %v808_v30 }
 0x4a8   :  { %v727_v47 = vpop.permute.xlu0 %726 }
 0x4a9   :  { %3335 = vtanh.f32 %v744_v43  ;;  %v745_v49 = vadd.f32 %v727_v47, %v3764_v46  ;;  %v760_v43 = vsub.f32 1.0, %v3931_v9 }
 0x4aa   :  { %v729_v51 = vpop.permute.xlu1 %728 }
 0x4ab   :  { %v3328_v52 = vpop.eup %3327  ;;  %3337 = vtanh.f32 %v745_v49  ;;  %v746_v40 = vadd.f32 %v729_v51, %v3762_v44 }
 0x4ac   :  { %v731_v53 = vpop.permute.xlu0 %730  ;;  %774 = vrot.lane.b32.xlu1 %v3328_v52, %s3641_s12 }
 0x4ad   :  { %v3330_v54 = vpop.eup %3329  ;;  %3339 = vtanh.f32 %v746_v40  ;;  %v747_v17 = vadd.f32 %v731_v53, %v3768_v50  ;;  %v761_v53 = vsub.f32 1.0, %v3935_v15 }
 0x4ae   :  { %776 = vrot.lane.b32.xlu0 %v3330_v54, %s3641_s12  ;;  %v809_v54 = vrot.slane %v3866_v12, 7 }
 0x4af   :  { %v3332_v56 = vpop.eup %3331  ;;  %3341 = vtanh.f32 %v747_v17 }
 0x4b0   :  { %772 = vrot.lane.b32.xlu1 %v3332_v56, %s3641_s12  ;;  %v810_v56 = vrot.slane %v3874_v8, 7  ;;  %v825_v9 = vmul.f32 %v3935_v15, %v809_v54 }
 0x4b1   :  { %v3334_v57 = vpop.eup %3333 }
 0x4b2   :  { %778 = vrot.lane.b32.xlu0 %v3334_v57, %s3641_s12  ;;  %v826_v10 = vmul.f32 %v3939_v18, %v810_v56 }
 0x4b3   :  { %v3336_v58 = vpop.eup %3335 }
 0x4b4   :  { %780 = vrot.lane.b32.xlu1 %v3336_v58, %s3641_s12 }
 0x4b5   :  { %v3338_v21 = vpop.eup %3337 }
 0x4b6   :  { %782 = vrot.lane.b32.xlu0 %v3338_v21, %s3641_s12 }
 0x4b7   :  { %v3340_v61 = vpop.eup %3339 }
 0x4b8   :  { %784 = vrot.lane.b32.xlu1 %v3340_v61, %s3641_s12  ;;  %v762_v61 = vsub.f32 1.0, %v3939_v18 }
 0x4b9   :  { %v3342_v24 = vpop.eup %3341 }
 0x4ba   :  { %786 = vrot.lane.b32.xlu0 %v3342_v24, %s3641_s12 }
 0x51e   :  { %v775_v6 = vpop.permute.xlu1 %774 }
 0x51f   :  { %v797_v2 = vmul.f32 %v775_v6, %v757_v1 }
 0x520   :  { %v777_v14 = vpop.permute.xlu0 %776 }
 0x521   :  { %v798_v31 = vmul.f32 %v777_v14, %v758_v4  ;;  %v3972_v23 = vadd.f32 %v821_v13, %v797_v2 }
 0x522   :  { %v773_v26 = vpop.permute.xlu1 %772 }
 0x523   :  { %v3975_v28 = vadd.f32 %v822_v16, %v798_v31  ;;  %v796_v32 = vmul.f32 %v773_v26, %v756_v19  ;;  %v878_v47 = vpack.c.bf16 %v3972_v23, %v3972_v23  ;;  %v763_v31 = vsub.f32 1.0, %v3943_v22 }
 0x524   :  { %v779_v63 = vpop.permute.xlu0 %778  ;;  %v811_v19 = vrot.slane %v3882_v48, 7 }
 0x525   :  { %v879_v37 = vpack.c.bf16 %v3975_v28, %v3975_v28  ;;  %v3983_v38 = vadd.f32 %v820_v29, %v796_v32  ;;  %v799_v42 = vmul.f32 %v779_v63, %v759_v59  ;;  %v894_v24 = vunpack.c.l.b16 %v878_v47 }
 0x526   :  { %v781_v5 = vpop.permute.xlu1 %780  ;;  %v827_v32 = vmul.f32 %v3943_v22, %v811_v19 }
 0x527   :  { %v877_v49 = vpack.c.bf16 %v3983_v38, %v3983_v38  ;;  %v3990_v51 = vadd.f32 %v823_v35, %v799_v42  ;;  %v800_v52 = vmul.f32 %v781_v5, %v760_v43  ;;  %v895_v40 = vunpack.c.l.b16 %v879_v37 }
 0x528   :  { %v783_v17 = vpop.permute.xlu0 %782 }
 0x529   :  { %v893_v57 = vunpack.c.l.b16 %v877_v49  ;;  %v880_v58 = vpack.c.bf16 %v3990_v51, %v3990_v51  ;;  %v3998_v21 = vadd.f32 %v824_v7, %v800_v52  ;;  %v801_v1 = vmul.f32 %v783_v17, %v761_v53 }
 0x52a   :  { %v785_v6 = vpop.permute.xlu1 %784  ;;  %v903_v14 = vrot.slane %v895_v40, 7 }
 0x52b   :  { %v901_v2 = vrot.slane %v893_v57, 1  ;;  %v896_v4 = vunpack.c.l.b16 %v880_v58  ;;  %v881_v25 = vpack.c.bf16 %v3998_v21, %v3998_v21  ;;  %v802_v13 = vmul.f32 %v785_v6, %v762_v61  ;;  %v4032_v58 = vld [vmem:[%s5199_s3] sm:$0xff]   ;;  %v4041_v61 = vld [vmem:[%s5199_s3 + $0x8] sm:$0xff]  }
 0x52c   :  { %v4005_v16 = vadd.f32 %v825_v9, %v801_v1  ;;  %v787_v20 = vpop.permute.xlu0 %786 }
 0x52d   :  { %v902_v15 = vsel %vm538_vm2, %v894_v24, %v901_v2  ;;  %v905_v26 = vrot.slane %v896_v4, 6  ;;  %v897_v27 = vunpack.c.l.b16 %v881_v25  ;;  %v4010_v18 = vadd.f32 %v826_v10, %v802_v13 }
 0x52e   :  { %v882_v29 = vpack.c.bf16 %v4005_v16, %v4005_v16  ;;  %v803_v59 = vmul.f32 %v787_v20, %v763_v31  ;;  %v904_v35 = vsel %vm541_vm3, %v903_v14, %v902_v15 }
 0x52f   :  { %v907_v63 = vrot.slane %v897_v27, 5  ;;  %v883_v30 = vpack.c.bf16 %v4010_v18, %v4010_v18  ;;  %v906_v37 = vsel %vm544_vm4, %v905_v26, %v904_v35 }
 0x530   :  { %v898_v42 = vunpack.c.l.b16 %v882_v29  ;;  %v4019_v43 = vadd.f32 %v827_v32, %v803_v59 }
 0x531   :  { %v899_v47 = vunpack.c.l.b16 %v883_v30  ;;  %v908_v5 = vsel %vm547_vm5, %v907_v63, %v906_v37 }
 0x532   :  { %v909_v49 = vrot.slane %v898_v42, 4  ;;  %v884_v7 = vpack.c.bf16 %v4019_v43, %v4019_v43 }
 0x533   :  { %v911_v22 = vrot.slane %v899_v47, 3 }
 0x534   :  { %v900_v52 = vunpack.c.l.b16 %v884_v7  ;;  %v910_v40 = vsel %vm550_vm6, %v909_v49, %v908_v5 }
 0x535   :  { %v912_v53 = vsel %vm553_vm7, %v911_v22, %v910_v40 }
 0x536   :  { %v913_v54 = vrot.slane %v900_v52, 2 }
 0x538   :  { %v914_v17 = vsel %vm556_vm8, %v913_v54, %v912_v53 }
 0x539   :  { %v915_v56 = vpack.c.b16 %v914_v17, %v914_v17 }
 0x53b   :  { %916 = vrot.lane.b32.xlu1 %v915_v56, %s3641_s12 }
 0x5ad   :  { %v917_v57 = vpop.permute.xlu1 %916 }
 0x5ae   :  { %3191 = vmatmul.mubr.msk.bf16.vlgmr.msra.gmra.mrb[8].mxu0 %vm25_vm0, %v917_v57 }
 0x5af   :  { %3203 = vmatpush3.bf16.msra.mxu0 %v4032_v58  ;;  %3206 = vmatprep.mubr.msk.bf16.mxu0 %vm3638_vm1, %v5204_v0 }
 0x5b0   :  { %3204 = vmatprep.subr.bf16.mxu0 %v5204_v0 }
 0x5b3   :  { %3205 = vmatpush3.bf16.msra.mxu0 %v4041_v61 }
 0x5b4   :  { %3218 = vmatprep.subr.bf16.mxu0 %v5204_v0 }
 0x681   :  { %v955_v24 = vpop.f32.mrb[8].mxu0 }
 0x682   :  { %v956_v9 = vadd.f32 %v3734_v11, %v955_v24  ;;  %v3192_v1 = vpop.f32.mrb[9].mxu0 }
 0x683   :  { %v958_v10 = vpop.f32.mrb[10].mxu0 }
 0x684   :  { %1037 = vrot.lane.b32.xlu1 %v956_v9, %s3639_s0  ;;  %v3193_v6 = vpop.f32.mrb[11].mxu0  ;;  %v962_v2 = vrot.slane %v956_v9, 6  ;;  %v963_v4 = vrot.slane %v956_v9, 7  ;;  %v964_v25 = vrot.slane %v956_v9, 1  ;;  %v966_v13 = vrot.slane %v956_v9, 3 }
 0x685   :  { %v965_v14 = vrot.slane %v956_v9, 2  ;;  %v968_v11 = vrot.slane %v956_v9, 5  ;;  %v967_v31 = vrot.slane %v956_v9, 4  ;;  %v979_v19 = vadd.f32 %v956_v9, %v3753_v36 }
 0x686   :  { %1033 = vrot.lane.b32.xlu0 %v962_v2, %s3639_s0  ;;  %v977_v20 = vadd.f32 %v962_v2, %v3748_v33  ;;  %v978_v15 = vadd.f32 %v963_v4, %v3750_v34  ;;  %v980_v29 = vadd.f32 %v964_v25, %v3756_v39  ;;  %v982_v59 = vadd.f32 %v966_v13, %v3764_v46 }
 0x687   :  { %v3077_v26 = vmul.f32 -1.442695, %v979_v19  ;;  %v981_v63 = vadd.f32 %v965_v14, %v3759_v41  ;;  %v984_v37 = vadd.f32 %v968_v11, %v3768_v50  ;;  %v983_v47 = vadd.f32 %v967_v31, %v3762_v44 }
 0x688   :  { %1035 = vrot.lane.b32.xlu1 %v963_v4, %s3639_s0  ;;  %v3075_v27 = vmul.f32 -1.442695, %v977_v20  ;;  %v3076_v32 = vmul.f32 -1.442695, %v978_v15  ;;  %v3078_v35 = vmul.f32 -1.442695, %v980_v29 }
 0x689   :  { %3343 = vpow2.f32 %v3077_v26  ;;  %v3080_v30 = vmul.f32 -1.442695, %v982_v59  ;;  %v3079_v42 = vmul.f32 -1.442695, %v981_v63  ;;  %v3082_v5 = vmul.f32 -1.442695, %v984_v37 }
 0x68a   :  { %1039 = vrot.lane.b32.xlu0 %v964_v25, %s3639_s0  ;;  %3345 = vpow2.f32 %v3075_v27  ;;  %v3081_v7 = vmul.f32 -1.442695, %v983_v47 }
 0x68b   :  { %3347 = vpow2.f32 %v3076_v32 }
 0x68c   :  { %1043 = vrot.lane.b32.xlu1 %v966_v13, %s3639_s0  ;;  %3349 = vpow2.f32 %v3078_v35 }
 0x68d   :  { %3351 = vpow2.f32 %v3080_v30 }
 0x68e   :  { %1041 = vrot.lane.b32.xlu0 %v965_v14, %s3639_s0  ;;  %3353 = vpow2.f32 %v3079_v42 }
 0x68f   :  { %3355 = vpow2.f32 %v3082_v5 }
 0x690   :  { %1047 = vrot.lane.b32.xlu1 %v968_v11, %s3639_s0  ;;  %3357 = vpow2.f32 %v3081_v7 }
 0x692   :  { %1045 = vrot.lane.b32.xlu0 %v967_v31, %s3639_s0 }
 0x693   :  { %v3344_v49 = vpop.eup %3343 }
 0x694   :  { %v3346_v22 = vpop.eup %3345  ;;  %v1011_v52 = vadd.f32 1.0, %v3344_v49 }
 0x695   :  { %v3348_v40 = vpop.eup %3347  ;;  %v1009_v53 = vadd.f32 1.0, %v3346_v22 }
 0x696   :  { %v3350_v54 = vpop.eup %3349  ;;  %v1010_v17 = vadd.f32 1.0, %v3348_v40  ;;  %3359 = vrcp.f32 %v1011_v52 }
 0x697   :  { %v3352_v56 = vpop.eup %3351  ;;  %3361 = vrcp.f32 %v1009_v53  ;;  %v1012_v57 = vadd.f32 1.0, %v3350_v54 }
 0x698   :  { %v3354_v24 = vpop.eup %3353  ;;  %3363 = vrcp.f32 %v1010_v17  ;;  %v1014_v9 = vadd.f32 1.0, %v3352_v56 }
 0x699   :  { %v3356_v1 = vpop.eup %3355  ;;  %3365 = vrcp.f32 %v1012_v57  ;;  %v1013_v10 = vadd.f32 1.0, %v3354_v24 }
 0x69a   :  { %v3358_v6 = vpop.eup %3357  ;;  %3367 = vrcp.f32 %v1014_v9  ;;  %v1016_v2 = vadd.f32 1.0, %v3356_v1 }
 0x69b   :  { %3369 = vrcp.f32 %v1013_v10  ;;  %v1015_v25 = vadd.f32 1.0, %v3358_v6 }
 0x69c   :  { %3371 = vrcp.f32 %v1016_v2 }
 0x69d   :  { %3373 = vrcp.f32 %v1015_v25 }
 0x6a0   :  { %v4062_v4 = vpop.eup %3359 }
 0x6a1   :  { %v4065_v11 = vpop.eup %3361 }
 0x6a2   :  { %v4069_v20 = vpop.eup %3363 }
 0x6a3   :  { %v4073_v27 = vpop.eup %3365 }
 0x6a4   :  { %v4077_v59 = vpop.eup %3367 }
 0x6a5   :  { %v4081_v30 = vpop.eup %3369 }
 0x6a6   :  { %v4085_v47 = vpop.eup %3371 }
 0x6a7   :  { %v4089_v7 = vpop.eup %3373 }
 0x6f6   :  { %v1038_v13 = vpop.permute.xlu1 %1037 }
 0x6f7   :  { %v1059_v14 = vmul.f32 %v4062_v4, %v1038_v13 }
 0x6f8   :  { %v1034_v31 = vpop.permute.xlu0 %1033 }
 0x6f9   :  { %v1057_v19 = vmul.f32 %v4065_v11, %v1034_v31  ;;  %1077 = vrot.lane.b32.xlu1 %v1059_v14, %s3639_s0 }
 0x6fa   :  { %v1036_v15 = vpop.permute.xlu1 %1035 }
 0x6fb   :  { %v1058_v26 = vmul.f32 %v4069_v20, %v1036_v15  ;;  %1073 = vrot.lane.b32.xlu0 %v1057_v19, %s3639_s0 }
 0x6fc   :  { %v1040_v29 = vpop.permute.xlu0 %1039 }
 0x6fd   :  { %v1060_v32 = vmul.f32 %v4073_v27, %v1040_v29  ;;  %1075 = vrot.lane.b32.xlu1 %v1058_v26, %s3639_s0 }
 0x6fe   :  { %v1044_v35 = vpop.permute.xlu1 %1043 }
 0x6ff   :  { %v1062_v63 = vmul.f32 %v4077_v59, %v1044_v35  ;;  %1079 = vrot.lane.b32.xlu0 %v1060_v32, %s3639_s0 }
 0x700   :  { %v1042_v37 = vpop.permute.xlu0 %1041 }
 0x701   :  { %v1061_v42 = vmul.f32 %v4081_v30, %v1042_v37  ;;  %1083 = vrot.lane.b32.xlu1 %v1062_v63, %s3639_s0 }
 0x702   :  { %v1048_v5 = vpop.permute.xlu1 %1047 }
 0x703   :  { %v1064_v49 = vmul.f32 %v4085_v47, %v1048_v5  ;;  %1081 = vrot.lane.b32.xlu0 %v1061_v42, %s3639_s0  ;;  %v1113_v5 = vsub.f32 1.0, %v4065_v11 }
 0x704   :  { %v1046_v22 = vpop.permute.xlu0 %1045 }
 0x705   :  { %v1063_v52 = vmul.f32 %v4089_v7, %v1046_v22  ;;  %1087 = vrot.lane.b32.xlu1 %v1064_v49, %s3639_s0  ;;  %v1161_v49 = vrot.slane %v3983_v38, 7  ;;  %v1115_v22 = vsub.f32 1.0, %v4062_v4 }
 0x707   :  { %1085 = vrot.lane.b32.xlu0 %v1063_v52, %s3639_s0 }
 0x76b   :  { %v1078_v40 = vpop.permute.xlu1 %1077 }
 0x76c   :  { %v1099_v53 = vadd.f32 %v1078_v40, %v3753_v36  ;;  %v1177_v40 = vmul.f32 %v4065_v11, %v1161_v49  ;;  %v1168_v49 = vrot.slane %v4019_v43, 7 }
 0x76d   :  { %v1074_v54 = vpop.permute.xlu0 %1073 }
 0x76e   :  { %3375 = vtanh.f32 %v1099_v53  ;;  %v1097_v17 = vadd.f32 %v1074_v54, %v3748_v33  ;;  %v1114_v54 = vsub.f32 1.0, %v4069_v20 }
 0x76f   :  { %v1076_v56 = vpop.permute.xlu1 %1075 }
 0x770   :  { %3377 = vtanh.f32 %v1097_v17  ;;  %v1098_v57 = vadd.f32 %v1076_v56, %v3750_v34  ;;  %v1162_v17 = vrot.slane %v3972_v23, 7  ;;  %v1163_v56 = vrot.slane %v3975_v28, 7 }
 0x771   :  { %v1080_v24 = vpop.permute.xlu0 %1079 }
 0x772   :  { %3379 = vtanh.f32 %v1098_v57  ;;  %v1100_v9 = vadd.f32 %v1080_v24, %v3756_v39  ;;  %v1179_v11 = vmul.f32 %v4062_v4, %v1163_v56  ;;  %v1184_v56 = vmul.f32 %v4085_v47, %v1168_v49 }
 0x773   :  { %v1084_v1 = vpop.permute.xlu1 %1083 }
 0x774   :  { %3381 = vtanh.f32 %v1100_v9  ;;  %v1102_v10 = vadd.f32 %v1084_v1, %v3764_v46  ;;  %v1164_v9 = vrot.slane %v3990_v51, 7 }
 0x775   :  { %v1082_v6 = vpop.permute.xlu0 %1081 }
 0x776   :  { %3383 = vtanh.f32 %v1102_v10  ;;  %v1101_v2 = vadd.f32 %v1082_v6, %v3759_v41  ;;  %v1178_v10 = vmul.f32 %v4069_v20, %v1162_v17 }
 0x777   :  { %v1088_v25 = vpop.permute.xlu1 %1087 }
 0x778   :  { %v3376_v13 = vpop.eup %3375  ;;  %3385 = vtanh.f32 %v1101_v2  ;;  %v1104_v14 = vadd.f32 %v1088_v25, %v3768_v50  ;;  %v1116_v2 = vsub.f32 1.0, %v4073_v27  ;;  %v1180_v25 = vmul.f32 %v4073_v27, %v1164_v9 }
 0x779   :  { %1133 = vrot.lane.b32.xlu1 %v3376_v13, %s3641_s12  ;;  %v1086_v31 = vpop.permute.xlu0 %1085 }
 0x77a   :  { %v3378_v19 = vpop.eup %3377  ;;  %3387 = vtanh.f32 %v1104_v14  ;;  %v1103_v15 = vadd.f32 %v1086_v31, %v3762_v44  ;;  %v1166_v14 = vrot.slane %v4005_v16, 7 }
 0x77b   :  { %1129 = vrot.lane.b32.xlu0 %v3378_v19, %s3641_s12 }
 0x77c   :  { %v3380_v26 = vpop.eup %3379  ;;  %3389 = vtanh.f32 %v1103_v15  ;;  %v1182_v20 = vmul.f32 %v4077_v59, %v1166_v14 }
 0x77d   :  { %1131 = vrot.lane.b32.xlu1 %v3380_v26, %s3641_s12  ;;  %v1118_v26 = vsub.f32 1.0, %v4077_v59 }
 0x77e   :  { %v3382_v29 = vpop.eup %3381 }
 0x77f   :  { %1135 = vrot.lane.b32.xlu0 %v3382_v29, %s3641_s12 }
 0x780   :  { %v3384_v32 = vpop.eup %3383 }
 0x781   :  { %1139 = vrot.lane.b32.xlu1 %v3384_v32, %s3641_s12 }
 0x782   :  { %v3386_v35 = vpop.eup %3385 }
 0x783   :  { %1137 = vrot.lane.b32.xlu0 %v3386_v35, %s3641_s12 }
 0x784   :  { %v3388_v63 = vpop.eup %3387 }
 0x785   :  { %1143 = vrot.lane.b32.xlu1 %v3388_v63, %s3641_s12 }
 0x786   :  { %v3390_v37 = vpop.eup %3389 }
 0x787   :  { %1141 = vrot.lane.b32.xlu0 %v3390_v37, %s3641_s12  ;;  %v1117_v37 = vsub.f32 1.0, %v4081_v30 }
 0x7eb   :  { %v1134_v42 = vpop.permute.xlu1 %1133 }
 0x7ec   :  { %v1155_v57 = vmul.f32 %v1134_v42, %v1115_v22  ;;  %v1165_v42 = vrot.slane %v3998_v21, 7 }
 0x7ed   :  { %v1130_v52 = vpop.permute.xlu0 %1129 }
 0x7ee   :  { %v1153_v53 = vmul.f32 %v1130_v52, %v1113_v5  ;;  %v4130_v29 = vadd.f32 %v1179_v11, %v1155_v57  ;;  %v1119_v11 = vsub.f32 1.0, %v4089_v7 }
 0x7ef   :  { %v1132_v24 = vpop.permute.xlu1 %1131 }
 0x7f0   :  { %v4118_v1 = vadd.f32 %v1177_v40, %v1153_v53  ;;  %v1154_v6 = vmul.f32 %v1132_v24, %v1114_v54  ;;  %v1120_v40 = vsub.f32 1.0, %v4085_v47  ;;  %v1236_v53 = vpack.c.bf16 %v4130_v29, %v4130_v29 }
 0x7f1   :  { %v1136_v13 = vpop.permute.xlu0 %1135  ;;  %v1181_v54 = vmul.f32 %v4081_v30, %v1165_v42 }
 0x7f2   :  { %v1234_v31 = vpack.c.bf16 %v4118_v1, %v4118_v1  ;;  %v4127_v19 = vadd.f32 %v1178_v10, %v1154_v6  ;;  %v1156_v15 = vmul.f32 %v1136_v13, %v1116_v2  ;;  %v1252_v47 = vunpack.c.l.b16 %v1236_v53 }
 0x7f3   :  { %v1140_v32 = vpop.permute.xlu1 %1139 }
 0x7f4   :  { %v1250_v35 = vunpack.c.l.b16 %v1234_v31  ;;  %v1235_v4 = vpack.c.bf16 %v4127_v19, %v4127_v19  ;;  %v4135_v27 = vadd.f32 %v1180_v25, %v1156_v15  ;;  %v1158_v63 = vmul.f32 %v1140_v32, %v1118_v26 }
 0x7f5   :  { %v1138_v5 = vpop.permute.xlu0 %1137  ;;  %v1167_v25 = vrot.slane %v4010_v18, 7 }
 0x7f6   :  { %v1251_v22 = vunpack.c.l.b16 %v1235_v4  ;;  %v1237_v52 = vpack.c.bf16 %v4135_v27, %v4135_v27  ;;  %v4142_v59 = vadd.f32 %v1182_v20, %v1158_v63  ;;  %v1157_v17 = vmul.f32 %v1138_v5, %v1117_v37 }
 0x7f7   :  { %v1144_v57 = vpop.permute.xlu1 %1143  ;;  %v1258_v24 = vrot.slane %v1250_v35, 2  ;;  %v1183_v26 = vmul.f32 %v4089_v7, %v1167_v25 }
 0x7f8   :  { %v1259_v9 = vrot.slane %v1251_v22, 1  ;;  %v1253_v10 = vunpack.c.l.b16 %v1237_v52  ;;  %v1160_v6 = vmul.f32 %v1144_v57, %v1120_v40  ;;  %v4149_v2 = vadd.f32 %v1181_v54, %v1157_v17 }
 0x7f9   :  { %v1142_v13 = vpop.permute.xlu0 %1141  ;;  %v1239_v30 = vpack.c.bf16 %v4142_v59, %v4142_v59 }
 0x7fa   :  { %5235 = vst [vmem:[#allocation3_spill] sm:$0xff] %v4149_v2  ;;  %v1260_v14 = vsel %vm538_vm2, %v1259_v9, %v1258_v24  ;;  %v4156_v31 = vadd.f32 %v1184_v56, %v1160_v6  ;;  %v1238_v15 = vpack.c.bf16 %v4149_v2, %v4149_v2  ;;  %v1159_v20 = vmul.f32 %v1142_v13, %v1119_v11  ;;  %v4184_v11 = vld [vmem:[%s5201_s4] ss:$0 sm:$0xff] }
 0x7fb   :  { %v1262_v32 = vrot.slane %v1253_v10, 7  ;;  %v1261_v37 = vsel %vm541_vm3, %v1252_v47, %v1260_v14  ;;  %v1255_v42 = vunpack.c.l.b16 %v1239_v30 }
 0x7fc   :  { %v1241_v35 = vpack.c.bf16 %v4156_v31, %v4156_v31  ;;  %v1254_v4 = vunpack.c.l.b16 %v1238_v15  ;;  %v4163_v63 = vadd.f32 %v1183_v26, %v1159_v20 }
 0x7fd   :  { %v1263_v52 = vsel %vm544_vm4, %v1262_v32, %v1261_v37  ;;  %v1266_v53 = vrot.slane %v1255_v42, 5 }
 0x7fe   :  { %5236 = vst [vmem:[#allocation4_spill] sm:$0xff] %v4163_v63  ;;  %v1264_v5 = vrot.slane %v1254_v4, 6  ;;  %v1240_v49 = vpack.c.bf16 %v4163_v63, %v4163_v63  ;;  %v1257_v22 = vunpack.c.l.b16 %v1241_v35 }
 0x800   :  { %v1256_v40 = vunpack.c.l.b16 %v1240_v49  ;;  %v1265_v7 = vsel %vm547_vm5, %v1264_v5, %v1263_v52  ;;  %v1270_v56 = vrot.slane %v1257_v22, 3 }
 0x801   :  { %v1267_v17 = vsel %vm550_vm6, %v1266_v53, %v1265_v7 }
 0x802   :  { %v1268_v54 = vrot.slane %v1256_v40, 4 }
 0x804   :  { %v1269_v57 = vsel %vm553_vm7, %v1268_v54, %v1267_v17 }
 0x805   :  { %v1271_v24 = vsel %vm556_vm8, %v1270_v56, %v1269_v57 }
 0x806   :  { %v1272_v9 = vpack.c.b16 %v1271_v24, %v1271_v24 }
 0x808   :  { %1273 = vrot.lane.b32.xlu0 %v1272_v9, %s3641_s12 }
 0x87a   :  { %v1274_v10 = vpop.permute.xlu0 %1273 }
 0x87b   :  { %3199 = vmatmul.mubr.msk.bf16.vlgmr.msra.gmra.mrb[8].mxu1 %vm25_vm0, %v1274_v10 }
 0x87c   :  { %3211 = vmatpush3.bf16.msra.mxu1 %v4032_v58  ;;  %3214 = vmatprep.mubr.msk.bf16.mxu1 %vm3638_vm1, %v5204_v0 }
 0x87d   :  { %3212 = vmatprep.subr.bf16.mxu1 %v5204_v0 }
 0x880   :  { %3213 = vmatpush3.bf16.msra.mxu1 %v4041_v61 }
 0x881   :  { %3226 = vmatprep.subr.bf16.mxu1 %v5204_v0 }
 0x94e   :  { %v1312_v6 = vpop.f32.mrb[8].mxu1 }
 0x94f   :  { %v1313_v25 = vadd.f32 %v4184_v11, %v1312_v6  ;;  %v3200_v13 = vpop.f32.mrb[9].mxu1 }
 0x950   :  { %v1315_v14 = vpop.f32.mrb[10].mxu1 }
 0x951   :  { %1396 = vrot.lane.b32.xlu1 %v1313_v25, %s3639_s0  ;;  %v3201_v30 = vpop.f32.mrb[11].mxu1  ;;  %v1320_v47 = vrot.slane %v1313_v25, 6  ;;  %v1319_v15 = vrot.slane %v1313_v25, 5  ;;  %v1322_v26 = vrot.slane %v1313_v25, 1  ;;  %v1321_v20 = vrot.slane %v1313_v25, 7 }
 0x952   :  { %v1323_v32 = vrot.slane %v1313_v25, 2  ;;  %v1324_v35 = vrot.slane %v1313_v25, 3  ;;  %v1325_v4 = vrot.slane %v1313_v25, 4  ;;  %v1337_v37 = vadd.f32 %v1313_v25, %v3756_v39 }
 0x953   :  { %1392 = vrot.lane.b32.xlu0 %v1320_v47, %s3639_s0  ;;  %v1335_v42 = vadd.f32 %v1320_v47, %v3750_v34  ;;  %v1334_v5 = vadd.f32 %v1319_v15, %v3748_v33  ;;  %v1338_v52 = vadd.f32 %v1322_v26, %v3759_v41  ;;  %v1336_v7 = vadd.f32 %v1321_v20, %v3753_v36 }
 0x954   :  { %v3087_v49 = vmul.f32 -1.442695, %v1337_v37  ;;  %v1339_v54 = vadd.f32 %v1323_v32, %v3764_v46  ;;  %v1340_v56 = vadd.f32 %v1324_v35, %v3762_v44  ;;  %v1341_v24 = vadd.f32 %v1325_v4, %v3768_v50 }
 0x955   :  { %1390 = vrot.lane.b32.xlu1 %v1319_v15, %s3639_s0  ;;  %v3085_v22 = vmul.f32 -1.442695, %v1335_v42  ;;  %v3084_v40 = vmul.f32 -1.442695, %v1334_v5  ;;  %v3088_v53 = vmul.f32 -1.442695, %v1338_v52 }
 0x956   :  { %3391 = vpow2.f32 %v3087_v49  ;;  %v3086_v17 = vmul.f32 -1.442695, %v1336_v7  ;;  %v3089_v57 = vmul.f32 -1.442695, %v1339_v54  ;;  %v3090_v9 = vmul.f32 -1.442695, %v1340_v56 }
 0x957   :  { %1398 = vrot.lane.b32.xlu0 %v1322_v26, %s3639_s0  ;;  %3393 = vpow2.f32 %v3085_v22  ;;  %v3091_v6 = vmul.f32 -1.442695, %v1341_v24 }
 0x958   :  { %3395 = vpow2.f32 %v3084_v40 }
 0x959   :  { %1394 = vrot.lane.b32.xlu1 %v1321_v20, %s3639_s0  ;;  %3397 = vpow2.f32 %v3088_v53 }
 0x95a   :  { %3399 = vpow2.f32 %v3086_v17 }
 0x95b   :  { %1400 = vrot.lane.b32.xlu0 %v1323_v32, %s3639_s0  ;;  %3401 = vpow2.f32 %v3089_v57 }
 0x95c   :  { %3403 = vpow2.f32 %v3090_v9 }
 0x95d   :  { %1402 = vrot.lane.b32.xlu1 %v1324_v35, %s3639_s0  ;;  %3405 = vpow2.f32 %v3091_v6 }
 0x95f   :  { %1404 = vrot.lane.b32.xlu0 %v1325_v4, %s3639_s0 }
 0x960   :  { %v3392_v10 = vpop.eup %3391 }
 0x961   :  { %v3394_v25 = vpop.eup %3393  ;;  %v1369_v13 = vadd.f32 1.0, %v3392_v10 }
 0x962   :  { %v3396_v14 = vpop.eup %3395  ;;  %v1367_v30 = vadd.f32 1.0, %v3394_v25 }
 0x963   :  { %v3398_v47 = vpop.eup %3397  ;;  %v1366_v15 = vadd.f32 1.0, %v3396_v14  ;;  %3407 = vrcp.f32 %v1369_v13 }
 0x964   :  { %v3400_v26 = vpop.eup %3399  ;;  %3409 = vrcp.f32 %v1367_v30  ;;  %v1370_v20 = vadd.f32 1.0, %v3398_v47 }
 0x965   :  { %v3402_v32 = vpop.eup %3401  ;;  %3411 = vrcp.f32 %v1366_v15  ;;  %v1368_v35 = vadd.f32 1.0, %v3400_v26 }
 0x966   :  { %v3404_v4 = vpop.eup %3403  ;;  %3413 = vrcp.f32 %v1370_v20  ;;  %v1371_v37 = vadd.f32 1.0, %v3402_v32 }
 0x967   :  { %v3406_v42 = vpop.eup %3405  ;;  %3415 = vrcp.f32 %v1368_v35  ;;  %v1372_v5 = vadd.f32 1.0, %v3404_v4 }
 0x968   :  { %3417 = vrcp.f32 %v1371_v37  ;;  %v1373_v22 = vadd.f32 1.0, %v3406_v42 }
 0x969   :  { %3419 = vrcp.f32 %v1372_v5 }
 0x96a   :  { %3421 = vrcp.f32 %v1373_v22 }
 0x96d   :  { %v4203_v49 = vpop.eup %3407 }
 0x96e   :  { %v4206_v7 = vpop.eup %3409 }
 0x96f   :  { %v4210_v17 = vpop.eup %3411 }
 0x970   :  { %v4214_v24 = vpop.eup %3413 }
 0x971   :  { %v4218_v6 = vpop.eup %3415 }
 0x972   :  { %v4222_v14 = vpop.eup %3417 }
 0x973   :  { %v4226_v15 = vpop.eup %3419 }
 0x974   :  { %v4230_v32 = vpop.eup %3421 }
 0x9c3   :  { %v1397_v52 = vpop.permute.xlu1 %1396 }
 0x9c4   :  { %v1417_v40 = vmul.f32 %v4203_v49, %v1397_v52 }
 0x9c5   :  { %v1393_v53 = vpop.permute.xlu0 %1392 }
 0x9c6   :  { %v1415_v54 = vmul.f32 %v4206_v7, %v1393_v53  ;;  %1436 = vrot.lane.b32.xlu1 %v1417_v40, %s3639_s0 }
 0x9c7   :  { %v1391_v56 = vpop.permute.xlu1 %1390 }
 0x9c8   :  { %v1414_v57 = vmul.f32 %v4210_v17, %v1391_v56  ;;  %1432 = vrot.lane.b32.xlu0 %v1415_v54, %s3639_s0 }
 0x9c9   :  { %v1399_v9 = vpop.permute.xlu0 %1398 }
 0x9ca   :  { %v1418_v10 = vmul.f32 %v4214_v24, %v1399_v9  ;;  %1430 = vrot.lane.b32.xlu1 %v1414_v57, %s3639_s0 }
 0x9cb   :  { %v1395_v25 = vpop.permute.xlu1 %1394 }
 0x9cc   :  { %v1416_v13 = vmul.f32 %v4218_v6, %v1395_v25  ;;  %1438 = vrot.lane.b32.xlu0 %v1418_v10, %s3639_s0 }
 0x9cd   :  { %v1401_v30 = vpop.permute.xlu0 %1400 }
 0x9ce   :  { %v1419_v47 = vmul.f32 %v4222_v14, %v1401_v30  ;;  %1434 = vrot.lane.b32.xlu1 %v1416_v13, %s3639_s0 }
 0x9cf   :  { %v1403_v26 = vpop.permute.xlu1 %1402 }
 0x9d0   :  { %v1420_v20 = vmul.f32 %v4226_v15, %v1403_v26  ;;  %1440 = vrot.lane.b32.xlu0 %v1419_v47, %s3639_s0 }
 0x9d1   :  { %v1405_v35 = vpop.permute.xlu0 %1404 }
 0x9d2   :  { %v1421_v4 = vmul.f32 %v4230_v32, %v1405_v35  ;;  %1442 = vrot.lane.b32.xlu1 %v1420_v20, %s3639_s0 }
 0x9d4   :  { %1444 = vrot.lane.b32.xlu0 %v1421_v4, %s3639_s0 }
 0xa38   :  { %v1437_v37 = vpop.permute.xlu1 %1436 }
 0xa39   :  { %v1457_v42 = vadd.f32 %v1437_v37, %v3756_v39 }
 0xa3a   :  { %v1433_v5 = vpop.permute.xlu0 %1432 }
 0xa3b   :  { %3423 = vtanh.f32 %v1457_v42  ;;  %v1455_v22 = vadd.f32 %v1433_v5, %v3750_v34 }
 0xa3c   :  { %v1431_v52 = vpop.permute.xlu1 %1430 }
 0xa3d   :  { %3425 = vtanh.f32 %v1455_v22  ;;  %v1454_v40 = vadd.f32 %v1431_v52, %v3748_v33 }
 0xa3e   :  { %v1439_v53 = vpop.permute.xlu0 %1438 }
 0xa3f   :  { %3427 = vtanh.f32 %v1454_v40  ;;  %v1458_v54 = vadd.f32 %v1439_v53, %v3759_v41  ;;  %v1471_v40 = vsub.f32 1.0, %v4206_v7  ;;  %v1519_v53 = vrot.slane %v4127_v19, 7 }
 0xa40   :  { %v1435_v56 = vpop.permute.xlu1 %1434 }
 0xa41   :  { %3429 = vtanh.f32 %v1458_v54  ;;  %v1456_v57 = vadd.f32 %v1435_v56, %v3753_v36  ;;  %v1535_v56 = vmul.f32 %v4206_v7, %v1519_v53  ;;  %v1472_v53 = vsub.f32 1.0, %v4218_v6 }
 0xa42   :  { %v1441_v9 = vpop.permute.xlu0 %1440 }
 0xa43   :  { %3431 = vtanh.f32 %v1456_v57  ;;  %v1459_v10 = vadd.f32 %v1441_v9, %v3764_v46  ;;  %v1470_v9 = vsub.f32 1.0, %v4210_v17 }
 0xa44   :  { %v1443_v25 = vpop.permute.xlu1 %1442 }
 0xa45   :  { %v3424_v13 = vpop.eup %3423  ;;  %3433 = vtanh.f32 %v1459_v10  ;;  %v1460_v30 = vadd.f32 %v1443_v25, %v3762_v44  ;;  %v1518_v10 = vrot.slane %v4118_v1, 7  ;;  %v1473_v25 = vsub.f32 1.0, %v4203_v49 }
 0xa46   :  { %v1445_v47 = vpop.permute.xlu0 %1444  ;;  %1492 = vrot.lane.b32.xlu1 %v3424_v13, %s3641_s12 }
 0xa47   :  { %v3426_v26 = vpop.eup %3425  ;;  %3435 = vtanh.f32 %v1460_v30  ;;  %v1461_v20 = vadd.f32 %v1445_v47, %v3768_v50  ;;  %v1522_v30 = vrot.slane %v4149_v2, 7 }
 0xa48   :  { %1488 = vrot.lane.b32.xlu0 %v3426_v26, %s3641_s12  ;;  %v1534_v26 = vmul.f32 %v4210_v17, %v1518_v10 }
 0xa49   :  { %v3428_v35 = vpop.eup %3427  ;;  %3437 = vtanh.f32 %v1461_v20 }
 0xa4a   :  { %1486 = vrot.lane.b32.xlu1 %v3428_v35, %s3641_s12  ;;  %v1474_v35 = vsub.f32 1.0, %v4214_v24 }
 0xa4b   :  { %v3430_v4 = vpop.eup %3429 }
 0xa4c   :  { %1494 = vrot.lane.b32.xlu0 %v3430_v4, %s3641_s12  ;;  %v1521_v4 = vrot.slane %v4135_v27, 7 }
 0xa4d   :  { %v3432_v37 = vpop.eup %3431 }
 0xa4e   :  { %1490 = vrot.lane.b32.xlu1 %v3432_v37, %s3641_s12 }
 0xa4f   :  { %v3434_v42 = vpop.eup %3433 }
 0xa50   :  { %1496 = vrot.lane.b32.xlu0 %v3434_v42, %s3641_s12  ;;  %v1520_v42 = vrot.slane %v4130_v29, 7 }
 0xa51   :  { %v3436_v5 = vpop.eup %3435 }
 0xa52   :  { %1498 = vrot.lane.b32.xlu1 %v3436_v5, %s3641_s12 }
 0xa53   :  { %v3438_v22 = vpop.eup %3437 }
 0xa54   :  { %1500 = vrot.lane.b32.xlu0 %v3438_v22, %s3641_s12  ;;  %v1538_v22 = vmul.f32 %v4214_v24, %v1522_v30  ;;  %v1475_v24 = vsub.f32 1.0, %v4222_v14 }
 0xab8   :  { %v1493_v52 = vpop.permute.xlu1 %1492 }
 0xab9   :  { %v1513_v7 = vmul.f32 %v1493_v52, %v1473_v25 }
 0xaba   :  { %v1489_v54 = vpop.permute.xlu0 %1488 }
 0xabb   :  { %v1511_v57 = vmul.f32 %v1489_v54, %v1471_v40  ;;  %v1537_v54 = vmul.f32 %v4203_v49, %v1521_v4  ;;  %v1524_v49 = vrot.slane %v4163_v63, 7  ;;  %v1476_v4 = vsub.f32 1.0, %v4226_v15 }
 0xabc   :  { %v1487_v13 = vpop.permute.xlu1 %1486 }
 0xabd   :  { %v4258_v47 = vadd.f32 %v1535_v56, %v1511_v57  ;;  %v1510_v20 = vmul.f32 %v1487_v13, %v1470_v9  ;;  %v1536_v9 = vmul.f32 %v4218_v6, %v1520_v42  ;;  %v4276_v25 = vadd.f32 %v1537_v54, %v1513_v7 }
 0xabe   :  { %v1495_v37 = vpop.permute.xlu0 %1494  ;;  %v1523_v13 = vrot.slane %v4142_v59, 7  ;;  %v1525_v54 = vrot.slane %v4156_v31, 7 }
 0xabf   :  { %v4264_v5 = vadd.f32 %v1534_v26, %v1510_v20  ;;  %v1514_v40 = vmul.f32 %v1495_v37, %v1474_v35  ;;  %v1592_v17 = vpack.c.bf16 %v4258_v47, %v4258_v47  ;;  %5239 = vst [vmem:[#allocation7_spill] sm:$0xff] %v4276_v25 }
 0xac0   :  { %v1491_v56 = vpop.permute.xlu1 %1490  ;;  %v1539_v6 = vmul.f32 %v4222_v14, %v1523_v13 }
 0xac1   :  { %5237 = vst [vmem:[#allocation5_spill] sm:$0xff] %v4264_v5  ;;  %v1591_v57 = vpack.c.bf16 %v4264_v5, %v4264_v5  ;;  %v4273_v52 = vadd.f32 %v1538_v22, %v1514_v40  ;;  %v1512_v10 = vmul.f32 %v1491_v56, %v1472_v53  ;;  %v1608_v37 = vunpack.c.l.b16 %v1592_v17 }
 0xac2   :  { %v1497_v30 = vpop.permute.xlu0 %1496  ;;  %v1540_v40 = vmul.f32 %v4226_v15, %v1524_v49  ;;  %v1594_v56 = vpack.c.bf16 %v4276_v25, %v4276_v25  ;;  %v1477_v17 = vsub.f32 1.0, %v4230_v32  ;;  %v1541_v49 = vmul.f32 %v4230_v32, %v1525_v54 }
 0xac3   :  { %5238 = vst [vmem:[#allocation6_spill] sm:$0xff] %v4273_v52  ;;  %v1607_v26 = vunpack.c.l.b16 %v1591_v57  ;;  %v1595_v20 = vpack.c.bf16 %v4273_v52, %v4273_v52  ;;  %v4283_v35 = vadd.f32 %v1536_v9, %v1512_v10  ;;  %v1515_v7 = vmul.f32 %v1497_v30, %v1475_v24 }
 0xac4   :  { %v1499_v42 = vpop.permute.xlu1 %1498  ;;  %v1616_v30 = vrot.slane %v1608_v37, 2 }
 0xac5   :  { %5240 = vst [vmem:[#allocation8_spill] sm:$0xff] %v4283_v35  ;;  %v1593_v22 = vpack.c.bf16 %v4283_v35, %v4283_v35  ;;  %v1516_v53 = vmul.f32 %v1499_v42, %v1476_v4  ;;  %v1615_v57 = vrot.slane %v1607_v26, 3  ;;  %v4293_v9 = vadd.f32 %v1539_v6, %v1515_v7 }
 0xac6   :  { %v1501_v10 = vpop.permute.xlu0 %1500  ;;  %v1611_v14 = vunpack.c.l.b16 %v1595_v20  ;;  %v1610_v6 = vunpack.c.l.b16 %v1594_v56 }
 0xac7   :  { %v1609_v24 = vunpack.c.l.b16 %v1593_v22  ;;  %v4296_v13 = vadd.f32 %v1540_v40, %v1516_v53  ;;  %v1596_v15 = vpack.c.bf16 %v4293_v9, %v4293_v9  ;;  %v1517_v4 = vmul.f32 %v1501_v10, %v1477_v17 }
 0xac8   :  { %v1617_v7 = vsel %vm538_vm2, %v1616_v30, %v1615_v57  ;;  %v1621_v20 = vrot.slane %v1611_v14, 7 }
 0xac9   :  { %5241 = vst [vmem:[#allocation9_spill] sm:$0xff] %v4296_v13  ;;  %v1618_v42 = vrot.slane %v1609_v24, 1  ;;  %v1597_v26 = vpack.c.bf16 %v4296_v13, %v4296_v13  ;;  %v1612_v0 = vunpack.c.l.b16 %v1596_v15  ;;  %v4304_v63 = vadd.f32 %v1541_v49, %v1517_v4 }
 0xacb   :  { %5242 = vst [vmem:[#allocation10_spill] sm:$0xff] %v4304_v63  ;;  %v1619_v22 = vsel %vm541_vm3, %v1618_v42, %v1617_v7  ;;  %v1613_v37 = vunpack.c.l.b16 %v1597_v26  ;;  %v1623_v53 = vrot.slane %v1612_v0, 6  ;;  %v1598_v32 = vpack.c.bf16 %v4304_v63, %v4304_v63 }
 0xacc   :  { %v1620_v40 = vsel %vm544_vm4, %v1610_v6, %v1619_v22  ;;  %v5243_v0 = vmov 0.0  }
 0xacd   :  { %v1625_v54 = vrot.slane %v1613_v37, 5  ;;  %v1622_v17 = vsel %vm547_vm5, %v1621_v20, %v1620_v40  ;;  %v1614_v10 = vunpack.c.l.b16 %v1598_v32 }
 0xace   :  { %v1624_v56 = vsel %vm550_vm6, %v1623_v53, %v1622_v17 }
 0xacf   :  { %v1626_v57 = vsel %vm553_vm7, %v1625_v54, %v1624_v56  ;;  %v1627_v24 = vrot.slane %v1614_v10, 4 }
 0xad1   :  { %v1628_v14 = vsel %vm556_vm8, %v1627_v24, %v1626_v57 }
 0xad2   :  { %v1629_v30 = vpack.c.b16 %v1628_v14, %v1628_v14 }
 0xad4   :  { %1630 = vrot.lane.b32.xlu1 %v1629_v30, %s3641_s12 }
 0xb46   :  { %v1631_v15 = vpop.permute.xlu1 %1630 }
 0xb47   :  { %3207 = vmatmul.mubr.msk.bf16.vlgmr.msra.gmra.mrb[12].mxu0 %vm25_vm0, %v1631_v15 }
 0xb48   :  { %3219 = vmatpush3.bf16.msra.mxu0 %v4032_v58  ;;  %3222 = vmatprep.mubr.msk.bf16.mxu0 %vm3638_vm1, %v5243_v0 }
 0xb49   :  { %3220 = vmatprep.subr.bf16.mxu0 %v5243_v0 }
 0xb4c   :  { %3221 = vmatpush3.bf16.msra.mxu0 %v4041_v61 }
 0xc1a   :  { %v1669_v49 = vpop.f32.mrb[12].mxu0 }
 0xc1b   :  { %v1670_v4 = vadd.f32 %v4184_v11, %v1669_v49  ;;  %v3208_v42 = vpop.f32.mrb[13].mxu0 }
 0xc1c   :  { %v1672_v26 = vpop.f32.mrb[14].mxu0 }
 0xc1d   :  { %1755 = vrot.lane.b32.xlu1 %v1670_v4, %s3639_s0  ;;  %v3209_v6 = vpop.f32.mrb[15].mxu0  ;;  %v1676_v7 = vrot.slane %v1670_v4, 4  ;;  %v1677_v20 = vrot.slane %v1670_v4, 5  ;;  %v1678_v58 = vrot.slane %v1670_v4, 6  ;;  %v1679_v22 = vrot.slane %v1670_v4, 7 }
 0xc1e   :  { %v1680_v61 = vrot.slane %v1670_v4, 1  ;;  %v1682_v37 = vrot.slane %v1670_v4, 3  ;;  %v1681_v40 = vrot.slane %v1670_v4, 2  ;;  %v1695_v53 = vadd.f32 %v1670_v4, %v3759_v41 }
 0xc1f   :  { %1747 = vrot.lane.b32.xlu0 %v1676_v7, %s3639_s0  ;;  %v1691_v32 = vadd.f32 %v1676_v7, %v3748_v33  ;;  %v1692_v54 = vadd.f32 %v1677_v20, %v3750_v34  ;;  %v1693_v56 = vadd.f32 %v1678_v58, %v3753_v36  ;;  %v1694_v24 = vadd.f32 %v1679_v22, %v3756_v39 }
 0xc20   :  { %v3097_v17 = vmul.f32 -1.442695, %v1695_v53  ;;  %v1696_v30 = vadd.f32 %v1680_v61, %v3764_v46  ;;  %v1698_v49 = vadd.f32 %v1682_v37, %v3768_v50  ;;  %v1697_v42 = vadd.f32 %v1681_v40, %v3762_v44 }
 0xc21   :  { %1749 = vrot.lane.b32.xlu1 %v1677_v20, %s3639_s0  ;;  %v3093_v10 = vmul.f32 -1.442695, %v1691_v32  ;;  %v3094_v57 = vmul.f32 -1.442695, %v1692_v54  ;;  %v3095_v14 = vmul.f32 -1.442695, %v1693_v56 }
 0xc22   :  { %3439 = vpow2.f32 %v3097_v17  ;;  %v3096_v15 = vmul.f32 -1.442695, %v1694_v24  ;;  %v3098_v4 = vmul.f32 -1.442695, %v1696_v30  ;;  %v3100_v26 = vmul.f32 -1.442695, %v1698_v49 }
 0xc23   :  { %1751 = vrot.lane.b32.xlu0 %v1678_v58, %s3639_s0  ;;  %3441 = vpow2.f32 %v3093_v10  ;;  %v3099_v7 = vmul.f32 -1.442695, %v1697_v42 }
 0xc24   :  { %3443 = vpow2.f32 %v3094_v57 }
 0xc25   :  { %1753 = vrot.lane.b32.xlu1 %v1679_v22, %s3639_s0  ;;  %3445 = vpow2.f32 %v3095_v14 }
 0xc26   :  { %3447 = vpow2.f32 %v3096_v15 }
 0xc27   :  { %1757 = vrot.lane.b32.xlu0 %v1680_v61, %s3639_s0  ;;  %3449 = vpow2.f32 %v3098_v4 }
 0xc28   :  { %3451 = vpow2.f32 %v3100_v26 }
 0xc29   :  { %1761 = vrot.lane.b32.xlu1 %v1682_v37, %s3639_s0  ;;  %3453 = vpow2.f32 %v3099_v7 }
 0xc2b   :  { %1759 = vrot.lane.b32.xlu0 %v1681_v40, %s3639_s0 }
 0xc2c   :  { %v3440_v6 = vpop.eup %3439 }
 0xc2d   :  { %v3442_v20 = vpop.eup %3441  ;;  %v1727_v58 = vadd.f32 1.0, %v3440_v6 }
 0xc2e   :  { %v3444_v22 = vpop.eup %3443  ;;  %v1723_v53 = vadd.f32 1.0, %v3442_v20 }
 0xc2f   :  { %v3446_v61 = vpop.eup %3445  ;;  %v1724_v32 = vadd.f32 1.0, %v3444_v22  ;;  %3455 = vrcp.f32 %v1727_v58 }
 0xc30   :  { %v3448_v54 = vpop.eup %3447  ;;  %3457 = vrcp.f32 %v1723_v53  ;;  %v1725_v37 = vadd.f32 1.0, %v3446_v61 }
 0xc31   :  { %v3450_v17 = vpop.eup %3449  ;;  %3459 = vrcp.f32 %v1724_v32  ;;  %v1726_v40 = vadd.f32 1.0, %v3448_v54 }
 0xc32   :  { %v3452_v10 = vpop.eup %3451  ;;  %3461 = vrcp.f32 %v1725_v37  ;;  %v1728_v56 = vadd.f32 1.0, %v3450_v17 }
 0xc33   :  { %v3454_v57 = vpop.eup %3453  ;;  %3463 = vrcp.f32 %v1726_v40  ;;  %v1730_v24 = vadd.f32 1.0, %v3452_v10 }
 0xc34   :  { %3465 = vrcp.f32 %v1728_v56  ;;  %v1729_v30 = vadd.f32 1.0, %v3454_v57 }
 0xc35   :  { %3467 = vrcp.f32 %v1730_v24 }
 0xc36   :  { %3469 = vrcp.f32 %v1729_v30 }
 0xc39   :  { %v4338_v14 = vpop.eup %3455 }
 0xc3a   :  { %v4341_v4 = vpop.eup %3457 }
 0xc3b   :  { %v4345_v6 = vpop.eup %3459 }
 0xc3c   :  { %v4349_v58 = vpop.eup %3461 }
 0xc3d   :  { %v4353_v61 = vpop.eup %3463 }
 0xc3e   :  { %v4357_v37 = vpop.eup %3465 }
 0xc3f   :  { %v4361_v10 = vpop.eup %3467 }
 0xc40   :  { %v4365_v24 = vpop.eup %3469 }
 0xc8f   :  { %v1756_v15 = vpop.permute.xlu1 %1755 }
 0xc90   :  { %v1775_v49 = vmul.f32 %v4338_v14, %v1756_v15 }
 0xc91   :  { %v1748_v42 = vpop.permute.xlu0 %1747 }
 0xc92   :  { %v1771_v26 = vmul.f32 %v4341_v4, %v1748_v42  ;;  %1795 = vrot.lane.b32.xlu1 %v1775_v49, %s3639_s0 }
 0xc93   :  { %v1750_v7 = vpop.permute.xlu1 %1749 }
 0xc94   :  { %v1772_v20 = vmul.f32 %v4345_v6, %v1750_v7  ;;  %1787 = vrot.lane.b32.xlu0 %v1771_v26, %s3639_s0 }
 0xc95   :  { %v1752_v22 = vpop.permute.xlu0 %1751 }
 0xc96   :  { %v1773_v53 = vmul.f32 %v4349_v58, %v1752_v22  ;;  %1789 = vrot.lane.b32.xlu1 %v1772_v20, %s3639_s0 }
 0xc97   :  { %v1754_v32 = vpop.permute.xlu1 %1753 }
 0xc98   :  { %v1774_v54 = vmul.f32 %v4353_v61, %v1754_v32  ;;  %1791 = vrot.lane.b32.xlu0 %v1773_v53, %s3639_s0 }
 0xc99   :  { %v1758_v17 = vpop.permute.xlu0 %1757 }
 0xc9a   :  { %v1776_v40 = vmul.f32 %v4357_v37, %v1758_v17  ;;  %1793 = vrot.lane.b32.xlu1 %v1774_v54, %s3639_s0 }
 0xc9b   :  { %v1762_v56 = vpop.permute.xlu1 %1761 }
 0xc9c   :  { %v1778_v57 = vmul.f32 %v4361_v10, %v1762_v56  ;;  %1797 = vrot.lane.b32.xlu0 %v1776_v40, %s3639_s0 }
 0xc9d   :  { %v1760_v30 = vpop.permute.xlu0 %1759 }
 0xc9e   :  { %v1777_v15 = vmul.f32 %v4365_v24, %v1760_v30  ;;  %1801 = vrot.lane.b32.xlu1 %v1778_v57, %s3639_s0 }
 0xca0   :  { %1799 = vrot.lane.b32.xlu0 %v1777_v15, %s3639_s0 }
 0xd04   :  { %v1796_v49 = vpop.permute.xlu1 %1795 }
 0xd05   :  { %v1815_v42 = vadd.f32 %v1796_v49, %v3759_v41 }
 0xd06   :  { %v1788_v26 = vpop.permute.xlu0 %1787 }
 0xd07   :  { %3471 = vtanh.f32 %v1815_v42  ;;  %v1811_v7 = vadd.f32 %v1788_v26, %v3748_v33 }
 0xd08   :  { %v1790_v20 = vpop.permute.xlu1 %1789 }
 0xd09   :  { %3473 = vtanh.f32 %v1811_v7  ;;  %v1812_v22 = vadd.f32 %v1790_v20, %v3750_v34 }
 0xd0a   :  { %v1792_v53 = vpop.permute.xlu0 %1791 }
 0xd0b   :  { %3475 = vtanh.f32 %v1812_v22  ;;  %v1813_v32 = vadd.f32 %v1792_v53, %v3753_v36 }
 0xd0c   :  { %v1794_v54 = vpop.permute.xlu1 %1793 }
 0xd0d   :  { %3477 = vtanh.f32 %v1813_v32  ;;  %v1814_v17 = vadd.f32 %v1794_v54, %v3756_v39 }
 0xd0e   :  { %v1798_v40 = vpop.permute.xlu0 %1797 }
 0xd0f   :  { %3479 = vtanh.f32 %v1814_v17  ;;  %v1816_v56 = vadd.f32 %v1798_v40, %v3764_v46  ;;  %v1827_v40 = vsub.f32 1.0, %v4341_v4 }
 0xd10   :  { %v1802_v57 = vpop.permute.xlu1 %1801 }
 0xd11   :  { %v3472_v30 = vpop.eup %3471  ;;  %3481 = vtanh.f32 %v1816_v56  ;;  %v1818_v15 = vadd.f32 %v1802_v57, %v3768_v50  ;;  %v1875_v56 = vrot.slane %v4264_v5, 7 }
 0xd12   :  { %1851 = vrot.lane.b32.xlu1 %v3472_v30, %s3641_s12  ;;  %v1800_v49 = vpop.permute.xlu0 %1799 }
 0xd13   :  { %v3474_v42 = vpop.eup %3473  ;;  %3483 = vtanh.f32 %v1818_v15  ;;  %v1817_v26 = vadd.f32 %v1800_v49, %v3762_v44  ;;  %v1891_v30 = vmul.f32 %v4341_v4, %v1875_v56  ;;  %v1828_v49 = vsub.f32 1.0, %v4345_v6 }
 0xd14   :  { %1843 = vrot.lane.b32.xlu0 %v3474_v42, %s3641_s12  ;;  %v1876_v42 = vrot.slane %v4258_v47, 7 }
 0xd15   :  { %v3476_v7 = vpop.eup %3475  ;;  %3485 = vtanh.f32 %v1817_v26 }
 0xd16   :  { %1845 = vrot.lane.b32.xlu1 %v3476_v7, %s3641_s12  ;;  %v1877_v7 = vrot.slane %v4283_v35, 7 }
 0xd17   :  { %v3478_v20 = vpop.eup %3477 }
 0xd18   :  { %1847 = vrot.lane.b32.xlu0 %v3478_v20, %s3641_s12  ;;  %v1893_v5 = vmul.f32 %v4349_v58, %v1877_v7 }
 0xd19   :  { %v3480_v22 = vpop.eup %3479 }
 0xd1a   :  { %1849 = vrot.lane.b32.xlu1 %v3480_v22, %s3641_s12  ;;  %v1892_v22 = vmul.f32 %v4345_v6, %v1876_v42  ;;  %v1879_v6 = vrot.slane %v4273_v52, 7 }
 0xd1b   :  { %v3482_v53 = vpop.eup %3481 }
 0xd1c   :  { %1853 = vrot.lane.b32.xlu0 %v3482_v53, %s3641_s12 }
 0xd1d   :  { %v3484_v32 = vpop.eup %3483 }
 0xd1e   :  { %1857 = vrot.lane.b32.xlu1 %v3484_v32, %s3641_s12  ;;  %v1829_v32 = vsub.f32 1.0, %v4349_v58 }
 0xd1f   :  { %v3486_v54 = vpop.eup %3485 }
 0xd20   :  { %1855 = vrot.lane.b32.xlu0 %v3486_v54, %s3641_s12  ;;  %v1831_v54 = vsub.f32 1.0, %v4338_v14 }
 0xd84   :  { %v1852_v17 = vpop.permute.xlu1 %1851 }
 0xd86   :  { %v1844_v57 = vpop.permute.xlu0 %1843 }
 0xd87   :  { %v1867_v15 = vmul.f32 %v1844_v57, %v1827_v40  ;;  %v1878_v40 = vrot.slane %v4276_v25, 7 }
 0xd88   :  { %v1846_v26 = vpop.permute.xlu1 %1845 }
 0xd89   :  { %v4392_v20 = vadd.f32 %v1891_v30, %v1867_v15  ;;  %v1868_v53 = vmul.f32 %v1846_v26, %v1828_v49  ;;  %v1830_v30 = vsub.f32 1.0, %v4353_v61  ;;  %v1871_v15 = vmul.f32 %v1852_v17, %v1831_v54 }
 0xd8a   :  { %v1848_v4 = vpop.permute.xlu0 %1847  ;;  %v1894_v49 = vmul.f32 %v4353_v61, %v1878_v40  ;;  %v1880_v26 = vrot.slane %v4293_v9, 7  ;;  %v1882_v17 = vrot.slane %v4304_v63, 7 }
 0xd8b   :  { %5244 = vst [vmem:[#allocation11_spill] sm:$0xff] %v4392_v20  ;;  %v1948_v56 = vpack.c.bf16 %v4392_v20, %v4392_v20  ;;  %v4401_v57 = vadd.f32 %v1892_v22, %v1868_v53  ;;  %v1869_v35 = vmul.f32 %v1848_v4, %v1829_v32  ;;  %v1895_v22 = vmul.f32 %v4338_v14, %v1879_v6 }
 0xd8c   :  { %v1850_v42 = vpop.permute.xlu1 %1849  ;;  %v1832_v53 = vsub.f32 1.0, %v4357_v37  ;;  %v1896_v32 = vmul.f32 %v4357_v37, %v1880_v26  ;;  %v1898_v14 = vmul.f32 %v4361_v10, %v1882_v17 }
 0xd8d   :  { %5245 = vst [vmem:[#allocation12_spill] sm:$0xff] %v4401_v57  ;;  %v1964_v58 = vunpack.c.l.b16 %v1948_v56  ;;  %v1949_v7 = vpack.c.bf16 %v4401_v57, %v4401_v57  ;;  %v4409_v25 = vadd.f32 %v1893_v5, %v1869_v35  ;;  %v1870_v2 = vmul.f32 %v1850_v42, %v1830_v30 }
 0xd8e   :  { %v1854_v4 = vpop.permute.xlu0 %1853  ;;  %v1834_v56 = vsub.f32 1.0, %v4361_v10  ;;  %v4420_v5 = vadd.f32 %v1895_v22, %v1871_v15 }
 0xd8f   :  { %5246 = vst [vmem:[#allocation13_spill] sm:$0xff] %v4409_v25  ;;  %v1965_v61 = vunpack.c.l.b16 %v1949_v7  ;;  %v1950_v54 = vpack.c.bf16 %v4409_v25, %v4409_v25  ;;  %v4417_v40 = vadd.f32 %v1894_v49, %v1870_v2  ;;  %v1972_v35 = vrot.slane %v1964_v58, 4 }
 0xd90   :  { %5248 = vst [vmem:[#allocation15_spill] sm:$0xff] %v4420_v5  ;;  %v1872_v30 = vmul.f32 %v1854_v4, %v1832_v53  ;;  %v1858_v6 = vpop.permute.xlu1 %1857  ;;  %v1833_v2 = vsub.f32 1.0, %v4365_v24  ;;  %v1881_v49 = vrot.slane %v4296_v13, 7  ;;  %v1952_v10 = vpack.c.bf16 %v4420_v5, %v4420_v5 }
 0xd91   :  { %5247 = vst [vmem:[#allocation14_spill] sm:$0xff] %v4417_v40  ;;  %v1973_v42 = vrot.slane %v1965_v61, 3  ;;  %v1966_v37 = vunpack.c.l.b16 %v1950_v54  ;;  %v1951_v26 = vpack.c.bf16 %v4417_v40, %v4417_v40  ;;  %v1874_v7 = vmul.f32 %v1858_v6, %v1834_v56 }
 0xd92   :  { %v4425_v63 = vadd.f32 %v1896_v32, %v1872_v30  ;;  %v1856_v52 = vpop.permute.xlu0 %1855  ;;  %v1897_v32 = vmul.f32 %v4365_v24, %v1881_v49  ;;  %v1968_v6 = vunpack.c.l.b16 %v1952_v10 }
 0xd93   :  { %v1974_v15 = vsel %vm538_vm2, %v1973_v42, %v1972_v35  ;;  %v1975_v58 = vrot.slane %v1966_v37, 2  ;;  %v1967_v22 = vunpack.c.l.b16 %v1951_v26  ;;  %v4430_v53 = vadd.f32 %v1898_v14, %v1874_v7 }
 0xd94   :  { %5249 = vst [vmem:[#allocation16_spill] sm:$0xff] %v4425_v63  ;;  %v1953_v4 = vpack.c.bf16 %v4425_v63, %v4425_v63  ;;  %v1873_v17 = vmul.f32 %v1856_v52, %v1833_v2 }
 0xd95   :  { %5250 = vst [vmem:[#allocation17_spill] sm:$0xff] %v4430_v53  ;;  %v1976_v61 = vsel %vm541_vm3, %v1975_v58, %v1974_v15  ;;  %v1977_v54 = vrot.slane %v1967_v22, 1  ;;  %v1955_v56 = vpack.c.bf16 %v4430_v53, %v4430_v53 }
 0xd96   :  { %v1969_v35 = vunpack.c.l.b16 %v1953_v4  ;;  %v4440_v30 = vadd.f32 %v1897_v32, %v1873_v17  ;;  %v3634_v4 = vld [vmem:[%s5199_s3] sm:$0xff]   ;;  %v3635_v32 = vld [vmem:[%s5199_s3 + $0x8] sm:$0xff]  }
 0xd97   :  { %v1978_v14 = vsel %vm544_vm4, %v1977_v54, %v1976_v61  ;;  %v1971_v26 = vunpack.c.l.b16 %v1955_v56 }
 0xd98   :  { %5251 = vst [vmem:[#allocation18_spill] sm:$0xff] %v4440_v30  ;;  %v1954_v42 = vpack.c.bf16 %v4440_v30, %v4440_v30  ;;  %v1980_v37 = vrot.slane %v1969_v35, 7  ;;  %v1979_v52 = vsel %vm547_vm5, %v1968_v6, %v1978_v14 }
 0xd99   :  { %v1984_v2 = vrot.slane %v1971_v26, 5 }
 0xd9a   :  { %v1970_v7 = vunpack.c.l.b16 %v1954_v42  ;;  %v1981_v49 = vsel %vm550_vm6, %v1980_v37, %v1979_v52 }
 0xd9c   :  { %v1982_v24 = vrot.slane %v1970_v7, 6 }
 0xd9e   :  { %v1983_v15 = vsel %vm553_vm7, %v1982_v24, %v1981_v49 }
 0xd9f   :  { %v1985_v58 = vsel %vm556_vm8, %v1984_v2, %v1983_v15 }
 0xda0   :  { %v1986_v22 = vpack.c.b16 %v1985_v58, %v1985_v58 }
 0xda2   :  { %1987 = vrot.lane.b32.xlu0 %v1986_v22, %s3641_s12 }
 0xe14   :  { %v1988_v10 = vpop.permute.xlu0 %1987 }
 0xe15   :  { %3215 = vmatmul.mubr.msk.bf16.vlgmr.msra.gmra.mrb[12].mxu1 %vm25_vm0, %v1988_v10 }
 0xe16   :  { %3227 = vmatpush3.bf16.msra.mxu1 %v3634_v4  ;;  %3230 = vmatprep.mubr.msk.bf16.mxu1 %vm3638_vm1, %v5243_v0  ;;  %vm3036_vm1 = vcmask 260096  }
 0xe17   :  { %3228 = vmatprep.subr.bf16.mxu1 %v5243_v0 }
 0xe1a   :  { %3229 = vmatpush3.bf16.msra.mxu1 %v3635_v32 }
 0xee8   :  { %v2026_v17 = vpop.f32.mrb[12].mxu1 }
 0xee9   :  { %v2027_v61 = vadd.f32 %v4184_v11, %v2026_v17  ;;  %v3216_v54 = vpop.f32.mrb[13].mxu1 }
 0xeea   :  { %v2029_v56 = vpop.f32.mrb[14].mxu1 }
 0xeeb   :  { %v3217_v35 = vpop.f32.mrb[15].mxu1  ;;  %v2034_v14 = vrot.slane %v2027_v61, 4  ;;  %v2033_v6 = vrot.slane %v2027_v61, 3  ;;  %v2036_v42 = vrot.slane %v2027_v61, 6  ;;  %v2035_v37 = vrot.slane %v2027_v61, 5 }
 0xeec   :  { %v2038_v0 = vrot.slane %v2027_v61, 1  ;;  %v2037_v26 = vrot.slane %v2027_v61, 7  ;;  %v2039_v11 = vrot.slane %v2027_v61, 2  ;;  %v2053_v56 = vadd.f32 %v2027_v61, %v3764_v46 }
 0xeed   :  { %2106 = vrot.lane.b32.xlu0 %v2034_v14, %s3639_s0  ;;  %2104 = vrot.lane.b32.xlu1 %v2033_v6, %s3639_s0  ;;  %v2049_v7 = vadd.f32 %v2034_v14, %v3750_v34  ;;  %v2048_v52 = vadd.f32 %v2033_v6, %v3748_v33  ;;  %v2051_v2 = vadd.f32 %v2036_v42, %v3756_v39 }
 0xeee   :  { %v2050_v15 = vadd.f32 %v2035_v37, %v3753_v36  ;;  %v2054_v22 = vadd.f32 %v2038_v0, %v3762_v44  ;;  %v2052_v4 = vadd.f32 %v2037_v26, %v3759_v41  ;;  %v2055_v17 = vadd.f32 %v2039_v11, %v3768_v50 }
 0xeef   :  { %v3103_v24 = vmul.f32 -1.442695, %v2049_v7  ;;  %v3102_v49 = vmul.f32 -1.442695, %v2048_v52  ;;  %v3105_v58 = vmul.f32 -1.442695, %v2051_v2 }
 0xef0   :  { %v3104_v10 = vmul.f32 -1.442695, %v2050_v15  ;;  %v3108_v32 = vmul.f32 -1.442695, %v2054_v22  ;;  %v3106_v54 = vmul.f32 -1.442695, %v2052_v4 }
 0xef1   :  { %2110 = vrot.lane.b32.xlu0 %v2036_v42, %s3639_s0  ;;  %2108 = vrot.lane.b32.xlu1 %v2035_v37, %s3639_s0  ;;  %3487 = vpow2.f32 %v3103_v24  ;;  %v3109_v35 = vmul.f32 -1.442695, %v2055_v17  ;;  %v3107_v14 = vmul.f32 -1.442695, %v2053_v56 }
 0xef2   :  { %3489 = vpow2.f32 %v3102_v49 }
 0xef3   :  { %3491 = vpow2.f32 %v3105_v58 }
 0xef4   :  { %3493 = vpow2.f32 %v3104_v10 }
 0xef5   :  { %2116 = vrot.lane.b32.xlu0 %v2038_v0, %s3639_s0  ;;  %2112 = vrot.lane.b32.xlu1 %v2037_v26, %s3639_s0  ;;  %3495 = vpow2.f32 %v3108_v32 }
 0xef6   :  { %3497 = vpow2.f32 %v3106_v54 }
 0xef7   :  { %3499 = vpow2.f32 %v3109_v35 }
 0xef8   :  { %3501 = vpow2.f32 %v3107_v14 }
 0xef9   :  { %2118 = vrot.lane.b32.xlu0 %v2039_v11, %s3639_s0  ;;  %2114 = vrot.lane.b32.xlu1 %v2027_v61, %s3639_s0 }
 0xefb   :  { %v3488_v6 = vpop.eup %3487 }
 0xefc   :  { %v3490_v42 = vpop.eup %3489  ;;  %v2081_v37 = vadd.f32 1.0, %v3488_v6 }
 0xefd   :  { %v3492_v0 = vpop.eup %3491  ;;  %v2080_v7 = vadd.f32 1.0, %v3490_v42 }
 0xefe   :  { %v3494_v26 = vpop.eup %3493  ;;  %3503 = vrcp.f32 %v2081_v37  ;;  %v2083_v52 = vadd.f32 1.0, %v3492_v0 }
 0xeff   :  { %v3496_v24 = vpop.eup %3495  ;;  %3505 = vrcp.f32 %v2080_v7  ;;  %v2082_v11 = vadd.f32 1.0, %v3494_v26 }
 0xf00   :  { %v3498_v2 = vpop.eup %3497  ;;  %3507 = vrcp.f32 %v2083_v52  ;;  %v2086_v61 = vadd.f32 1.0, %v3496_v24 }
 0xf01   :  { %v3500_v49 = vpop.eup %3499  ;;  %3509 = vrcp.f32 %v2082_v11  ;;  %v2084_v15 = vadd.f32 1.0, %v3498_v2 }
 0xf02   :  { %v3502_v58 = vpop.eup %3501  ;;  %3511 = vrcp.f32 %v2086_v61  ;;  %v2087_v22 = vadd.f32 1.0, %v3500_v49 }
 0xf03   :  { %3513 = vrcp.f32 %v2084_v15  ;;  %v2085_v10 = vadd.f32 1.0, %v3502_v58 }
 0xf04   :  { %3515 = vrcp.f32 %v2087_v22 }
 0xf05   :  { %3517 = vrcp.f32 %v2085_v10 }
 0xf08   :  { %v4477_v4 = vpop.eup %3503 }
 0xf09   :  { %v4479_v32 = vpop.eup %3505 }
 0xf0a   :  { %v4483_v14 = vpop.eup %3507 }
 0xf0b   :  { %v4487_v6 = vpop.eup %3509 }
 0xf0c   :  { %v4491_v26 = vpop.eup %3511 }
 0xf0d   :  { %v4495_v52 = vpop.eup %3513 }
 0xf0e   :  { %v4499_v49 = vpop.eup %3515 }
 0xf0f   :  { %v4503_v15 = vpop.eup %3517 }
 0xf5f   :  { %v2107_v17 = vpop.permute.xlu0 %2106  ;;  %v2105_v54 = vpop.permute.xlu1 %2104 }
 0xf60   :  { %v2129_v56 = vmul.f32 %v4477_v4, %v2107_v17  ;;  %v2128_v35 = vmul.f32 %v4479_v32, %v2105_v54 }
 0xf62   :  { %2146 = vrot.lane.b32.xlu0 %v2129_v56, %s3639_s0  ;;  %2144 = vrot.lane.b32.xlu1 %v2128_v35, %s3639_s0 }
 0xf63   :  { %v2111_v42 = vpop.permute.xlu0 %2110  ;;  %v2109_v37 = vpop.permute.xlu1 %2108 }
 0xf64   :  { %v2131_v0 = vmul.f32 %v4483_v14, %v2111_v42  ;;  %v2130_v7 = vmul.f32 %v4487_v6, %v2109_v37 }
 0xf66   :  { %2150 = vrot.lane.b32.xlu0 %v2131_v0, %s3639_s0  ;;  %2148 = vrot.lane.b32.xlu1 %v2130_v7, %s3639_s0 }
 0xf67   :  { %v2117_v24 = vpop.permute.xlu0 %2116  ;;  %v2113_v11 = vpop.permute.xlu1 %2112 }
 0xf68   :  { %v2134_v2 = vmul.f32 %v4491_v26, %v2117_v24  ;;  %v2132_v61 = vmul.f32 %v4495_v52, %v2113_v11 }
 0xf6a   :  { %2156 = vrot.lane.b32.xlu0 %v2134_v2, %s3639_s0  ;;  %2152 = vrot.lane.b32.xlu1 %v2132_v61, %s3639_s0 }
 0xf6b   :  { %v2119_v58 = vpop.permute.xlu0 %2118  ;;  %v2115_v22 = vpop.permute.xlu1 %2114 }
 0xf6c   :  { %v2135_v10 = vmul.f32 %v4499_v49, %v2119_v58  ;;  %v2133_v17 = vmul.f32 %v4503_v15, %v2115_v22 }
 0xf6e   :  { %2158 = vrot.lane.b32.xlu0 %v2135_v10, %s3639_s0  ;;  %2154 = vrot.lane.b32.xlu1 %v2133_v17, %s3639_s0 }
 0xfd4   :  { %v2147_v54 = vpop.permute.xlu0 %2146  ;;  %v2145_v56 = vpop.permute.xlu1 %2144 }
 0xfd5   :  { %v2169_v35 = vadd.f32 %v2147_v54, %v3750_v34  ;;  %v2168_v42 = vadd.f32 %v2145_v56, %v3748_v33 }
 0xfd7   :  { %3519 = vtanh.f32 %v2169_v35 }
 0xfd8   :  { %3521 = vtanh.f32 %v2168_v42  ;;  %v2151_v37 = vpop.permute.xlu0 %2150  ;;  %v2149_v0 = vpop.permute.xlu1 %2148 }
 0xfd9   :  { %v2171_v7 = vadd.f32 %v2151_v37, %v3756_v39  ;;  %v2170_v24 = vadd.f32 %v2149_v0, %v3753_v36 }
 0xfdb   :  { %3523 = vtanh.f32 %v2171_v7 }
 0xfdc   :  { %3525 = vtanh.f32 %v2170_v24  ;;  %v2157_v11 = vpop.permute.xlu0 %2156  ;;  %v2153_v2 = vpop.permute.xlu1 %2152 }
 0xfdd   :  { %v2174_v61 = vadd.f32 %v2157_v11, %v3762_v44  ;;  %v2172_v58 = vadd.f32 %v2153_v2, %v3759_v41  ;;  %v2185_v2 = vsub.f32 1.0, %v4477_v4 }
 0xfdf   :  { %3527 = vtanh.f32 %v2174_v61  ;;  %v2233_v61 = vrot.slane %v4401_v57, 7  ;;  %v2186_v57 = vsub.f32 1.0, %v4487_v6 }
 0xfe0   :  { %3529 = vtanh.f32 %v2172_v58  ;;  %v2159_v22 = vpop.permute.xlu0 %2158  ;;  %v2155_v10 = vpop.permute.xlu1 %2154 }
 0xfe1   :  { %v3520_v17 = vpop.eup %3519  ;;  %v2175_v54 = vadd.f32 %v2159_v22, %v3768_v50  ;;  %v2173_v56 = vadd.f32 %v2155_v10, %v3764_v46  ;;  %v2184_v22 = vsub.f32 1.0, %v4479_v32  ;;  %v2232_v10 = vrot.slane %v4392_v20, 7 }
 0xfe2   :  { %v3522_v35 = vpop.eup %3521  ;;  %2202 = vrot.lane.b32.xlu0 %v3520_v17, %s3641_s12  ;;  %v2249_v17 = vmul.f32 %v4477_v4, %v2233_v61  ;;  %v2234_v20 = vrot.slane %v4409_v25, 7 }
 0xfe3   :  { %3531 = vtanh.f32 %v2175_v54  ;;  %2200 = vrot.lane.b32.xlu1 %v3522_v35, %s3641_s12  ;;  %v2248_v35 = vmul.f32 %v4479_v32, %v2232_v10 }
 0xfe4   :  { %3533 = vtanh.f32 %v2173_v56 }
 0xfe5   :  { %v3524_v42 = vpop.eup %3523 }
 0xfe6   :  { %v3526_v37 = vpop.eup %3525  ;;  %2206 = vrot.lane.b32.xlu0 %v3524_v42, %s3641_s12 }
 0xfe7   :  { %2204 = vrot.lane.b32.xlu1 %v3526_v37, %s3641_s12 }
 0xfe9   :  { %v3528_v0 = vpop.eup %3527 }
 0xfea   :  { %v3530_v7 = vpop.eup %3529  ;;  %2212 = vrot.lane.b32.xlu0 %v3528_v0, %s3641_s12  ;;  %v2187_v0 = vsub.f32 1.0, %v4483_v14 }
 0xfeb   :  { %2208 = vrot.lane.b32.xlu1 %v3530_v7, %s3641_s12  ;;  %v2235_v7 = vrot.slane %v4417_v40, 7 }
 0xfed   :  { %v3532_v24 = vpop.eup %3531 }
 0xfee   :  { %v3534_v11 = vpop.eup %3533  ;;  %2214 = vrot.lane.b32.xlu0 %v3532_v24, %s3641_s12 }
 0xfef   :  { %2210 = vrot.lane.b32.xlu1 %v3534_v11, %s3641_s12 }
0x1054   :  { %v2203_v58 = vpop.permute.xlu0 %2202 }
0x1055   :  { %v2225_v54 = vmul.f32 %v2203_v58, %v2185_v2  ;;  %v2201_v56 = vpop.permute.xlu1 %2200  ;;  %v2251_v2 = vmul.f32 %v4483_v14, %v2235_v7  ;;  %v2188_v14 = vsub.f32 1.0, %v4495_v52 }
0x1056   :  { %v2224_v42 = vmul.f32 %v2201_v56, %v2184_v22  ;;  %v2250_v22 = vmul.f32 %v4487_v6, %v2234_v20  ;;  %v2190_v56 = vsub.f32 1.0, %v4491_v26 }
0x1057   :  { %v4531_v37 = vadd.f32 %v2249_v17, %v2225_v54 }
0x1058   :  { %v4535_v24 = vadd.f32 %v2248_v35, %v2224_v42  ;;  %v2207_v11 = vpop.permute.xlu0 %2206  ;;  %v2238_v35 = vrot.slane %v4440_v30, 7 }
0x1059   :  { %5252 = vst [vmem:[#allocation19_spill] sm:$0xff] %v4531_v37  ;;  %v2306_v4 = vpack.c.bf16 %v4531_v37, %v4531_v37  ;;  %v2227_v32 = vmul.f32 %v2207_v11, %v2187_v0  ;;  %v2205_v61 = vpop.permute.xlu1 %2204  ;;  %v2236_v0 = vrot.slane %v4420_v5, 7  ;;  %v2239_v11 = vrot.slane %v4430_v53, 7 }
0x105a   :  { %5253 = vst [vmem:[#allocation20_spill] sm:$0xff] %v4535_v24  ;;  %v2305_v58 = vpack.c.bf16 %v4535_v24, %v4535_v24  ;;  %v2226_v10 = vmul.f32 %v2205_v61, %v2186_v57  ;;  %v2254_v20 = vmul.f32 %v4491_v26, %v2238_v35  ;;  %v2191_v61 = vsub.f32 1.0, %v4499_v49 }
0x105b   :  { %v2322_v17 = vunpack.c.l.b16 %v2306_v4  ;;  %v4545_v54 = vadd.f32 %v2251_v2, %v2227_v32  ;;  %v2252_v2 = vmul.f32 %v4495_v52, %v2236_v0  ;;  %v2189_v26 = vsub.f32 1.0, %v4503_v15 }
0x105c   :  { %v2321_v42 = vunpack.c.l.b16 %v2305_v58  ;;  %v4549_v40 = vadd.f32 %v2250_v22, %v2226_v10  ;;  %v2213_v25 = vpop.permute.xlu0 %2212  ;;  %v2255_v52 = vmul.f32 %v4499_v49, %v2239_v11 }
0x105d   :  { %5254 = vst [vmem:[#allocation21_spill] sm:$0xff] %v4545_v54  ;;  %v2308_v7 = vpack.c.bf16 %v4545_v54, %v4545_v54  ;;  %v2230_v57 = vmul.f32 %v2213_v25, %v2190_v56  ;;  %v2209_v6 = vpop.permute.xlu1 %2208  ;;  %v2330_v58 = vrot.slane %v2322_v17, 4  ;;  %v2237_v56 = vrot.slane %v4425_v63, 7 }
0x105e   :  { %v2307_v4 = vpack.c.bf16 %v4549_v40, %v4549_v40  ;;  %v2228_v32 = vmul.f32 %v2209_v6, %v2188_v14  ;;  %v2329_v22 = vrot.slane %v2321_v42, 5 }
0x105f   :  { %v2324_v10 = vunpack.c.l.b16 %v2308_v7  ;;  %v4561_v30 = vadd.f32 %v2254_v20, %v2230_v57  ;;  %v2253_v7 = vmul.f32 %v4503_v15, %v2237_v56 }
0x1060   :  { %v2323_v5 = vunpack.c.l.b16 %v2307_v4  ;;  %v4563_v13 = vadd.f32 %v2252_v2, %v2228_v32  ;;  %v2215_v25 = vpop.permute.xlu0 %2214  ;;  %v2331_v57 = vsel %vm538_vm2, %v2330_v58, %v2329_v22 }
0x1061   :  { %v2311_v35 = vpack.c.bf16 %v4561_v30, %v4561_v30  ;;  %v2231_v14 = vmul.f32 %v2215_v25, %v2191_v61  ;;  %v2211_v0 = vpop.permute.xlu1 %2210  ;;  %v2334_v6 = vrot.slane %v2324_v10, 2 }
0x1062   :  { %v2332_v17 = vrot.slane %v2323_v5, 3  ;;  %v2309_v42 = vpack.c.bf16 %v4563_v13, %v4563_v13  ;;  %v2229_v20 = vmul.f32 %v2211_v0, %v2189_v26 }
0x1063   :  { %v4574_v4 = vadd.f32 %v2255_v52, %v2231_v14  ;;  %v2327_v49 = vunpack.c.l.b16 %v2311_v35 }
0x1064   :  { %v2333_v2 = vsel %vm541_vm3, %v2332_v17, %v2331_v57  ;;  %v2325_v32 = vunpack.c.l.b16 %v2309_v42  ;;  %v4577_v53 = vadd.f32 %v2253_v7, %v2229_v20  ;;  %v4593_v42 = vld [vmem:[%s5201_s4] ss:$0 sm:$0xff] }
0x1065   :  { %5255 = vst [vmem:[#allocation22_spill] sm:$0xff] %v4574_v4  ;;  %v2312_v5 = vpack.c.bf16 %v4574_v4, %v4574_v4  ;;  %v2335_v15 = vsel %vm544_vm4, %v2334_v6, %v2333_v2  ;;  %v2339_v10 = vrot.slane %v2327_v49, 7 }
0x1066   :  { %5256 = vst [vmem:[#allocation23_spill] sm:$0xff] %v4577_v53  ;;  %v2336_v11 = vrot.slane %v2325_v32, 1  ;;  %v2310_v61 = vpack.c.bf16 %v4577_v53, %v4577_v53 }
0x1067   :  { %v2328_v25 = vunpack.c.l.b16 %v2312_v5 }
0x1068   :  { %v2337_v58 = vsel %vm547_vm5, %v2336_v11, %v2335_v15  ;;  %v2326_v22 = vunpack.c.l.b16 %v2310_v61 }
0x1069   :  { %v2341_v26 = vrot.slane %v2328_v25, 6 }
0x106a   :  { %v2338_v56 = vsel %vm550_vm6, %v2326_v22, %v2337_v58 }
0x106b   :  { %v2340_v52 = vsel %vm553_vm7, %v2339_v10, %v2338_v56 }
0x106c   :  { %v2342_v35 = vsel %vm556_vm8, %v2341_v26, %v2340_v52 }
0x106d   :  { %v2343_v14 = vpack.c.b16 %v2342_v35, %v2342_v35 }
0x106f   :  { %2344 = vrot.lane.b32.xlu1 %v2343_v14, %s3641_s12 }
0x10e1   :  { %v2345_v0 = vpop.permute.xlu1 %2344 }
0x10e2   :  { %3223 = vmatmul.mubr.msk.bf16.vlgmr.msra.gmra.mrb[16].mxu0 %vm25_vm0, %v2345_v0 }
0x11b5   :  { %v2383_v17 = vpop.f32.mrb[16].mxu0 }
0x11b6   :  { %v2384_v7 = vadd.f32 %v4593_v42, %v2383_v17  ;;  %v3224_v20 = vpop.f32.mrb[17].mxu0 }
0x11b7   :  { %v2386_v57 = vpop.f32.mrb[18].mxu0 }
0x11b8   :  { %v3225_v6 = vpop.f32.mrb[19].mxu0  ;;  %v2391_v2 = vrot.slane %v2384_v7, 3  ;;  %v2390_v32 = vrot.slane %v2384_v7, 2  ;;  %v2393_v49 = vrot.slane %v2384_v7, 5  ;;  %v2392_v5 = vrot.slane %v2384_v7, 4 }
0x11b9   :  { %v2395_v11 = vrot.slane %v2384_v7, 7  ;;  %v2394_v61 = vrot.slane %v2384_v7, 6  ;;  %v2396_v15 = vrot.slane %v2384_v7, 1  ;;  %v2411_v6 = vadd.f32 %v2384_v7, %v3762_v44 }
0x11ba   :  { %2463 = vrot.lane.b32.xlu1 %v2391_v2, %s3639_s0  ;;  %2461 = vrot.lane.b32.xlu0 %v2390_v32, %s3639_s0  ;;  %v2406_v25 = vadd.f32 %v2391_v2, %v3750_v34  ;;  %v2405_v58 = vadd.f32 %v2390_v32, %v3748_v33  ;;  %v2408_v10 = vadd.f32 %v2393_v49, %v3756_v39 }
0x11bb   :  { %v2407_v56 = vadd.f32 %v2392_v5, %v3753_v36  ;;  %v2410_v35 = vadd.f32 %v2395_v11, %v3764_v46  ;;  %v2409_v0 = vadd.f32 %v2394_v61, %v3759_v41  ;;  %v2412_v20 = vadd.f32 %v2396_v15, %v3768_v50 }
0x11bc   :  { %v3112_v22 = vmul.f32 -1.442695, %v2406_v25  ;;  %v3111_v26 = vmul.f32 -1.442695, %v2405_v58  ;;  %v3114_v52 = vmul.f32 -1.442695, %v2408_v10 }
0x11bd   :  { %v3113_v14 = vmul.f32 -1.442695, %v2407_v56  ;;  %v3116_v17 = vmul.f32 -1.442695, %v2410_v35  ;;  %v3115_v57 = vmul.f32 -1.442695, %v2409_v0 }
0x11be   :  { %2467 = vrot.lane.b32.xlu1 %v2393_v49, %s3639_s0  ;;  %2465 = vrot.lane.b32.xlu0 %v2392_v5, %s3639_s0  ;;  %3535 = vpow2.f32 %v3112_v22  ;;  %v3118_v2 = vmul.f32 -1.442695, %v2412_v20  ;;  %v3117_v32 = vmul.f32 -1.442695, %v2411_v6 }
0x11bf   :  { %3537 = vpow2.f32 %v3111_v26 }
0x11c0   :  { %3539 = vpow2.f32 %v3114_v52 }
0x11c1   :  { %3541 = vpow2.f32 %v3113_v14 }
0x11c2   :  { %2471 = vrot.lane.b32.xlu1 %v2395_v11, %s3639_s0  ;;  %2469 = vrot.lane.b32.xlu0 %v2394_v61, %s3639_s0  ;;  %3543 = vpow2.f32 %v3116_v17 }
0x11c3   :  { %3545 = vpow2.f32 %v3115_v57 }
0x11c4   :  { %3547 = vpow2.f32 %v3118_v2 }
0x11c5   :  { %3549 = vpow2.f32 %v3117_v32 }
0x11c6   :  { %2473 = vrot.lane.b32.xlu1 %v2384_v7, %s3639_s0  ;;  %2475 = vrot.lane.b32.xlu0 %v2396_v15, %s3639_s0 }
0x11c8   :  { %v3536_v49 = vpop.eup %3535 }
0x11c9   :  { %v3538_v5 = vpop.eup %3537  ;;  %v2438_v11 = vadd.f32 1.0, %v3536_v49 }
0x11ca   :  { %v3540_v25 = vpop.eup %3539  ;;  %v2437_v58 = vadd.f32 1.0, %v3538_v5 }
0x11cb   :  { %v3542_v61 = vpop.eup %3541  ;;  %3551 = vrcp.f32 %v2438_v11  ;;  %v2440_v22 = vadd.f32 1.0, %v3540_v25 }
0x11cc   :  { %v3544_v10 = vpop.eup %3543  ;;  %3553 = vrcp.f32 %v2437_v58  ;;  %v2439_v15 = vadd.f32 1.0, %v3542_v61 }
0x11cd   :  { %v3546_v26 = vpop.eup %3545  ;;  %3555 = vrcp.f32 %v2440_v22  ;;  %v2442_v7 = vadd.f32 1.0, %v3544_v10 }
0x11ce   :  { %v3548_v56 = vpop.eup %3547  ;;  %3557 = vrcp.f32 %v2439_v15  ;;  %v2441_v52 = vadd.f32 1.0, %v3546_v26 }
0x11cf   :  { %v3550_v35 = vpop.eup %3549  ;;  %3559 = vrcp.f32 %v2442_v7  ;;  %v2444_v14 = vadd.f32 1.0, %v3548_v56 }
0x11d0   :  { %3561 = vrcp.f32 %v2441_v52  ;;  %v2443_v0 = vadd.f32 1.0, %v3550_v35 }
0x11d1   :  { %3563 = vrcp.f32 %v2444_v14 }
0x11d2   :  { %3565 = vrcp.f32 %v2443_v0 }
0x11d5   :  { %v4612_v17 = vpop.eup %3551 }
0x11d6   :  { %v4614_v20 = vpop.eup %3553 }
0x11d7   :  { %v4618_v49 = vpop.eup %3555 }
0x11d8   :  { %v4622_v5 = vpop.eup %3557 }
0x11d9   :  { %v4626_v22 = vpop.eup %3559  ;;  %v2543_v63 = vsub.f32 1.0, %v4622_v5 }
0x11da   :  { %v4630_v10 = vpop.eup %3561 }
0x11db   :  { %v4634_v52 = vpop.eup %3563 }
0x11dc   :  { %v4638_v35 = vpop.eup %3565 }
0x122c   :  { %v2464_v57 = vpop.permute.xlu1 %2463  ;;  %v2462_v6 = vpop.permute.xlu0 %2461 }
0x122d   :  { %v2486_v2 = vmul.f32 %v4612_v17, %v2464_v57  ;;  %v2485_v32 = vmul.f32 %v4614_v20, %v2462_v6 }
0x122f   :  { %2503 = vrot.lane.b32.xlu1 %v2486_v2, %s3639_s0  ;;  %2501 = vrot.lane.b32.xlu0 %v2485_v32, %s3639_s0 }
0x1230   :  { %v2468_v11 = vpop.permute.xlu1 %2467  ;;  %v2466_v25 = vpop.permute.xlu0 %2465 }
0x1231   :  { %v2488_v58 = vmul.f32 %v4618_v49, %v2468_v11  ;;  %v2487_v61 = vmul.f32 %v4622_v5, %v2466_v25 }
0x1233   :  { %2507 = vrot.lane.b32.xlu1 %v2488_v58, %s3639_s0  ;;  %2505 = vrot.lane.b32.xlu0 %v2487_v61, %s3639_s0 }
0x1234   :  { %v2472_v15 = vpop.permute.xlu1 %2471  ;;  %v2470_v26 = vpop.permute.xlu0 %2469 }
0x1235   :  { %v2490_v7 = vmul.f32 %v4626_v22, %v2472_v15  ;;  %v2489_v56 = vmul.f32 %v4630_v10, %v2470_v26 }
0x1237   :  { %2511 = vrot.lane.b32.xlu1 %v2490_v7, %s3639_s0  ;;  %2509 = vrot.lane.b32.xlu0 %v2489_v56, %s3639_s0 }
0x1238   :  { %v2474_v14 = vpop.permute.xlu1 %2473  ;;  %v2476_v0 = vpop.permute.xlu0 %2475 }
0x1239   :  { %v2491_v57 = vmul.f32 %v4638_v35, %v2474_v14  ;;  %v2492_v6 = vmul.f32 %v4634_v52, %v2476_v0 }
0x123b   :  { %2513 = vrot.lane.b32.xlu1 %v2491_v57, %s3639_s0  ;;  %2515 = vrot.lane.b32.xlu0 %v2492_v6, %s3639_s0 }
0x12a1   :  { %v2504_v2 = vpop.permute.xlu1 %2503  ;;  %v2502_v32 = vpop.permute.xlu0 %2501 }
0x12a2   :  { %v2526_v11 = vadd.f32 %v2504_v2, %v3750_v34  ;;  %v2525_v25 = vadd.f32 %v2502_v32, %v3748_v33 }
0x12a4   :  { %3567 = vtanh.f32 %v2526_v11 }
0x12a5   :  { %3569 = vtanh.f32 %v2525_v25  ;;  %v2508_v58 = vpop.permute.xlu1 %2507  ;;  %v2506_v61 = vpop.permute.xlu0 %2505 }
0x12a6   :  { %v2528_v15 = vadd.f32 %v2508_v58, %v3756_v39  ;;  %v2527_v26 = vadd.f32 %v2506_v61, %v3753_v36 }
0x12a8   :  { %3571 = vtanh.f32 %v2528_v15 }
0x12a9   :  { %3573 = vtanh.f32 %v2527_v26  ;;  %v2512_v7 = vpop.permute.xlu1 %2511  ;;  %v2510_v56 = vpop.permute.xlu0 %2509 }
0x12aa   :  { %v2530_v14 = vadd.f32 %v2512_v7, %v3764_v46  ;;  %v2529_v0 = vadd.f32 %v2510_v56, %v3759_v41 }
0x12ac   :  { %3575 = vtanh.f32 %v2530_v14  ;;  %v2542_v14 = vsub.f32 1.0, %v4612_v17 }
0x12ad   :  { %3577 = vtanh.f32 %v2529_v0  ;;  %v2514_v57 = vpop.permute.xlu1 %2513  ;;  %v2516_v6 = vpop.permute.xlu0 %2515  ;;  %v2590_v0 = vrot.slane %v4531_v37, 7 }
0x12ae   :  { %v3568_v2 = vpop.eup %3567  ;;  %v2531_v32 = vadd.f32 %v2514_v57, %v3762_v44  ;;  %v2532_v11 = vadd.f32 %v2516_v6, %v3768_v50  ;;  %v2541_v6 = vsub.f32 1.0, %v4614_v20 }
0x12af   :  { %v3570_v25 = vpop.eup %3569  ;;  %2559 = vrot.lane.b32.xlu1 %v3568_v2, %s3641_s12  ;;  %v2589_v2 = vrot.slane %v4535_v24, 7  ;;  %v2591_v24 = vrot.slane %v4549_v40, 7 }
0x12b0   :  { %3579 = vtanh.f32 %v2531_v32  ;;  %2557 = vrot.lane.b32.xlu0 %v3570_v25, %s3641_s12  ;;  %v2606_v32 = vmul.f32 %v4612_v17, %v2590_v0 }
0x12b1   :  { %3581 = vtanh.f32 %v2532_v11 }
0x12b2   :  { %v3572_v58 = vpop.eup %3571 }
0x12b3   :  { %v3574_v61 = vpop.eup %3573  ;;  %2563 = vrot.lane.b32.xlu1 %v3572_v58, %s3641_s12  ;;  %v2605_v58 = vmul.f32 %v4614_v20, %v2589_v2 }
0x12b4   :  { %2561 = vrot.lane.b32.xlu0 %v3574_v61, %s3641_s12 }
0x12b6   :  { %v3576_v15 = vpop.eup %3575 }
0x12b7   :  { %v3578_v26 = vpop.eup %3577  ;;  %2567 = vrot.lane.b32.xlu1 %v3576_v15, %s3641_s12 }
0x12b8   :  { %2565 = vrot.lane.b32.xlu0 %v3578_v26, %s3641_s12  ;;  %v2544_v26 = vsub.f32 1.0, %v4618_v49 }
0x12ba   :  { %v3580_v7 = vpop.eup %3579 }
0x12bb   :  { %v3582_v56 = vpop.eup %3581  ;;  %2569 = vrot.lane.b32.xlu1 %v3580_v7, %s3641_s12  ;;  %v2592_v7 = vrot.slane %v4545_v54, 7 }
0x12bc   :  { %2571 = vrot.lane.b32.xlu0 %v3582_v56, %s3641_s12 }
0x1321   :  { %v2560_v57 = vpop.permute.xlu1 %2559 }
0x1322   :  { %v2582_v11 = vmul.f32 %v2560_v57, %v2542_v14  ;;  %v2558_v25 = vpop.permute.xlu0 %2557  ;;  %v2608_v14 = vmul.f32 %v4618_v49, %v2592_v7  ;;  %v2593_v49 = vrot.slane %v4563_v13, 7  ;;  %v2595_v7 = vrot.slane %v4561_v30, 7 }
0x1323   :  { %v2581_v61 = vmul.f32 %v2558_v25, %v2541_v6  ;;  %v2607_v6 = vmul.f32 %v4622_v5, %v2591_v24  ;;  %v2546_v25 = vsub.f32 1.0, %v4626_v22 }
0x1324   :  { %v4666_v15 = vadd.f32 %v2606_v32, %v2582_v11 }
0x1325   :  { %v4670_v56 = vadd.f32 %v2605_v58, %v2581_v61  ;;  %v2564_v37 = vpop.permute.xlu1 %2563  ;;  %v2594_v58 = vrot.slane %v4577_v53, 7 }
0x1326   :  { %5257 = vst [vmem:[#allocation24_spill] sm:$0xff] %v4666_v15  ;;  %v2663_v17 = vpack.c.bf16 %v4666_v15, %v4666_v15  ;;  %v2584_v20 = vmul.f32 %v2564_v37, %v2544_v26  ;;  %v2562_v0 = vpop.permute.xlu0 %2561  ;;  %v2545_v37 = vsub.f32 1.0, %v4630_v10 }
0x1327   :  { %5258 = vst [vmem:[#allocation25_spill] sm:$0xff] %v4670_v56  ;;  %v2662_v57 = vpack.c.bf16 %v4670_v56, %v4670_v56  ;;  %v2583_v2 = vmul.f32 %v2562_v0, %v2543_v63  ;;  %v2610_v63 = vmul.f32 %v4626_v22, %v2594_v58  ;;  %v2547_v0 = vsub.f32 1.0, %v4638_v35 }
0x1328   :  { %v2679_v32 = vunpack.c.l.b16 %v2663_v17  ;;  %v4680_v11 = vadd.f32 %v2608_v14, %v2584_v20  ;;  %v2609_v14 = vmul.f32 %v4630_v10, %v2593_v49  ;;  %v2611_v10 = vmul.f32 %v4638_v35, %v2595_v7 }
0x1329   :  { %v2678_v61 = vunpack.c.l.b16 %v2662_v57  ;;  %v4684_v54 = vadd.f32 %v2607_v6, %v2583_v2  ;;  %v2568_v15 = vpop.permute.xlu1 %2567 }
0x132a   :  { %5259 = vst [vmem:[#allocation26_spill] sm:$0xff] %v4680_v11  ;;  %v2665_v26 = vpack.c.bf16 %v4680_v11, %v4680_v11  ;;  %v2586_v24 = vmul.f32 %v2568_v15, %v2546_v25  ;;  %v2566_v5 = vpop.permute.xlu0 %2565  ;;  %v2687_v57 = vrot.slane %v2679_v32, 5  ;;  %v2548_v15 = vsub.f32 1.0, %v4634_v52 }
0x132b   :  { %v2664_v17 = vpack.c.bf16 %v4684_v54, %v4684_v54  ;;  %v2585_v20 = vmul.f32 %v2566_v5, %v2545_v37  ;;  %v2686_v6 = vrot.slane %v2678_v61, 6  ;;  %v2596_v25 = vrot.slane %v4574_v4, 7 }
0x132c   :  { %v2681_v2 = vunpack.c.l.b16 %v2665_v26  ;;  %v4696_v53 = vadd.f32 %v2610_v63, %v2586_v24 }
0x132d   :  { %v2680_v11 = vunpack.c.l.b16 %v2664_v17  ;;  %v4698_v56 = vadd.f32 %v2609_v14, %v2585_v20  ;;  %v2570_v22 = vpop.permute.xlu1 %2569  ;;  %v2612_v26 = vmul.f32 %v4634_v52, %v2596_v25  ;;  %v2688_v24 = vsel %vm538_vm2, %v2687_v57, %v2686_v6 }
0x132e   :  { %5260 = vst [vmem:[#allocation27_spill] sm:$0xff] %v4696_v53  ;;  %v2667_v58 = vpack.c.bf16 %v4696_v53, %v4696_v53  ;;  %v2587_v37 = vmul.f32 %v2570_v22, %v2547_v0  ;;  %v2572_v49 = vpop.permute.xlu0 %2571  ;;  %v2691_v5 = vrot.slane %v2681_v2, 3 }
0x132f   :  { %v2689_v32 = vrot.slane %v2680_v11, 4  ;;  %v2666_v61 = vpack.c.bf16 %v4698_v56, %v4698_v56  ;;  %v2588_v63 = vmul.f32 %v2572_v49, %v2548_v15 }
0x1330   :  { %v2683_v17 = vunpack.c.l.b16 %v2667_v58  ;;  %v4709_v14 = vadd.f32 %v2611_v10, %v2587_v37 }
0x1331   :  { %v2690_v20 = vsel %vm541_vm3, %v2689_v32, %v2688_v24  ;;  %v2682_v53 = vunpack.c.l.b16 %v2666_v61  ;;  %v4712_v4 = vadd.f32 %v2612_v26, %v2588_v63 }
0x1332   :  { %v2695_v35 = vrot.slane %v2683_v17, 1  ;;  %v2668_v11 = vpack.c.bf16 %v4709_v14, %v4709_v14  ;;  %v2692_v0 = vsel %vm544_vm4, %v2691_v5, %v2690_v20 }
0x1333   :  { %v2693_v7 = vrot.slane %v2682_v53, 2  ;;  %v2669_v52 = vpack.c.bf16 %v4712_v4, %v4712_v4 }
0x1334   :  { %v2684_v57 = vunpack.c.l.b16 %v2668_v11 }
0x1335   :  { %v2694_v6 = vsel %vm547_vm5, %v2693_v7, %v2692_v0  ;;  %v2685_v2 = vunpack.c.l.b16 %v2669_v52 }
0x1336   :  { %v2696_v22 = vsel %vm550_vm6, %v2695_v35, %v2694_v6 }
0x1337   :  { %v2698_v15 = vrot.slane %v2685_v2, 7  ;;  %v2697_v25 = vsel %vm553_vm7, %v2684_v57, %v2696_v22 }
0x1339   :  { %v2699_v58 = vsel %vm556_vm8, %v2698_v15, %v2697_v25 }
0x133a   :  { %v2700_v10 = vpack.c.b16 %v2699_v58, %v2699_v58 }
0x133c   :  { %2701 = vrot.lane.b32.xlu0 %v2700_v10, %s3641_s12 }
0x13ae   :  { %v2702_v53 = vpop.permute.xlu0 %2701 }
0x13af   :  { %3231 = vmatmul.mubr.msk.bf16.vlgmr.msra.gmra.mrb[16].mxu1 %vm25_vm0, %v2702_v53  ;;  %vm3010_vm0 = vcmask 261127  }
0x1482   :  { %v2740_v37 = vpop.f32.mrb[16].mxu1 }
0x1483   :  { %v2741_v49 = vadd.f32 %v4593_v42, %v2740_v37  ;;  %v3232_v32 = vpop.f32.mrb[17].mxu1 }
0x1484   :  { %v2743_v61 = vpop.f32.mrb[18].mxu1 }
0x1485   :  { %v3233_v26 = vpop.f32.mrb[19].mxu1  ;;  %v2749_v63 = vrot.slane %v2741_v49, 3  ;;  %v2748_v24 = vrot.slane %v2741_v49, 2  ;;  %v2751_v5 = vrot.slane %v2741_v49, 5  ;;  %v2750_v17 = vrot.slane %v2741_v49, 4 }
0x1486   :  { %v2753_v20 = vrot.slane %v2741_v49, 7  ;;  %v2752_v35 = vrot.slane %v2741_v49, 6  ;;  %v2747_v42 = vrot.slane %v2741_v49, 1 }
0x1487   :  { %2822 = vrot.lane.b32.xlu0 %v2749_v63, %s3639_s0  ;;  %2820 = vrot.lane.b32.xlu1 %v2748_v24, %s3639_s0  ;;  %v2764_v11 = vadd.f32 %v2749_v63, %v3753_v36  ;;  %v2766_v52 = vadd.f32 %v2751_v5, %v3759_v41  ;;  %v2765_v25 = vadd.f32 %v2750_v17, %v3756_v39 }
0x1488   :  { %v2768_v57 = vadd.f32 %v2753_v20, %v3762_v44  ;;  %v2767_v37 = vadd.f32 %v2752_v35, %v3764_v46 }
0x1489   :  { %v3122_v7 = vmul.f32 -1.442695, %v2764_v11  ;;  %v3124_v0 = vmul.f32 -1.442695, %v2766_v52  ;;  %v3123_v53 = vmul.f32 -1.442695, %v2765_v25 }
0x148a   :  { %v3126_v6 = vmul.f32 -1.442695, %v2768_v57  ;;  %v3125_v61 = vmul.f32 -1.442695, %v2767_v37 }
0x148b   :  { %2826 = vrot.lane.b32.xlu0 %v2751_v5, %s3639_s0  ;;  %2824 = vrot.lane.b32.xlu1 %v2750_v17, %s3639_s0  ;;  %3583 = vpow2.f32 %v3122_v7 }
0x148c   :  { %3585 = vpow2.f32 %v3124_v0 }
0x148d   :  { %3587 = vpow2.f32 %v3126_v6 }
0x148f   :  { %2830 = vrot.lane.b32.xlu0 %v2753_v20, %s3639_s0  ;;  %2828 = vrot.lane.b32.xlu1 %v2752_v35, %s3639_s0 }
0x1493   :  { %2832 = vrot.lane.b32.xlu1 %v2741_v49, %s3639_s0  ;;  %2818 = vrot.lane.b32.xlu0 %v2747_v42, %s3639_s0 }
0x1495   :  { %v3584_v22 = vpop.eup %3583 }
0x1496   :  { %v2796_v58 = vadd.f32 1.0, %v3584_v22  ;;  %v3586_v10 = vpop.eup %3585 }
0x1497   :  { %480 = vrot.lane.b32.xlu1 %v3854_v62, %s3641_s12  ;;  %482 = vrot.lane.b32.xlu0 %v3840_v45, %s3641_s12  ;;  %v2762_v62 = vadd.f32 %v2747_v42, %v3748_v33  ;;  %v2769_v45 = vadd.f32 %v2741_v49, %v3768_v50  ;;  %v2798_v32 = vadd.f32 1.0, %v3586_v10  ;;  %v3588_v49 = vpop.eup %3587 }
0x1498   :  { %v2800_v63 = vadd.f32 1.0, %v3588_v49 }
0x1499   :  { %v3120_v2 = vmul.f32 -1.442695, %v2762_v62 }
0x149b   :  { %484 = vrot.lane.b32.xlu1 %v3845_v55, %s3641_s12  ;;  %486 = vrot.lane.b32.xlu0 %v3851_v60, %s3641_s12  ;;  %v2763_v55 = vadd.f32 %v2748_v24, %v3750_v34  ;;  %v3127_v60 = vmul.f32 -1.442695, %v2769_v45  ;;  %3589 = vpow2.f32 %v3120_v2 }
0x149d   :  { %v3121_v15 = vmul.f32 -1.442695, %v2763_v55  ;;  %3591 = vpow2.f32 %v3127_v60 }
0x149f   :  { %3593 = vpow2.f32 %v3121_v15 }
0x14a0   :  { %3595 = vrcp.f32 %v2796_v58 }
0x14a1   :  { %3597 = vpow2.f32 %v3123_v53 }
0x14a2   :  { %3599 = vrcp.f32 %v2798_v32 }
0x14a3   :  { %3601 = vpow2.f32 %v3125_v61 }
0x14a4   :  { %3603 = vrcp.f32 %v2800_v63 }
0x14a5   :  { %v3590_v26 = vpop.eup %3589 }
0x14a6   :  { %v2794_v5 = vadd.f32 1.0, %v3590_v26 }
0x14a7   :  { %v3592_v24 = vpop.eup %3591 }
0x14a8   :  { %v2801_v17 = vadd.f32 1.0, %v3592_v24  ;;  %3605 = vrcp.f32 %v2794_v5 }
0x14a9   :  { %v3594_v20 = vpop.eup %3593 }
0x14aa   :  { %v4750_v42 = vpop.eup %3595  ;;  %v2795_v52 = vadd.f32 1.0, %v3594_v20  ;;  %3607 = vrcp.f32 %v2801_v17 }
0x14ab   :  { %v3598_v0 = vpop.eup %3597 }
0x14ac   :  { %v4754_v57 = vpop.eup %3599  ;;  %3609 = vrcp.f32 %v2795_v52  ;;  %v2797_v2 = vadd.f32 1.0, %v3598_v0 }
0x14ad   :  { %v3602_v55 = vpop.eup %3601 }
0x14ae   :  { %v4758_v60 = vpop.eup %3603  ;;  %3611 = vrcp.f32 %v2797_v2  ;;  %v2799_v58 = vadd.f32 1.0, %v3602_v55 }
0x14b0   :  { %3613 = vrcp.f32 %v2799_v58 }
0x14b2   :  { %v4761_v10 = vpop.eup %3605 }
0x14b4   :  { %v4764_v53 = vpop.eup %3607 }
0x14b6   :  { %v4770_v26 = vpop.eup %3609 }
0x14b8   :  { %v4784_v17 = vpop.eup %3611 }
0x14f9   :  { %v2823_v11 = vpop.permute.xlu0 %2822  ;;  %v2821_v7 = vpop.permute.xlu1 %2820 }
0x14fa   :  { %v2844_v35 = vmul.f32 %v4750_v42, %v2823_v11  ;;  %v2843_v5 = vmul.f32 %v4770_v26, %v2821_v7 }
0x14fc   :  { %2862 = vrot.lane.b32.xlu0 %v2844_v35, %s3639_s0 }
0x14fd   :  { %v2827_v62 = vpop.permute.xlu0 %2826  ;;  %v2825_v6 = vpop.permute.xlu1 %2824 }
0x14fe   :  { %v2846_v45 = vmul.f32 %v4754_v57, %v2827_v62  ;;  %v2845_v7 = vmul.f32 %v4784_v17, %v2825_v6 }
0x1500   :  { %2866 = vrot.lane.b32.xlu0 %v2846_v45, %s3639_s0 }
0x1501   :  { %v2831_v22 = vpop.permute.xlu0 %2830  ;;  %v2829_v15 = vpop.permute.xlu1 %2828 }
0x1502   :  { %v2848_v25 = vmul.f32 %v4758_v60, %v2831_v22 }
0x1504   :  { %2870 = vrot.lane.b32.xlu0 %v2848_v25, %s3639_s0 }
0x1505   :  { %v2833_v37 = vpop.permute.xlu1 %2832  ;;  %v2819_v32 = vpop.permute.xlu0 %2818 }
0x1506   :  { %v2849_v49 = vmul.f32 %v4764_v53, %v2833_v37  ;;  %v2842_v61 = vmul.f32 %v4761_v10, %v2819_v32  ;;  %v5269_v37 = vld [vmem:[#allocation13_spill] sm:$0xff] }
0x1508   :  { %2872 = vrot.lane.b32.xlu1 %v2849_v49, %s3639_s0  ;;  %2858 = vrot.lane.b32.xlu0 %v2842_v61, %s3639_s0 }
0x1509   :  { %v481_v63 = vpop.permute.xlu1 %480  ;;  %v483_v24 = vpop.permute.xlu0 %482 }
0x150a   :  { %505 = vst.msk [vmem:[%s5203_s5] sm:$0x1] %vm504_vm9, %v481_v63  ;;  %506 = vst.msk [vmem:[%s5203_s5 + $0x8] sm:$0x1] %vm504_vm9, %v483_v24  ;;  %v5270_v63 = vld [vmem:[#allocation15_spill] sm:$0xff] }
0x150c   :  { %2860 = vrot.lane.b32.xlu1 %v2843_v5, %s3639_s0  ;;  %490 = vrot.lane.b32.xlu0 %v3866_v12, %s3641_s12  ;;  %v4798_v12 = vpop.eup %3613 }
0x150d   :  { %v485_v20 = vpop.permute.xlu1 %484  ;;  %v487_v11 = vpop.permute.xlu0 %486  ;;  %v2847_v35 = vmul.f32 %v4798_v12, %v2829_v15 }
0x150e   :  { %507 = vst.msk [vmem:[%s5203_s5 + $0x10] sm:$0x1] %vm504_vm9, %v485_v20  ;;  %508 = vst.msk [vmem:[%s5203_s5 + $0x18] sm:$0x1] %vm504_vm9, %v487_v11  ;;  %v5271_v20 = vld [vmem:[#allocation10_spill] sm:$0xff] }
0x150f   :  { %v5272_v11 = vld [vmem:[#allocation18_spill] sm:$0xff] }
0x1510   :  { %2864 = vrot.lane.b32.xlu1 %v2845_v7, %s3639_s0  ;;  %494 = vrot.lane.b32.xlu0 %v3882_v48, %s3641_s12  ;;  %v5263_v48 = vld [vmem:[#allocation4_spill] sm:$0xff] }
0x1514   :  { %2868 = vrot.lane.b32.xlu1 %v2847_v35, %s3639_s0  ;;  %846 = vrot.lane.b32.xlu0 %v3972_v23, %s3641_s12  ;;  %v5264_v23 = vld [vmem:[#allocation5_spill] sm:$0xff] }
0x1518   :  { %488 = vrot.lane.b32.xlu1 %v3859_v3, %s3641_s12  ;;  %850 = vrot.lane.b32.xlu0 %v3990_v51, %s3641_s12  ;;  %v5261_v3 = vld [vmem:[#allocation3_spill] sm:$0xff]  ;;  %v5267_v51 = vld [vmem:[#allocation9_spill] sm:$0xff] }
0x151c   :  { %492 = vrot.lane.b32.xlu1 %v3874_v8, %s3641_s12  ;;  %854 = vrot.lane.b32.xlu0 %v4005_v16, %s3641_s12  ;;  %v5262_v8 = vld [vmem:[#allocation7_spill] sm:$0xff] }
0x1520   :  { %844 = vrot.lane.b32.xlu1 %v3983_v38, %s3641_s12  ;;  %858 = vrot.lane.b32.xlu0 %v4019_v43, %s3641_s12  ;;  %v5266_v38 = vld [vmem:[#allocation6_spill] sm:$0xff] }
0x1524   :  { %848 = vrot.lane.b32.xlu1 %v3975_v28, %s3641_s12  ;;  %1203 = vrot.lane.b32.xlu0 %v4127_v19, %s3641_s12  ;;  %v5265_v28 = vld [vmem:[#allocation8_spill] sm:$0xff] }
0x1528   :  { %852 = vrot.lane.b32.xlu1 %v3998_v21, %s3641_s12  ;;  %1207 = vrot.lane.b32.xlu0 %v4135_v27, %s3641_s12 }
0x152c   :  { %856 = vrot.lane.b32.xlu1 %v4010_v18, %s3641_s12  ;;  %1211 = vrot.lane.b32.xlu0 %v4142_v59, %s3641_s12 }
0x1530   :  { %1201 = vrot.lane.b32.xlu1 %v4118_v1, %s3641_s12  ;;  %1215 = vrot.lane.b32.xlu0 %v4156_v31, %s3641_s12 }
0x1534   :  { %1205 = vrot.lane.b32.xlu1 %v4130_v29, %s3641_s12  ;;  %1560 = vrot.lane.b32.xlu0 %v4258_v47, %s3641_s12 }
0x1538   :  { %1209 = vrot.lane.b32.xlu1 %v5261_v3, %s3641_s12  ;;  %1564 = vrot.lane.b32.xlu0 %v5262_v8, %s3641_s12  ;;  %v5273_v3 = vld [vmem:[#allocation12_spill] sm:$0xff] }
0x1539   :  { %v5274_v8 = vld [vmem:[#allocation20_spill] sm:$0xff] }
0x153c   :  { %1213 = vrot.lane.b32.xlu1 %v5263_v48, %s3641_s12  ;;  %1568 = vrot.lane.b32.xlu0 %v4293_v9, %s3641_s12 }
0x1540   :  { %1558 = vrot.lane.b32.xlu1 %v5264_v23, %s3641_s12 }
0x1544   :  { %1562 = vrot.lane.b32.xlu1 %v5265_v28, %s3641_s12  ;;  %v5275_v28 = vld [vmem:[#allocation14_spill] sm:$0xff] }
0x1548   :  { %1566 = vrot.lane.b32.xlu1 %v5266_v38, %s3641_s12 }
0x154c   :  { %1570 = vrot.lane.b32.xlu1 %v5267_v51, %s3641_s12 }
0x156e   :  { %v2863_v21 = vpop.permute.xlu0 %2862 }
0x156f   :  { %v2884_v16 = vadd.f32 %v2863_v21, %v3753_v36  ;;  %v5276_v21 = vld [vmem:[#allocation16_spill] sm:$0xff] }
0x1571   :  { %3615 = vtanh.f32 %v2884_v16 }
0x1572   :  { %v2867_v18 = vpop.permute.xlu0 %2866 }
0x1573   :  { %v2886_v43 = vadd.f32 %v2867_v18, %v3759_v41  ;;  %v5277_v18 = vld [vmem:[#allocation17_spill] sm:$0xff] }
0x1575   :  { %3617 = vtanh.f32 %v2886_v43 }
0x1576   :  { %v2871_v1 = vpop.permute.xlu0 %2870 }
0x1577   :  { %v2888_v19 = vadd.f32 %v2871_v1, %v3762_v44  ;;  %v5278_v1 = vld [vmem:[#allocation19_spill] sm:$0xff] }
0x1579   :  { %3619 = vtanh.f32 %v2888_v19  ;;  %v5279_v19 = vld [vmem:[#allocation25_spill] sm:$0xff] }
0x157a   :  { %v2873_v29 = vpop.permute.xlu1 %2872  ;;  %v2859_v27 = vpop.permute.xlu0 %2858 }
0x157b   :  { %v3616_v59 = vpop.eup %3615  ;;  %v2889_v31 = vadd.f32 %v2873_v29, %v3768_v50  ;;  %v2882_v47 = vadd.f32 %v2859_v27, %v3748_v33  ;;  %v5280_v27 = vld [vmem:[#allocation21_spill] sm:$0xff] }
0x157c   :  { %2918 = vrot.lane.b32.xlu1 %v3616_v59, %s3641_s12 }
0x157d   :  { %3621 = vtanh.f32 %v2889_v31  ;;  %v5281_v31 = vld [vmem:[#allocation23_spill] sm:$0xff] }
0x157e   :  { %v2861_v36 = vpop.permute.xlu1 %2860  ;;  %v491_v9 = vpop.permute.xlu0 %490  ;;  %3623 = vtanh.f32 %v2882_v47 }
0x157f   :  { %v3618_v52 = vpop.eup %3617  ;;  %v2883_v41 = vadd.f32 %v2861_v36, %v3750_v34  ;;  %510 = vst.msk [vmem:[%s5203_s5 + $0x28] sm:$0x1] %vm504_vm9, %v491_v9  ;;  %v5268_v34 = vld [vmem:[#allocation11_spill] sm:$0xff]  ;;  %v5282_v36 = vld [vmem:[#allocation22_spill] sm:$0xff] }
0x1580   :  { %2922 = vrot.lane.b32.xlu1 %v3618_v52, %s3641_s12  ;;  %v5283_v52 = vld [vmem:[#allocation24_spill] sm:$0xff] }
0x1581   :  { %3625 = vtanh.f32 %v2883_v41 }
0x1582   :  { %v2865_v44 = vpop.permute.xlu1 %2864  ;;  %v495_v50 = vpop.permute.xlu0 %494 }
0x1583   :  { %v2885_v33 = vadd.f32 %v2865_v44, %v3756_v39  ;;  %512 = vst.msk [vmem:[%s5203_s5 + $0x38] sm:$0x1] %vm504_vm9, %v495_v50  ;;  %v3620_v0 = vpop.eup %3619  ;;  %v5284_v44 = vld [vmem:[#allocation26_spill] sm:$0xff]  ;;  %v5285_v50 = vld [vmem:[#allocation27_spill] sm:$0xff] }
0x1584   :  { %1915 = vrot.lane.b32.xlu1 %v5268_v34, %s3641_s12 }
0x1585   :  { %3627 = vtanh.f32 %v2885_v33 }
0x1586   :  { %v2869_v62 = vpop.permute.xlu1 %2868  ;;  %v847_v6 = vpop.permute.xlu0 %846 }
0x1587   :  { %v3622_v45 = vpop.eup %3621  ;;  %v2887_v2 = vadd.f32 %v2869_v62, %v3764_v46  ;;  %870 = vst.msk [vmem:[%s5203_s5 + $0x8] sm:$0x2] %vm868_vm10, %v847_v6 }
0x1588   :  { %2926 = vrot.lane.b32.xlu1 %v3620_v0, %s3641_s12  ;;  %2928 = vrot.lane.b32.xlu0 %v3622_v45, %s3641_s12  ;;  %v3624_v39 = vpop.eup %3623  ;;  %v2900_v45 = vsub.f32 1.0, %v4750_v42 }
0x1589   :  { %3629 = vtanh.f32 %v2887_v2  ;;  %v2898_v2 = vsub.f32 1.0, %v4761_v10 }
0x158a   :  { %v489_v55 = vpop.permute.xlu1 %488  ;;  %v851_v22 = vpop.permute.xlu0 %850 }
0x158b   :  { %v3626_v15 = vpop.eup %3625  ;;  %509 = vst.msk [vmem:[%s5203_s5 + $0x20] sm:$0x1] %vm504_vm9, %v489_v55  ;;  %v2899_v55 = vsub.f32 1.0, %v4770_v26 }
0x158c   :  { %872 = vst.msk [vmem:[%s5203_s5 + $0x18] sm:$0x2] %vm868_vm10, %v851_v22  ;;  %2916 = vrot.lane.b32.xlu0 %v3626_v15, %s3641_s12  ;;  %2914 = vrot.lane.b32.xlu1 %v3624_v39, %s3641_s12  ;;  %v2946_v39 = vrot.slane %v5279_v19, 7  ;;  %v2947_v22 = vrot.slane %v5283_v52, 7  ;;  %v2948_v15 = vrot.slane %v4684_v54, 7 }
0x158e   :  { %v493_v46 = vpop.permute.xlu1 %492  ;;  %v855_v25 = vpop.permute.xlu0 %854 }
0x158f   :  { %v3628_v58 = vpop.eup %3627  ;;  %511 = vst.msk [vmem:[%s5203_s5 + $0x30] sm:$0x1] %vm504_vm9, %v493_v46 }
0x1590   :  { %874 = vst.msk [vmem:[%s5203_s5 + $0x28] sm:$0x2] %vm868_vm10, %v855_v25  ;;  %2920 = vrot.lane.b32.xlu0 %v3628_v58, %s3641_s12  ;;  %1919 = vrot.lane.b32.xlu1 %v5269_v37, %s3641_s12  ;;  %v2962_v37 = vmul.f32 %v4761_v10, %v2946_v39 }
0x1592   :  { %v845_v32 = vpop.permute.xlu1 %844  ;;  %v859_v49 = vpop.permute.xlu0 %858 }
0x1593   :  { %v3630_v61 = vpop.eup %3629  ;;  %869 = vst.msk [vmem:[%s5203_s5] sm:$0x2] %vm868_vm10, %v845_v32  ;;  %876 = vst.msk [vmem:[%s5203_s5 + $0x38] sm:$0x2] %vm868_vm10, %v859_v49  ;;  %v2963_v49 = vmul.f32 %v4770_v26, %v2947_v22 }
0x1594   :  { %2924 = vrot.lane.b32.xlu0 %v3630_v61, %s3641_s12  ;;  %1923 = vrot.lane.b32.xlu1 %v5270_v63, %s3641_s12  ;;  %v2964_v63 = vmul.f32 %v4750_v42, %v2948_v15 }
0x1596   :  { %v849_v24 = vpop.permute.xlu1 %848  ;;  %v1204_v5 = vpop.permute.xlu0 %1203 }
0x1597   :  { %871 = vst.msk [vmem:[%s5203_s5 + $0x10] sm:$0x2] %vm868_vm10, %v849_v24  ;;  %v2902_v24 = vsub.f32 1.0, %v4754_v57 }
0x1598   :  { %1227 = vst.msk [vmem:[%s5203_s5 + $0x8] sm:$0x4] %vm1225_vm11, %v1204_v5  ;;  %1572 = vrot.lane.b32.xlu0 %v5271_v20, %s3641_s12  ;;  %1927 = vrot.lane.b32.xlu1 %v5272_v11, %s3641_s12  ;;  %v2901_v11 = vsub.f32 1.0, %v4784_v17 }
0x159a   :  { %v853_v7 = vpop.permute.xlu1 %852  ;;  %v1208_v35 = vpop.permute.xlu0 %1207 }
0x159b   :  { %873 = vst.msk [vmem:[%s5203_s5 + $0x20] sm:$0x2] %vm868_vm10, %v853_v7  ;;  %v2949_v7 = vrot.slane %v5284_v44, 7 }
0x159c   :  { %1229 = vst.msk [vmem:[%s5203_s5 + $0x18] sm:$0x4] %vm1225_vm11, %v1208_v35  ;;  %1917 = vrot.lane.b32.xlu0 %v5273_v3, %s3641_s12  ;;  %2272 = vrot.lane.b32.xlu1 %v5274_v8, %s3641_s12  ;;  %v2950_v35 = vrot.slane %v4698_v56, 7 }
0x159d   :  { %v2965_v42 = vmul.f32 %v4784_v17, %v2949_v7  ;;  %v2905_v17 = vsub.f32 1.0, %v4764_v53 }
0x159e   :  { %v857_v48 = vpop.permute.xlu1 %856  ;;  %v1212_v23 = vpop.permute.xlu0 %1211 }
0x159f   :  { %875 = vst.msk [vmem:[%s5203_s5 + $0x30] sm:$0x2] %vm868_vm10, %v857_v48  ;;  %v2904_v48 = vsub.f32 1.0, %v4758_v60 }
0x15a0   :  { %1231 = vst.msk [vmem:[%s5203_s5 + $0x28] sm:$0x4] %vm1225_vm11, %v1212_v23  ;;  %1921 = vrot.lane.b32.xlu0 %v5275_v28, %s3641_s12  ;;  %2276 = vrot.lane.b32.xlu1 %v4549_v40, %s3641_s12  ;;  %v2966_v23 = vmul.f32 %v4754_v57, %v2950_v35  ;;  %v2951_v28 = vrot.slane %v5285_v50, 7 }
0x15a2   :  { %v1202_v38 = vpop.permute.xlu1 %1201  ;;  %v1216_v51 = vpop.permute.xlu0 %1215 }
0x15a3   :  { %1226 = vst.msk [vmem:[%s5203_s5] sm:$0x4] %vm1225_vm11, %v1202_v38  ;;  %1233 = vst.msk [vmem:[%s5203_s5 + $0x38] sm:$0x4] %vm1225_vm11, %v1216_v51  ;;  %v2952_v38 = vrot.slane %v4709_v14, 7 }
0x15a4   :  { %1925 = vrot.lane.b32.xlu0 %v5276_v21, %s3641_s12  ;;  %2280 = vrot.lane.b32.xlu1 %v4563_v13, %s3641_s12 }
0x15a6   :  { %v1206_v40 = vpop.permute.xlu1 %1205  ;;  %v1561_v16 = vpop.permute.xlu0 %1560 }
0x15a7   :  { %1228 = vst.msk [vmem:[%s5203_s5 + $0x10] sm:$0x4] %vm1225_vm11, %v1206_v40  ;;  %v2903_v40 = vsub.f32 1.0, %v4798_v12 }
0x15a8   :  { %1584 = vst.msk [vmem:[%s5203_s5 + $0x8] sm:$0x8] %vm1582_vm12, %v1561_v16  ;;  %1929 = vrot.lane.b32.xlu0 %v5277_v18, %s3641_s12  ;;  %2284 = vrot.lane.b32.xlu1 %v4561_v30, %s3641_s12 }
0x15aa   :  { %v1210_v13 = vpop.permute.xlu1 %1209  ;;  %v1565_v43 = vpop.permute.xlu0 %1564 }
0x15ab   :  { %1230 = vst.msk [vmem:[%s5203_s5 + $0x20] sm:$0x4] %vm1225_vm11, %v1210_v13 }
0x15ac   :  { %1586 = vst.msk [vmem:[%s5203_s5 + $0x18] sm:$0x8] %vm1582_vm12, %v1565_v43  ;;  %2274 = vrot.lane.b32.xlu0 %v5278_v1, %s3641_s12  ;;  %2629 = vrot.lane.b32.xlu1 %v5279_v19, %s3641_s12  ;;  %v2968_v1 = vmul.f32 %v4758_v60, %v2952_v38 }
0x15ae   :  { %v1214_v29 = vpop.permute.xlu1 %1213  ;;  %v1569_v30 = vpop.permute.xlu0 %1568 }
0x15af   :  { %1232 = vst.msk [vmem:[%s5203_s5 + $0x30] sm:$0x4] %vm1225_vm11, %v1214_v29  ;;  %v2953_v29 = vrot.slane %v4712_v4, 7 }
0x15b0   :  { %1588 = vst.msk [vmem:[%s5203_s5 + $0x28] sm:$0x8] %vm1582_vm12, %v1569_v30  ;;  %2278 = vrot.lane.b32.xlu0 %v5280_v27, %s3641_s12  ;;  %2633 = vrot.lane.b32.xlu1 %v4684_v54, %s3641_s12 }
0x15b2   :  { %v1559_v59 = vpop.permute.xlu1 %1558 }
0x15b3   :  { %1583 = vst.msk [vmem:[%s5203_s5] sm:$0x8] %vm1582_vm12, %v1559_v59 }
0x15b4   :  { %2282 = vrot.lane.b32.xlu0 %v5281_v31, %s3641_s12  ;;  %2637 = vrot.lane.b32.xlu1 %v4698_v56, %s3641_s12 }
0x15b6   :  { %v1563_v47 = vpop.permute.xlu1 %1562 }
0x15b7   :  { %1585 = vst.msk [vmem:[%s5203_s5 + $0x10] sm:$0x8] %vm1582_vm12, %v1563_v47 }
0x15b8   :  { %2286 = vrot.lane.b32.xlu0 %v5282_v36, %s3641_s12  ;;  %2641 = vrot.lane.b32.xlu1 %v4709_v14, %s3641_s12  ;;  %v2967_v14 = vmul.f32 %v4798_v12, %v2951_v28  ;;  %v2969_v36 = vmul.f32 %v4764_v53, %v2953_v29 }
0x15ba   :  { %v1567_v9 = vpop.permute.xlu1 %1566 }
0x15bb   :  { %1587 = vst.msk [vmem:[%s5203_s5 + $0x20] sm:$0x8] %vm1582_vm12, %v1567_v9 }
0x15bc   :  { %2631 = vrot.lane.b32.xlu0 %v5283_v52, %s3641_s12 }
0x15be   :  { %v1571_v41 = vpop.permute.xlu1 %1570 }
0x15bf   :  { %1589 = vst.msk [vmem:[%s5203_s5 + $0x30] sm:$0x8] %vm1582_vm12, %v1571_v41 }
0x15c0   :  { %2635 = vrot.lane.b32.xlu0 %v5284_v44, %s3641_s12 }
0x15c4   :  { %2639 = vrot.lane.b32.xlu0 %v5285_v50, %s3641_s12 }
0x15c8   :  { %2643 = vrot.lane.b32.xlu0 %v4712_v4, %s3641_s12 }
0x15ee   :  { %v2919_v33 = vpop.permute.xlu1 %2918 }
0x15ef   :  { %v2940_v46 = vmul.f32 %v2919_v33, %v2900_v45 }
0x15f1   :  { %v2972_v54 = vadd.f32 %v2964_v63, %v2940_v46 }
0x15f2   :  { %v2923_v34 = vpop.permute.xlu1 %2922 }
0x15f3   :  { %v2942_v3 = vmul.f32 %v2923_v34, %v2902_v24  ;;  %v3020_v16 = vrot.slane %v2972_v54, 6 }
0x15f5   :  { %v2974_v18 = vadd.f32 %v2966_v23, %v2942_v3 }
0x15f6   :  { %v1916_v0 = vpop.permute.xlu1 %1915 }
0x15f7   :  { %1940 = vst.msk [vmem:[%s5203_s5] sm:$0x10] %vm1939_vm13, %v1916_v0  ;;  %v3024_v47 = vrot.slane %v2974_v18, 4 }
0x15fa   :  { %v2927_v62 = vpop.permute.xlu1 %2926  ;;  %v2929_v6 = vpop.permute.xlu0 %2928 }
0x15fb   :  { %v2944_v51 = vmul.f32 %v2927_v62, %v2904_v48  ;;  %v2945_v30 = vmul.f32 %v2929_v6, %v2905_v17 }
0x15fd   :  { %v2976_v59 = vadd.f32 %v2968_v1, %v2944_v51  ;;  %v2977_v4 = vadd.f32 %v2969_v36, %v2945_v30 }
0x15fe   :  { %v2915_v25 = vpop.permute.xlu1 %2914  ;;  %v2917_v58 = vpop.permute.xlu0 %2916 }
0x15ff   :  { %v2938_v32 = vmul.f32 %v2915_v25, %v2898_v2  ;;  %v2939_v61 = vmul.f32 %v2917_v58, %v2899_v55  ;;  %v3028_v41 = vrot.slane %v2976_v59, 2  ;;  %v3030_v0 = vrot.slane %v2977_v4, 1 }
0x1601   :  { %v2970_v5 = vadd.f32 %v2962_v37, %v2938_v32  ;;  %v2971_v20 = vadd.f32 %v2963_v49, %v2939_v61 }
0x1602   :  { %v1920_v8 = vpop.permute.xlu1 %1919  ;;  %v2921_v10 = vpop.permute.xlu0 %2920 }
0x1603   :  { %1942 = vst.msk [vmem:[%s5203_s5 + $0x10] sm:$0x10] %vm1939_vm13, %v1920_v8  ;;  %v2941_v26 = vmul.f32 %v2921_v10, %v2901_v11  ;;  %2986 = vrot.lane.b32.xlu1 %v2970_v5, %s3641_s12  ;;  %2988 = vrot.lane.b32.xlu0 %v2971_v20, %s3641_s12  ;;  %v3019_v56 = vrot.slane %v2971_v20, 7 }
0x1605   :  { %v2973_v21 = vadd.f32 %v2965_v42, %v2941_v26  ;;  %v3021_v27 = vsel %vm538_vm2, %v3020_v16, %v3019_v56 }
0x1606   :  { %v1924_v13 = vpop.permute.xlu1 %1923  ;;  %v2925_v43 = vpop.permute.xlu0 %2924 }
0x1607   :  { %v3022_v19 = vrot.slane %v2973_v21, 5  ;;  %1944 = vst.msk [vmem:[%s5203_s5 + $0x20] sm:$0x10] %vm1939_vm13, %v1924_v13  ;;  %v2943_v57 = vmul.f32 %v2925_v43, %v2903_v40  ;;  %2990 = vrot.lane.b32.xlu1 %v2972_v54, %s3641_s12  ;;  %2992 = vrot.lane.b32.xlu0 %v2973_v21, %s3641_s12 }
0x1609   :  { %v3023_v60 = vsel %vm541_vm3, %v3022_v19, %v3021_v27  ;;  %v2975_v31 = vadd.f32 %v2967_v14, %v2943_v57 }
0x160a   :  { %v1928_v9 = vpop.permute.xlu1 %1927  ;;  %v1573_v52 = vpop.permute.xlu0 %1572  ;;  %v3025_v53 = vsel %vm544_vm4, %v3024_v47, %v3023_v60 }
0x160b   :  { %v3026_v12 = vrot.slane %v2975_v31, 3  ;;  %1946 = vst.msk [vmem:[%s5203_s5 + $0x30] sm:$0x10] %vm1939_vm13, %v1928_v9  ;;  %2994 = vrot.lane.b32.xlu1 %v2974_v18, %s3641_s12  ;;  %2996 = vrot.lane.b32.xlu0 %v2975_v31, %s3641_s12 }
0x160c   :  { %1590 = vst.msk [vmem:[%s5203_s5 + $0x38] sm:$0x8] %vm1582_vm12, %v1573_v52 }
0x160d   :  { %v3027_v44 = vsel %vm547_vm5, %v3026_v12, %v3025_v53 }
0x160e   :  { %v2273_v50 = vpop.permute.xlu1 %2272  ;;  %v1918_v33 = vpop.permute.xlu0 %1917  ;;  %v3029_v34 = vsel %vm550_vm6, %v3028_v41, %v3027_v44 }
0x160f   :  { %2297 = vst.msk [vmem:[%s5203_s5] sm:$0x20] %vm2296_vm14, %v2273_v50  ;;  %2998 = vrot.lane.b32.xlu1 %v2976_v59, %s3641_s12  ;;  %3000 = vrot.lane.b32.xlu0 %v2977_v4, %s3641_s12  ;;  %v3031_v45 = vsel %vm553_vm7, %v3030_v0, %v3029_v34 }
0x1610   :  { %1941 = vst.msk [vmem:[%s5203_s5 + $0x8] sm:$0x10] %vm1939_vm13, %v1918_v33 }
0x1612   :  { %v2277_v62 = vpop.permute.xlu1 %2276  ;;  %v1922_v6 = vpop.permute.xlu0 %1921 }
0x1613   :  { %2299 = vst.msk [vmem:[%s5203_s5 + $0x10] sm:$0x20] %vm2296_vm14, %v2277_v62  ;;  %3032 = vrot.lane.b32.xlu1 %v3031_v45, %s3641_s12 }
0x1614   :  { %1943 = vst.msk [vmem:[%s5203_s5 + $0x18] sm:$0x10] %vm1939_vm13, %v1922_v6 }
0x1616   :  { %v2281_v2 = vpop.permute.xlu1 %2280  ;;  %v1926_v39 = vpop.permute.xlu0 %1925 }
0x1617   :  { %2301 = vst.msk [vmem:[%s5203_s5 + $0x20] sm:$0x20] %vm2296_vm14, %v2281_v2 }
0x1618   :  { %1945 = vst.msk [vmem:[%s5203_s5 + $0x28] sm:$0x10] %vm1939_vm13, %v1926_v39 }
0x161a   :  { %v2285_v55 = vpop.permute.xlu1 %2284  ;;  %v1930_v22 = vpop.permute.xlu0 %1929 }
0x161b   :  { %2303 = vst.msk [vmem:[%s5203_s5 + $0x30] sm:$0x20] %vm2296_vm14, %v2285_v55 }
0x161c   :  { %1947 = vst.msk [vmem:[%s5203_s5 + $0x38] sm:$0x10] %vm1939_vm13, %v1930_v22 }
0x161e   :  { %v2630_v15 = vpop.permute.xlu1 %2629  ;;  %v2275_v46 = vpop.permute.xlu0 %2274 }
0x161f   :  { %2654 = vst.msk [vmem:[%s5203_s5] sm:$0x40] %vm2653_vm15, %v2630_v15 }
0x1620   :  { %2298 = vst.msk [vmem:[%s5203_s5 + $0x8] sm:$0x20] %vm2296_vm14, %v2275_v46 }
0x1622   :  { %v2634_v25 = vpop.permute.xlu1 %2633  ;;  %v2279_v58 = vpop.permute.xlu0 %2278 }
0x1623   :  { %2656 = vst.msk [vmem:[%s5203_s5 + $0x10] sm:$0x40] %vm2653_vm15, %v2634_v25 }
0x1624   :  { %2300 = vst.msk [vmem:[%s5203_s5 + $0x18] sm:$0x20] %vm2296_vm14, %v2279_v58 }
0x1626   :  { %v2638_v37 = vpop.permute.xlu1 %2637  ;;  %v2283_v32 = vpop.permute.xlu0 %2282 }
0x1627   :  { %2658 = vst.msk [vmem:[%s5203_s5 + $0x20] sm:$0x40] %vm2653_vm15, %v2638_v37 }
0x1628   :  { %2302 = vst.msk [vmem:[%s5203_s5 + $0x28] sm:$0x20] %vm2296_vm14, %v2283_v32 }
0x162a   :  { %v2642_v49 = vpop.permute.xlu1 %2641  ;;  %v2287_v61 = vpop.permute.xlu0 %2286 }
0x162b   :  { %2660 = vst.msk [vmem:[%s5203_s5 + $0x30] sm:$0x40] %vm2653_vm15, %v2642_v49 }
0x162c   :  { %2304 = vst.msk [vmem:[%s5203_s5 + $0x38] sm:$0x20] %vm2296_vm14, %v2287_v61 }
0x162e   :  { %v2632_v63 = vpop.permute.xlu0 %2631 }
0x162f   :  { %2655 = vst.msk [vmem:[%s5203_s5 + $0x8] sm:$0x40] %vm2653_vm15, %v2632_v63 }
0x1632   :  { %v2636_v24 = vpop.permute.xlu0 %2635 }
0x1633   :  { %2657 = vst.msk [vmem:[%s5203_s5 + $0x18] sm:$0x40] %vm2653_vm15, %v2636_v24 }
0x1636   :  { %v2640_v5 = vpop.permute.xlu0 %2639 }
0x1637   :  { %2659 = vst.msk [vmem:[%s5203_s5 + $0x28] sm:$0x40] %vm2653_vm15, %v2640_v5 }
0x163a   :  { %v2644_v20 = vpop.permute.xlu0 %2643 }
0x163b   :  { %2661 = vst.msk [vmem:[%s5203_s5 + $0x38] sm:$0x40] %vm2653_vm15, %v2644_v20 }
0x1675   :  { %v2987_v11 = vpop.permute.xlu1 %2986  ;;  %v2989_v7 = vpop.permute.xlu0 %2988 }
0x1676   :  { %3011 = vst.msk [vmem:[%s5203_s5] sm:$0x80] %vm3010_vm0, %v2987_v11  ;;  %3035 = vst.msk [vmem:[#allocation2 - $0x7] sm:$0x80] %vm3010_vm0, %v2987_v11 }
0x1677   :  { %3012 = vst.msk [vmem:[%s5203_s5 + $0x8] sm:$0x80] %vm3010_vm0, %v2989_v7 }
0x1679   :  { %v2991_v54 = vpop.permute.xlu1 %2990  ;;  %v2993_v35 = vpop.permute.xlu0 %2992 }
0x167a   :  { %3013 = vst.msk [vmem:[%s5203_s5 + $0x10] sm:$0x80] %vm3010_vm0, %v2991_v54  ;;  %3014 = vst.msk [vmem:[%s5203_s5 + $0x18] sm:$0x80] %vm3010_vm0, %v2993_v35 }
0x167d   :  { %v2995_v3 = vpop.permute.xlu1 %2994  ;;  %v2997_v8 = vpop.permute.xlu0 %2996 }
0x167e   :  { %3015 = vst.msk [vmem:[%s5203_s5 + $0x20] sm:$0x80] %vm3010_vm0, %v2995_v3  ;;  %3016 = vst.msk [vmem:[%s5203_s5 + $0x28] sm:$0x80] %vm3010_vm0, %v2997_v8 }
0x1681   :  { %v2999_v10 = vpop.permute.xlu1 %2998  ;;  %v3001_v48 = vpop.permute.xlu0 %3000 }
0x1682   :  { %3017 = vst.msk [vmem:[%s5203_s5 + $0x30] sm:$0x80] %vm3010_vm0, %v2999_v10  ;;  %3018 = vst.msk [vmem:[%s5203_s5 + $0x38] sm:$0x80] %vm3010_vm0, %v3001_v48 }
0x1685   :  { %v3033_v42 = vpop.permute.xlu1 %3032 }
0x1686   :  { %3037 = vst.msk [vmem:[#allocation2 + $0x1] sm:$0x7f] %vm3036_vm1, %v3033_v42 }

// kernel: han_forward.7
= control target key start
LH: loop header
LB: loop body
LE: loop exit
PB: predicated region body
PF: predicated region fallthrough
CT: control target
= control target key end

     0   :  { %vm25_vm0 = vcmask 254976   ;;  %v825_v0 = vmov 0.0   ;;  %vm826_vm1 = vmmov 0   ;;  %v50_v5 = vlaneseq  ;;  %s828_s8 = smov 64   ;;  %s1070_s1 = inlined_call_operand.vmem [shape: bf16[64,96], index: 1, kind: input, shape index: {}]   ;;  %s1071_s3 = inlined_call_operand.vmem [shape: bf16[32,96], index: 3, kind: input, shape index: {}]   ;;  %s1072_s0 = inlined_call_operand.vmem [shape: bf16[2,4,64], index: 0, kind: input, shape index: {}]   ;;  %s1073_s4 = inlined_call_operand.vmem [shape: f32[1,96], index: 4, kind: input, shape index: {}]   ;;  %s1074_s2 = inlined_call_operand.vmem [shape: f32[1,96], index: 2, kind: input, shape index: {}]   ;;  %s1075_s5 = inlined_call_operand.vmem [shape: f32[2,4,32], index: 5, kind: output, shape index: {}]  }
   0x1   :  { %721 = vmatprep.subr.bf16.mxu0 %v825_v0  ;;  %733 = vmatprep.subr.bf16.mxu1 %v825_v0  ;;  %v771_v1 = vld [vmem:[%s1070_s1] sm:$0xff]   ;;  %26 = vst.msk [vmem:[#allocation2] sm:$0x3] %vm25_vm0, %v825_v0  ;;  %v773_v3 = vld [vmem:[%s1070_s1 + $0x8] sm:$0xff]   ;;  %v775_v6 = vld [vmem:[%s1070_s1 + $0x10] sm:$0xff]   ;;  %vm150_vm2 = vcmask 261120  }
   0x2   :  { %v870_v2 = vld [vmem:[%s1071_s3] sm:$0xff]   ;;  %737 = vmatprep.mubr.msk.bf16.mxu1 %vm826_vm1, %v825_v0  ;;  %729 = vmatprep.mubr.msk.bf16.mxu0 %vm826_vm1, %v825_v0  ;;  %v884_v4 = vld [vmem:[%s1071_s3 + $0x8] sm:$0xff]   ;;  %v827_v10 = vmov 1983009808   ;;  %v900_v12 = vshrl.u32 %v50_v5, 7  ;;  %v776_v16 = vld [vmem:[%s1070_s1 + $0x18] sm:$0xff]  }
   0x3   :  { %722 = vmatpush3.bf16.msra.mxu0 %v771_v1  ;;  %734 = vmatpush3.bf16.msra.mxu1 %v870_v2  ;;  %v27_v7 = vld [vmem:[%s1072_s0] sm:$0x3]  ;;  %v28_v8 = vld [vmem:[%s1072_s0 + $0x2] sm:$0x3]  ;;  %v48_v11 = vunpack.c.l.s4 %v827_v10  ;;  %vm78_vm3 = vcmask 523264   ;;  %vm282_vm4 = vcmask 1041409  }
   0x4   :  { %723 = vmatprep.subr.bf16.mxu0 %v825_v0  ;;  %735 = vmatprep.subr.bf16.mxu1 %v825_v0  ;;  %v46_v14 = vcombine.low %v27_v7, %v28_v8  ;;  %v926_v19 = vld [vmem:[%s1073_s4] ss:$0 sm:$0xff]  ;;  %s830_s4 = smov 96   ;;  %vm272_vm5 = vcmask 253952   ;;  %vm672_vm6 = vcmask 1044484   ;;  %vm404_vm7 = vcmask 254977  }
   0x5   :  { %v49_v15 = vunpack.c.0.s8 %v48_v11  ;;  %v683_v30 = vld [vmem:[%s1074_s2] ss:$0 sm:$0xff]  ;;  %s829_s2 = smov 32   ;;  %vm536_vm8 = vcmask 256002   ;;  %vm669_vm9 = vcmask 257027   ;;  %vm677_vm10 = vcmask 258051  }
   0x7   :  { %724 = vmatpush3.bf16.msra.mxu0 %v773_v3  ;;  %736 = vmatpush3.bf16.msra.mxu1 %v884_v4  ;;  %v52_v17 = vsub.s32 %v49_v15, %v900_v12 }
   0x8   :  { %725 = vmatprep.subr.bf16.mxu0 %v825_v0  ;;  %v898_v9 = vld [vmem:[#allocation2] sm:$0x3]  ;;  %741 = vmatprep.subr.bf16.mxu1 %v825_v0 }
   0x9   :  { %v131_v13 = vpack.c.bf16 %v898_v9, %v898_v9  ;;  %v53_v18 = vrot.slane %v46_v14, %v52_v17  ;;  %v245_v47 = vrot.slane %v898_v9, 1 }
   0xb   :  { %738 = vmatmul.mubr.msk.bf16.vlgmr.msra.gmra.mrb[0].mxu1 %vm150_vm2, %v131_v13  ;;  %726 = vmatpush3.bf16.msra.mxu0 %v775_v6 }
   0xc   :  { %727 = vmatprep.subr.bf16.mxu0 %v825_v0  ;;  %742 = vmatpush3.bf16.msra.mxu1 %v870_v2 }
   0xd   :  { %743 = vmatprep.subr.bf16.mxu1 %v825_v0  ;;  %745 = vmatprep.mubr.msk.bf16.mxu1 %vm826_vm1, %v825_v0 }
   0xf   :  { %728 = vmatpush3.bf16.msra.mxu0 %v776_v16 }
  0x10   :  { %744 = vmatpush3.bf16.msra.mxu1 %v884_v4  ;;  %749 = vmatprep.subr.bf16.mxu0 %v825_v0 }
  0x11   :  { %757 = vmatprep.subr.bf16.mxu1 %v825_v0 }
  0x12   :  { %730 = vmatmul.mubr.msk.bf16.vlgmr.msra.gmra.mrb[0].mxu0 %vm78_vm3, %v53_v18 }
  0x13   :  { %750 = vmatpush3.bf16.msra.mxu0 %v870_v2  ;;  %753 = vmatprep.mubr.msk.bf16.mxu0 %vm826_vm1, %v825_v0 }
  0x14   :  { %751 = vmatprep.subr.bf16.mxu0 %v825_v0 }
  0x17   :  { %752 = vmatpush3.bf16.msra.mxu0 %v884_v4 }
  0xde   :  { %v188_v20 = vpop.f32.mrb[0].mxu1 }
  0xdf   :  { %v189_v21 = vadd.f32 %v926_v19, %v188_v20  ;;  %v739_v22 = vpop.f32.mrb[1].mxu1 }
  0xe0   :  { %v191_v23 = vpop.f32.mrb[2].mxu1 }
  0xe1   :  { %v740_v24 = vpop.f32.mrb[3].mxu1  ;;  %v195_v25 = vrot.slane %v189_v21, 1 }
  0xe3   :  { %214 = vrot.lane.b32.xlu0 %v195_v25, %s828_s8 }
  0xe5   :  { %v116_v26 = vpop.f32.mrb[0].mxu0 }
  0xe6   :  { %v731_v27 = vpop.f32.mrb[1].mxu0  ;;  %v934_v31 = vadd.f32 %v683_v30, %v116_v26 }
  0xe7   :  { %212 = vrot.lane.b32.xlu0 %v189_v21, %s828_s8  ;;  %v119_v28 = vpop.f32.mrb[2].mxu0 }
  0xe8   :  { %v732_v29 = vpop.f32.mrb[3].mxu0  ;;  %v938_v32 = vcombine.high %v934_v31, %v934_v31  ;;  %v198_v35 = vadd.f32 %v189_v21, %v934_v31 }
  0xea   :  { %v199_v33 = vadd.f32 %v195_v25, %v938_v32  ;;  %v693_v36 = vmul.f32 -1.442695, %v198_v35 }
  0xec   :  { %v694_v34 = vmul.f32 -1.442695, %v199_v33 }
  0xee   :  { %777 = vpow2.f32 %v694_v34 }
  0xef   :  { %779 = vpow2.f32 %v693_v36 }
  0xf8   :  { %v778_v37 = vpop.eup %777 }
  0xf9   :  { %v207_v38 = vadd.f32 1.0, %v778_v37  ;;  %v780_v39 = vpop.eup %779 }
  0xfa   :  { %v206_v40 = vadd.f32 1.0, %v780_v39 }
  0xfb   :  { %781 = vrcp.f32 %v207_v38 }
  0xfc   :  { %783 = vrcp.f32 %v206_v40 }
 0x105   :  { %v782_v41 = vpop.eup %781 }
 0x106   :  { %v784_v44 = vpop.eup %783  ;;  %v233_v55 = vsub.f32 1.0, %v782_v41 }
 0x107   :  { %v232_v61 = vsub.f32 1.0, %v784_v44 }
 0x155   :  { %v215_v42 = vpop.permute.xlu0 %214 }
 0x156   :  { %v219_v43 = vmul.f32 %v782_v41, %v215_v42 }
 0x158   :  { %224 = vrot.lane.b32.xlu1 %v219_v43, %s828_s8 }
 0x159   :  { %v213_v45 = vpop.permute.xlu0 %212 }
 0x15a   :  { %v218_v46 = vmul.f32 %v784_v44, %v213_v45 }
 0x15c   :  { %222 = vrot.lane.b32.xlu1 %v218_v46, %s828_s8 }
 0x160   :  { %248 = vrot.lane.b32.xlu1 %v245_v47, %s829_s2 }
 0x164   :  { %246 = vrot.lane.b32.xlu1 %v898_v9, %s829_s2 }
 0x1ca   :  { %v225_v48 = vpop.permute.xlu1 %224 }
 0x1cb   :  { %v229_v49 = vadd.f32 %v225_v48, %v938_v32 }
 0x1cd   :  { %785 = vtanh.f32 %v229_v49 }
 0x1ce   :  { %v223_v50 = vpop.permute.xlu1 %222 }
 0x1cf   :  { %v228_v51 = vadd.f32 %v223_v50, %v934_v31 }
 0x1d1   :  { %787 = vtanh.f32 %v228_v51 }
 0x1d2   :  { %v249_v54 = vpop.permute.xlu1 %248 }
 0x1d3   :  { %v253_v57 = vmul.f32 %v782_v41, %v249_v54 }
 0x1d6   :  { %v247_v59 = vpop.permute.xlu1 %246 }
 0x1d7   :  { %v786_v52 = vpop.eup %785  ;;  %v252_v63 = vmul.f32 %v784_v44, %v247_v59 }
 0x1d8   :  { %238 = vrot.lane.b32.xlu0 %v786_v52, %s830_s4 }
 0x1db   :  { %v788_v53 = vpop.eup %787 }
 0x1dc   :  { %236 = vrot.lane.b32.xlu0 %v788_v53, %s830_s4 }
 0x24a   :  { %v239_v56 = vpop.permute.xlu0 %238 }
 0x24b   :  { %v243_v58 = vmul.f32 %v239_v56, %v233_v55 }
 0x24d   :  { %v950_v60 = vadd.f32 %v253_v57, %v243_v58 }
 0x24e   :  { %v237_v62 = vpop.permute.xlu0 %236 }
 0x24f   :  { %v276_v1 = vpack.c.bf16 %v950_v60, %v950_v60  ;;  %v242_v3 = vmul.f32 %v237_v62, %v232_v61  ;;  %v381_v41 = vrot.slane %v950_v60, 7 }
 0x251   :  { %v280_v5 = vunpack.c.l.b16 %v276_v1  ;;  %v954_v6 = vadd.f32 %v252_v63, %v242_v3 }
 0x253   :  { %v275_v7 = vpack.c.bf16 %v954_v6, %v954_v6  ;;  %v281_v8 = vrot.slane %v280_v5, 7  ;;  %v380_v46 = vrot.slane %v954_v6, 7 }
 0x255   :  { %v279_v9 = vunpack.c.l.b16 %v275_v7 }
 0x257   :  { %v283_v10 = vsel %vm282_vm4, %v281_v8, %v279_v9 }
 0x258   :  { %v284_v11 = vpack.c.b16 %v283_v10, %v283_v10 }
 0x25a   :  { %285 = vrot.lane.b32.xlu0 %v284_v11, %s830_s4 }
 0x2cc   :  { %v286_v13 = vpop.permute.xlu0 %285 }
 0x2cd   :  { %746 = vmatmul.mubr.msk.bf16.vlgmr.msra.gmra.mrb[4].mxu1 %vm150_vm2, %v286_v13 }
 0x2ce   :  { %758 = vmatpush3.bf16.msra.mxu1 %v870_v2  ;;  %761 = vmatprep.mubr.msk.bf16.mxu1 %vm826_vm1, %v825_v0 }
 0x2cf   :  { %759 = vmatprep.subr.bf16.mxu1 %v825_v0 }
 0x2d2   :  { %760 = vmatpush3.bf16.msra.mxu1 %v884_v4 }
 0x3a0   :  { %v324_v14 = vpop.f32.mrb[4].mxu1 }
 0x3a1   :  { %v325_v15 = vadd.f32 %v926_v19, %v324_v14  ;;  %v747_v16 = vpop.f32.mrb[5].mxu1 }
 0x3a2   :  { %v327_v17 = vpop.f32.mrb[6].mxu1 }
 0x3a3   :  { %350 = vrot.lane.b32.xlu0 %v325_v15, %s828_s8  ;;  %v748_v18 = vpop.f32.mrb[7].mxu1  ;;  %v331_v20 = vrot.slane %v325_v15, 7  ;;  %v335_v2 = vadd.f32 %v325_v15, %v938_v32 }
 0x3a5   :  { %348 = vrot.lane.b32.xlu1 %v331_v20, %s828_s8  ;;  %v334_v21 = vadd.f32 %v331_v20, %v934_v31  ;;  %v697_v22 = vmul.f32 -1.442695, %v335_v2 }
 0x3a7   :  { %v696_v23 = vmul.f32 -1.442695, %v334_v21  ;;  %789 = vpow2.f32 %v697_v22 }
 0x3a9   :  { %791 = vpow2.f32 %v696_v23 }
 0x3b1   :  { %v790_v0 = vpop.eup %789 }
 0x3b2   :  { %v343_v24 = vadd.f32 1.0, %v790_v0 }
 0x3b3   :  { %v792_v4 = vpop.eup %791 }
 0x3b4   :  { %v342_v25 = vadd.f32 1.0, %v792_v4  ;;  %793 = vrcp.f32 %v343_v24 }
 0x3b6   :  { %795 = vrcp.f32 %v342_v25 }
 0x3be   :  { %v794_v26 = vpop.eup %793 }
 0x3bf   :  { %v369_v40 = vsub.f32 1.0, %v794_v26  ;;  %v385_v43 = vmul.f32 %v794_v26, %v381_v41 }
 0x3c0   :  { %v796_v29 = vpop.eup %795 }
 0x3c1   :  { %v368_v45 = vsub.f32 1.0, %v796_v29  ;;  %v384_v49 = vmul.f32 %v796_v29, %v380_v46 }
 0x415   :  { %v351_v27 = vpop.permute.xlu0 %350 }
 0x416   :  { %v355_v28 = vmul.f32 %v794_v26, %v351_v27 }
 0x417   :  { %v349_v30 = vpop.permute.xlu1 %348 }
 0x418   :  { %v354_v33 = vmul.f32 %v796_v29, %v349_v30  ;;  %360 = vrot.lane.b32.xlu0 %v355_v28, %s828_s8 }
 0x41a   :  { %358 = vrot.lane.b32.xlu1 %v354_v33, %s828_s8 }
 0x48a   :  { %v361_v34 = vpop.permute.xlu0 %360 }
 0x48b   :  { %v365_v35 = vadd.f32 %v361_v34, %v938_v32 }
 0x48c   :  { %v359_v36 = vpop.permute.xlu1 %358 }
 0x48d   :  { %797 = vtanh.f32 %v365_v35  ;;  %v364_v37 = vadd.f32 %v359_v36, %v934_v31 }
 0x48f   :  { %799 = vtanh.f32 %v364_v37 }
 0x497   :  { %v798_v38 = vpop.eup %797 }
 0x498   :  { %374 = vrot.lane.b32.xlu0 %v798_v38, %s830_s4 }
 0x499   :  { %v800_v39 = vpop.eup %799 }
 0x49a   :  { %372 = vrot.lane.b32.xlu1 %v800_v39, %s830_s4 }
 0x50a   :  { %v375_v42 = vpop.permute.xlu0 %374 }
 0x50b   :  { %v379_v44 = vmul.f32 %v375_v42, %v369_v40 }
 0x50c   :  { %v373_v47 = vpop.permute.xlu1 %372 }
 0x50d   :  { %v979_v48 = vadd.f32 %v385_v43, %v379_v44  ;;  %v378_v50 = vmul.f32 %v373_v47, %v368_v45 }
 0x50f   :  { %v981_v51 = vadd.f32 %v384_v49, %v378_v50  ;;  %v408_v52 = vpack.c.bf16 %v979_v48, %v979_v48  ;;  %v513_v28 = vrot.slane %v979_v48, 7 }
 0x511   :  { %v407_v53 = vpack.c.bf16 %v981_v51, %v981_v51  ;;  %v412_v55 = vunpack.c.l.b16 %v408_v52  ;;  %v512_v33 = vrot.slane %v981_v51, 7 }
 0x513   :  { %v411_v54 = vunpack.c.l.b16 %v407_v53 }
 0x515   :  { %v413_v56 = vrot.slane %v411_v54, 1 }
 0x517   :  { %v414_v57 = vsel %vm282_vm4, %v412_v55, %v413_v56 }
 0x518   :  { %v415_v58 = vpack.c.b16 %v414_v57, %v414_v57 }
 0x51a   :  { %416 = vrot.lane.b32.xlu1 %v415_v58, %s830_s4 }
 0x58c   :  { %v417_v59 = vpop.permute.xlu1 %416 }
 0x58d   :  { %754 = vmatmul.mubr.msk.bf16.vlgmr.msra.gmra.mrb[4].mxu0 %vm150_vm2, %v417_v59 }
 0x660   :  { %v455_v61 = vpop.f32.mrb[4].mxu0 }
 0x661   :  { %v456_v62 = vadd.f32 %v926_v19, %v455_v61  ;;  %v755_v63 = vpop.f32.mrb[5].mxu0 }
 0x662   :  { %v458_v1 = vpop.f32.mrb[6].mxu0 }
 0x663   :  { %v462_v3 = vrot.slane %v456_v62, 6  ;;  %v463_v5 = vrot.slane %v456_v62, 7  ;;  %v756_v7 = vpop.f32.mrb[7].mxu0 }
 0x665   :  { %482 = vrot.lane.b32.xlu1 %v463_v5, %s828_s8  ;;  %480 = vrot.lane.b32.xlu0 %v462_v3, %s828_s8  ;;  %v466_v8 = vadd.f32 %v462_v3, %v934_v31  ;;  %v467_v9 = vadd.f32 %v463_v5, %v938_v32 }
 0x667   :  { %v699_v10 = vmul.f32 -1.442695, %v466_v8  ;;  %v700_v11 = vmul.f32 -1.442695, %v467_v9 }
 0x669   :  { %801 = vpow2.f32 %v699_v10 }
 0x66a   :  { %803 = vpow2.f32 %v700_v11 }
 0x673   :  { %v802_v13 = vpop.eup %801 }
 0x674   :  { %v804_v14 = vpop.eup %803  ;;  %v474_v15 = vadd.f32 1.0, %v802_v13 }
 0x675   :  { %v475_v16 = vadd.f32 1.0, %v804_v14 }
 0x676   :  { %805 = vrcp.f32 %v474_v15 }
 0x677   :  { %807 = vrcp.f32 %v475_v16 }
 0x680   :  { %v806_v17 = vpop.eup %805 }
 0x681   :  { %v808_v18 = vpop.eup %807  ;;  %v500_v30 = vsub.f32 1.0, %v806_v17  ;;  %v516_v37 = vmul.f32 %v806_v17, %v512_v33 }
 0x682   :  { %v501_v27 = vsub.f32 1.0, %v808_v18  ;;  %v517_v34 = vmul.f32 %v808_v18, %v513_v28 }
 0x6d7   :  { %v483_v20 = vpop.permute.xlu1 %482  ;;  %v481_v2 = vpop.permute.xlu0 %480 }
 0x6d8   :  { %v487_v21 = vmul.f32 %v808_v18, %v483_v20  ;;  %v486_v22 = vmul.f32 %v806_v17, %v481_v2  ;;  %v260_v18 = vsub.s32 0, %v900_v12 }
 0x6da   :  { %492 = vrot.lane.b32.xlu1 %v487_v21, %s828_s8  ;;  %490 = vrot.lane.b32.xlu0 %v486_v22, %s828_s8  ;;  %v265_v21 = vrot.slane %v950_v60, %v260_v18  ;;  %v392_v22 = vsub.s32 1, %v900_v12 }
 0x74c   :  { %v493_v23 = vpop.permute.xlu1 %492  ;;  %v491_v0 = vpop.permute.xlu0 %490 }
 0x74d   :  { %v497_v4 = vadd.f32 %v493_v23, %v938_v32  ;;  %v496_v24 = vadd.f32 %v491_v0, %v934_v31  ;;  %v261_v23 = vrot.slane %v954_v6, %v260_v18  ;;  %v393_v0 = vrot.slane %v981_v51, %v392_v22 }
 0x74f   :  { %809 = vtanh.f32 %v497_v4 }
 0x750   :  { %811 = vtanh.f32 %v496_v24 }
 0x759   :  { %v810_v25 = vpop.eup %809 }
 0x75a   :  { %v812_v26 = vpop.eup %811  ;;  %506 = vrot.lane.b32.xlu1 %v810_v25, %s830_s4 }
 0x75b   :  { %504 = vrot.lane.b32.xlu0 %v812_v26, %s830_s4 }
 0x7cc   :  { %v507_v29 = vpop.permute.xlu1 %506 }
 0x7cd   :  { %v511_v35 = vmul.f32 %v507_v29, %v501_v27  ;;  %v505_v36 = vpop.permute.xlu0 %504  ;;  %v657_v29 = vsub.s32 3, %v900_v12 }
 0x7ce   :  { %v510_v38 = vmul.f32 %v505_v36, %v500_v30 }
 0x7cf   :  { %v1003_v39 = vadd.f32 %v517_v34, %v511_v35 }
 0x7d0   :  { %v1005_v40 = vadd.f32 %v516_v37, %v510_v38 }
 0x7d1   :  { %v540_v41 = vpack.c.bf16 %v1003_v39, %v1003_v39  ;;  %v646_v24 = vrot.slane %v1003_v39, 7 }
 0x7d2   :  { %v539_v42 = vpack.c.bf16 %v1005_v40, %v1005_v40  ;;  %v645_v26 = vrot.slane %v1005_v40, 7 }
 0x7d3   :  { %v544_v43 = vunpack.c.l.b16 %v540_v41 }
 0x7d4   :  { %v543_v44 = vunpack.c.l.b16 %v539_v42 }
 0x7d5   :  { %v546_v45 = vrot.slane %v544_v43, 1 }
 0x7d6   :  { %v545_v46 = vrot.slane %v543_v44, 2 }
 0x7d8   :  { %v547_v47 = vsel %vm282_vm4, %v546_v45, %v545_v46 }
 0x7d9   :  { %v548_v49 = vpack.c.b16 %v547_v47, %v547_v47 }
 0x7db   :  { %549 = vrot.lane.b32.xlu0 %v548_v49, %s830_s4 }
 0x84d   :  { %v550_v50 = vpop.permute.xlu0 %549 }
 0x84e   :  { %762 = vmatmul.mubr.msk.bf16.vlgmr.msra.gmra.mrb[8].mxu1 %vm150_vm2, %v550_v50 }
 0x921   :  { %v588_v52 = vpop.f32.mrb[8].mxu1 }
 0x922   :  { %v589_v53 = vadd.f32 %v926_v19, %v588_v52  ;;  %v763_v54 = vpop.f32.mrb[9].mxu1 }
 0x923   :  { %v591_v55 = vpop.f32.mrb[10].mxu1 }
 0x924   :  { %v595_v56 = vrot.slane %v589_v53, 5  ;;  %v596_v57 = vrot.slane %v589_v53, 6  ;;  %v764_v58 = vpop.f32.mrb[11].mxu1 }
 0x926   :  { %615 = vrot.lane.b32.xlu0 %v596_v57, %s828_s8  ;;  %613 = vrot.lane.b32.xlu1 %v595_v56, %s828_s8  ;;  %v599_v59 = vadd.f32 %v595_v56, %v934_v31  ;;  %v600_v61 = vadd.f32 %v596_v57, %v938_v32 }
 0x928   :  { %v702_v62 = vmul.f32 -1.442695, %v599_v59  ;;  %v703_v63 = vmul.f32 -1.442695, %v600_v61 }
 0x92a   :  { %813 = vpow2.f32 %v702_v62 }
 0x92b   :  { %815 = vpow2.f32 %v703_v63 }
 0x934   :  { %v814_v1 = vpop.eup %813 }
 0x935   :  { %v816_v3 = vpop.eup %815  ;;  %v607_v19 = vadd.f32 1.0, %v814_v1 }
 0x936   :  { %v608_v5 = vadd.f32 1.0, %v816_v3 }
 0x937   :  { %817 = vrcp.f32 %v607_v19 }
 0x938   :  { %819 = vrcp.f32 %v608_v5 }
 0x941   :  { %v818_v7 = vpop.eup %817 }
 0x942   :  { %v820_v8 = vpop.eup %819  ;;  %v633_v25 = vsub.f32 1.0, %v818_v7  ;;  %v649_v30 = vmul.f32 %v818_v7, %v645_v26 }
 0x943   :  { %v634_v6 = vsub.f32 1.0, %v820_v8  ;;  %v650_v51 = vmul.f32 %v820_v8, %v646_v24 }
 0x998   :  { %v616_v9 = vpop.permute.xlu0 %615  ;;  %v614_v10 = vpop.permute.xlu1 %613 }
 0x999   :  { %v620_v11 = vmul.f32 %v820_v8, %v616_v9  ;;  %v619_v13 = vmul.f32 %v818_v7, %v614_v10 }
 0x99b   :  { %625 = vrot.lane.b32.xlu0 %v620_v11, %s828_s8  ;;  %623 = vrot.lane.b32.xlu1 %v619_v13, %s828_s8 }
 0xa0d   :  { %v626_v14 = vpop.permute.xlu0 %625  ;;  %v624_v15 = vpop.permute.xlu1 %623 }
 0xa0e   :  { %v630_v16 = vadd.f32 %v626_v14, %v938_v32  ;;  %v629_v17 = vadd.f32 %v624_v15, %v934_v31  ;;  %v397_v31 = vrot.slane %v979_v48, %v392_v22  ;;  %v524_v32 = vsub.s32 2, %v900_v12 }
 0xa10   :  { %821 = vtanh.f32 %v630_v16  ;;  %v529_v60 = vrot.slane %v1003_v39, %v524_v32  ;;  %v525_v4 = vrot.slane %v1005_v40, %v524_v32 }
 0xa11   :  { %823 = vtanh.f32 %v629_v17 }
 0xa1a   :  { %v822_v20 = vpop.eup %821 }
 0xa1b   :  { %v824_v2 = vpop.eup %823  ;;  %639 = vrot.lane.b32.xlu0 %v822_v20, %s830_s4 }
 0xa1c   :  { %637 = vrot.lane.b32.xlu1 %v824_v2, %s830_s4 }
 0xa1f   :  { %268 = vrot.lane.b32.xlu0 %v265_v21, %s830_s4 }
 0xa20   :  { %266 = vrot.lane.b32.xlu1 %v261_v23, %s830_s4 }
 0xa23   :  { %400 = vrot.lane.b32.xlu0 %v397_v31, %s830_s4 }
 0xa24   :  { %398 = vrot.lane.b32.xlu1 %v393_v0, %s830_s4 }
 0xa27   :  { %532 = vrot.lane.b32.xlu0 %v529_v60, %s830_s4 }
 0xa28   :  { %530 = vrot.lane.b32.xlu1 %v525_v4, %s830_s4 }
 0xa8d   :  { %v640_v48 = vpop.permute.xlu0 %639 }
 0xa8e   :  { %v644_v27 = vmul.f32 %v640_v48, %v634_v6  ;;  %v638_v28 = vpop.permute.xlu1 %637 }
 0xa8f   :  { %v643_v33 = vmul.f32 %v638_v28, %v633_v25 }
 0xa90   :  { %v652_v34 = vadd.f32 %v650_v51, %v644_v27 }
 0xa91   :  { %v651_v35 = vadd.f32 %v649_v30, %v643_v33  ;;  %v269_v36 = vpop.permute.xlu0 %268 }
 0xa92   :  { %274 = vst.msk [vmem:[%s1075_s5 + $0x4] sm:$0x1] %vm272_vm5, %v269_v36  ;;  %v267_v37 = vpop.permute.xlu1 %266  ;;  %v662_v38 = vrot.slane %v652_v34, %v657_v29 }
 0xa93   :  { %273 = vst.msk [vmem:[%s1075_s5] sm:$0x1] %vm272_vm5, %v267_v37  ;;  %v658_v39 = vrot.slane %v651_v35, %v657_v29 }
 0xa94   :  { %665 = vrot.lane.b32.xlu0 %v662_v38, %s830_s4 }
 0xa95   :  { %663 = vrot.lane.b32.xlu1 %v658_v39, %s830_s4  ;;  %v401_v12 = vpop.permute.xlu0 %400  ;;  %v673_v40 = vsel %vm672_vm6, %v662_v38, %v658_v39 }
 0xa96   :  { %406 = vst.msk [vmem:[%s1075_s5 + $0x4] sm:$0x2] %vm404_vm7, %v401_v12  ;;  %v399_v41 = vpop.permute.xlu1 %398 }
 0xa97   :  { %405 = vst.msk [vmem:[%s1075_s5] sm:$0x2] %vm404_vm7, %v399_v41 }
 0xa99   :  { %674 = vrot.lane.b32.xlu1 %v673_v40, %s830_s4  ;;  %v533_v42 = vpop.permute.xlu0 %532 }
 0xa9a   :  { %538 = vst.msk [vmem:[%s1075_s5 + $0x4] sm:$0x4] %vm536_vm8, %v533_v42  ;;  %v531_v43 = vpop.permute.xlu1 %530 }
 0xa9b   :  { %537 = vst.msk [vmem:[%s1075_s5] sm:$0x4] %vm536_vm8, %v531_v43 }
 0xb06   :  { %v666_v44 = vpop.permute.xlu0 %665 }
 0xb07   :  { %671 = vst.msk [vmem:[%s1075_s5 + $0x4] sm:$0x8] %vm669_vm9, %v666_v44  ;;  %v664_v45 = vpop.permute.xlu1 %663 }
 0xb08   :  { %670 = vst.msk [vmem:[%s1075_s5] sm:$0x8] %vm669_vm9, %v664_v45 }
 0xb0b   :  { %v675_v46 = vpop.permute.xlu1 %674 }
 0xb0c   :  { %678 = vst.msk [vmem:[#allocation2 - $0x3] sm:$0x18] %vm677_vm10, %v675_v46 }

// kernel: han_forward.9
= control target key start
LH: loop header
LB: loop body
LE: loop exit
PB: predicated region body
PF: predicated region fallthrough
CT: control target
= control target key end

     0   :  { %v169_v3 = vmov 0.0|0.0   ;;  %vm170_vm0 = vmmov 0   ;;  %v171_v6 = vmov 0.0   ;;  %s223_s0 = inlined_call_operand.vmem [shape: f32[2,32], index: 0, kind: input, shape index: {}]   ;;  %s224_s1 = inlined_call_operand.vmem [shape: f32[32,5], index: 1, kind: input, shape index: {}]   ;;  %s225_s2 = inlined_call_operand.vmem [shape: f32[1,5], index: 2, kind: input, shape index: {}]   ;;  %s226_s3 = inlined_call_operand.hbm [shape: f32[2,5], index: 3, kind: output, shape index: {}]  }
   0x1   :  { %v16_v0 = vld [vmem:[%s224_s1] sm:$0xff]  ;;  %v17_v1 = vld [vmem:[%s224_s1 + $0x8] sm:$0xff]  ;;  %v18_v2 = vld [vmem:[%s224_s1 + $0x10] sm:$0xff]  ;;  %135 = vmatprep.subr.bf16.mxu0 %v169_v3  ;;  %132 = vmatprep.mubr.msk.f32.mxu0 %vm170_vm0, %v171_v6 }
   0x2   :  { %v136_v4 = vpack.c.bf16 %v17_v1, %v16_v0  ;;  %v19_v5 = vld [vmem:[%s224_s1 + $0x18] sm:$0xff] }
   0x3   :  { %8 = vsyncpa [#allocation3], 0  ;;  %v139_v7 = vpack.c.bf16 %v19_v5, %v18_v2  ;;  %v15_v8 = vld [vmem:[%s223_s0] sm:$0x3]  ;;  %vm27_vm1 = vcmask 261120   ;;  %s172_s24 = smov [#allocation2]  }
   0x4   :  { %137 = vmatpush3.bf16.msra.mxu0 %v136_v4  ;;  %v117_v9 = vld [vmem:[%s225_s2] ss:$0 sm:$0xff]  ;;  %s109_s1 = sshll.u32 %s172_s24, 4  ;;  %vm101_vm2 = vcmask 33792   ;;  %s110_s1 = int_to_ptr.vmem [resolvable:$true] %s109_s1 }
   0x5   :  { %138 = vmatprep.subr.bf16.mxu0 %v169_v3  ;;  %s145_s25 = scalar_lea.vmem %s110_s1, 32  ;;  %p150_p1 = scmp.lt.s32.totalorder %s110_s1, %s110_s1 }
   0x6   :  { %p146_p0 = scmp.ne.s32.totalorder %s110_s1, %s145_s25  ;;  %p151_p2 = scmp.lt.s32.totalorder %s145_s25, %s145_s25 }
   0x8   :  { %140 = vmatpush3.bf16.msra.mxu0 %v139_v7  ;;  %p152_p3 = por %p151_p2, %p150_p1 }
   0xa   :  { %p153_p4 = pnand %p152_p3, %p146_p0 }
   0xb   :  { %133 = vmatmul.mubr.msk.f32.vlgmr.msra.gmra.mrb[0].mxu0 %vm27_vm1, %v15_v8 }
  0xde   :  { %v97_v10 = vpop.f32.mrb[0].mxu0 }
  0xdf   :  { %v98_v11 = vadd.f32 %v117_v9, %v97_v10  ;;  %v134_v12 = vpop.f32.mrb[1].mxu0 }
  0xe1   :  { %102 = vst.msk [vmem:[#allocation2] sm:$0x3] %vm101_vm2, %v98_v11 }
  0xe2   :  { %156 = shalt.err (!%p153_p4)
}
  0xe3   :  { %s157_s27 = scalar_lea.hbm %s226_s3, 32 }
  0xe4   :  { %p158_p5 = scmp.ne.s32.totalorder %s226_s3, %s157_s27  ;;  %p161_p6 = scmp.lt.u32.totalorder %s157_s27, %s226_s3 }
  0xe6   :  { %p163_p7 = pnand %p161_p6, %p158_p5 }
  0xe8   :  { %166 = shalt.err (!%p163_p7)
}
  0xe9   :  { %112 = dma.vmem_to_hbm [thread:$0]  %s110_s1, 32, %s226_s3, [#allocation3]  }
  0xea   :  { %167 = dma.done.wait [#allocation3], 32  }
  0xeb   :  { %168 = vsyncadd [#allocation3], 4294967264 }
  0xec   :  { %116 = vsyncpa [#allocation3], 1 }

// kernel: han_forward.8
= control target key start
LH: loop header
LB: loop body
LE: loop exit
PB: predicated region body
PF: predicated region fallthrough
CT: control target
= control target key end

     0   :  { %v271_v1 = vmov 0.0   ;;  %vm272_vm0 = vmmov 0   ;;  %s359_s0 = inlined_call_operand.vmem [shape: f32[2,4,32], index: 0, kind: input, shape index: {}]   ;;  %s360_s1 = inlined_call_operand.vmem [shape: s32[2,1], index: 1, kind: input, shape index: {}]   ;;  %s361_s2 = inlined_call_operand.vmem [shape: bf16[32,16], index: 2, kind: input, shape index: {}]   ;;  %s362_s3 = inlined_call_operand.vmem [shape: f32[1,16], index: 3, kind: input, shape index: {}]   ;;  %s363_s4 = inlined_call_operand.vmem [shape: f32[1,16], index: 4, kind: input, shape index: {}]   ;;  %s364_s5 = inlined_call_operand.hbm [shape: f32[2,4], index: 5, kind: output, shape index: {0}]   ;;  %s365_s6 = inlined_call_operand.vmem [shape: f32[2,32], index: 6, kind: output, shape index: {1}]  }
   0x1   :  { %v238_v0 = vld [vmem:[%s361_s2] sm:$0xff]   ;;  %224 = vmatprep.subr.bf16.mxu0 %v271_v1  ;;  %v239_v2 = vld [vmem:[%s361_s2 + $0x8] sm:$0xff]   ;;  %228 = vmatprep.mubr.msk.bf16.mxu0 %vm272_vm0, %v271_v1 }
   0x2   :  { %225 = vmatpush3.bf16.msra.mxu0 %v238_v0  ;;  %v319_v3 = vld [vmem:[%s359_s0] sm:$0xf]  ;;  %v324_v4 = vld [vmem:[%s359_s0 + $0x4] sm:$0xf] }
   0x3   :  { %226 = vmatprep.subr.bf16.mxu0 %v271_v1  ;;  %v28_v5 = vcombine.low %v319_v3, %v324_v4 }
   0x4   :  { %12 = vsyncpa [#allocation3], 0  ;;  %vm54_vm1 = vcmask 261120   ;;  %v120_v7 = vld [vmem:[%s360_s1] sm:$0x3]  ;;  %v273_v8 = vmov 0   ;;  %v118_v22 = vlaneseq }
   0x5   :  { %v30_v6 = vpack.c.bf16 %v28_v5, %v28_v5  ;;  %236 = vset.pattern.permute.xlu1 %v273_v8  ;;  %237 = vset.pattern.permute.xlu0 %v273_v8  ;;  %v216_v9 = vld [vmem:[%s362_s3] ss:$0 sm:$0xff]  ;;  %vm111_vm2 = vcmask 125952   ;;  %vm135_vm3 = vcmask 1041409   ;;  %vm139_vm5 = vcmask 25600   ;;  %s274_s1 = smov [#allocation2]  }
   0x6   :  { %227 = vmatpush3.bf16.msra.mxu0 %v239_v2  ;;  %122 = vperm.xlu1 %236, %v120_v7   ;;  %v220_v15 = vld [vmem:[%s363_s4] ss:$0 sm:$0xff]  ;;  %v119_v23 = vand.u32 127, %v118_v22  ;;  %v128_v24 = vshrl.u32 %v118_v22, 7  ;;  %vm170_vm6 = vcmask 257024   ;;  %s204_s3 = sshll.u32 %s274_s1, 4  ;;  %s205_s3 = int_to_ptr.vmem [resolvable:$true] %s204_s3 }
   0x7   :  { %s247_s4 = scalar_lea.vmem %s205_s3, 32  ;;  %p252_p1 = scmp.lt.s32.totalorder %s205_s3, %s205_s3 }
   0x8   :  { %v129_v26 = vsub.s32 %v119_v23, %v128_v24  ;;  %v163_v40 = vsub.s32 1, %v128_v24  ;;  %v156_v42 = vsub.s32 0, %v128_v24  ;;  %p248_p0 = scmp.ne.s32.totalorder %s205_s3, %s247_s4  ;;  %p253_p2 = scmp.lt.s32.totalorder %s247_s4, %s247_s4 }
   0x9   :  { %229 = vmatmul.mubr.msk.bf16.vlgmr.msra.gmra.mrb[0].mxu0 %vm54_vm1, %v30_v6 }
   0xa   :  { %p254_p3 = por %p253_p2, %p252_p1 }
   0xc   :  { %p255_p4 = pnand %p254_p3, %p248_p0 }
  0x85   :  { %v123_v27 = vpop.permute.xlu1 %122 }
  0x86   :  { %vm124_vm4 = vcmp.lt.s32.totalorder %v119_v23, %v123_v27 }
  0xdc   :  { %v92_v10 = vpop.f32.mrb[0].mxu0 }
  0xdd   :  { %v93_v11 = vadd.f32 %v216_v9, %v92_v10  ;;  %v230_v12 = vpop.f32.mrb[1].mxu0 }
  0xde   :  { %v95_v13 = vpop.f32.mrb[2].mxu0 }
  0xdf   :  { %241 = vtanh.f32 %v93_v11  ;;  %v231_v14 = vpop.f32.mrb[3].mxu0 }
  0xe9   :  { %v242_v16 = vpop.eup %241 }
  0xea   :  { %v109_v17 = vmul.f32 %v242_v16, %v220_v15  ;;  %v100_v18 = vcombine.high %v242_v16, %v242_v16 }
  0xec   :  { %v112_v19 = vsel %vm111_vm2, %v109_v17, 0.0  ;;  %v110_v20 = vmul.f32 %v220_v15, %v100_v18 }
  0xed   :  { %113 = vadd.xlane.f32.xlu0 %v112_v19 }
  0xee   :  { %v115_v21 = vsel %vm111_vm2, %v110_v20, 0.0 }
  0xf1   :  { %116 = vadd.xlane.f32.xlu0 %v115_v21 }
 0x17a   :  { %v114_v25 = vpop.xlane.xlu0 %113 }
 0x17b   :  { %v130_v29 = vrot.slane %v114_v25, %v129_v26 }
 0x17e   :  { %v117_v28 = vpop.xlane.xlu0 %116 }
 0x17f   :  { %v134_v30 = vrot.slane %v117_v28, %v129_v26 }
 0x181   :  { %v136_v31 = vsel %vm135_vm3, %v134_v30, %v130_v29 }
 0x182   :  { %v138_v32 = vsel %vm124_vm4, %v136_v31, -1e+30 }
 0x183   :  { %v140_v33 = vsel %vm139_vm5, %v138_v32, -inf }
 0x184   :  { %141 = vmax.xlane.f32.xlu1 %v140_v33 }
 0x211   :  { %v142_v34 = vpop.xlane.xlu1 %141 }
 0x212   :  { %v143_v35 = vsub.f32 %v138_v32, %v142_v34 }
 0x214   :  { %v144_v36 = vmul.f32 1.442695, %v143_v35 }
 0x216   :  { %243 = vpow2.f32 %v144_v36 }
 0x220   :  { %v244_v37 = vpop.eup %243 }
 0x221   :  { %v146_v38 = vsel %vm124_vm4, %v244_v37, 0.0 }
 0x222   :  { %v147_v39 = vsel %vm139_vm5, %v146_v38, 0.0  ;;  %v164_v41 = vrot.slane %v146_v38, %v163_v40  ;;  %v157_v43 = vrot.slane %v146_v38, %v156_v42 }
 0x223   :  { %148 = vadd.xlane.f32.xlu0 %v147_v39 }
 0x239   :  { %166 = vbcast.lane.b32.xlu0 %v164_v41, 256 }
 0x23d   :  { %159 = vbcast.lane.b32.xlu0 %v157_v43, 256 }
 0x2b0   :  { %v149_v44 = vpop.xlane.xlu0 %148 }
 0x2b1   :  { %v150_v45 = vmax.f32 %v149_v44, 1e-30 }
 0x2b3   :  { %245 = vrcp.f32 %v150_v45 }
 0x2b4   :  { %v167_v46 = vpop.permute.xlu0 %166 }
 0x2b5   :  { %v169_v47 = vmul.f32 %v167_v46, %v324_v4 }
 0x2b7   :  { %v178_v48 = vsel %vm170_vm6, %v169_v47, 0.0 }
 0x2b8   :  { %v179_v49 = vrot.slane %v178_v48, 4  ;;  %v160_v50 = vpop.permute.xlu0 %159 }
 0x2b9   :  { %v168_v51 = vmul.f32 %v160_v50, %v319_v3 }
 0x2ba   :  { %v180_v52 = vadd.f32 %v179_v49, %v178_v48 }
 0x2bb   :  { %v171_v53 = vsel %vm170_vm6, %v168_v51, 0.0 }
 0x2bc   :  { %v181_v54 = vrot.slane %v180_v52, 2  ;;  %v172_v55 = vrot.slane %v171_v53, 4 }
 0x2bd   :  { %v246_v56 = vpop.eup %245 }
 0x2be   :  { %v182_v57 = vadd.f32 %v181_v54, %v180_v52  ;;  %v173_v58 = vadd.f32 %v172_v55, %v171_v53  ;;  %v152_v59 = vmul.f32 %v246_v56, %v146_v38 }
 0x2c0   :  { %v183_v60 = vrot.slane %v182_v57, 1  ;;  %v174_v61 = vrot.slane %v173_v58, 2  ;;  %153 = vst.msk [vmem:[#allocation2] sm:$0x3] %vm139_vm5, %v152_v59 }
 0x2c1   :  { %258 = shalt.err (!%p255_p4)
}
 0x2c2   :  { %s259_s11 = scalar_lea.hbm %s364_s5, 32 }
 0x2c3   :  { %p260_p5 = scmp.ne.s32.totalorder %s364_s5, %s259_s11  ;;  %p263_p6 = scmp.lt.u32.totalorder %s259_s11, %s364_s5 }
 0x2c5   :  { %p265_p7 = pnand %p263_p6, %p260_p5 }
 0x2c7   :  { %268 = shalt.err (!%p265_p7)
}
 0x2c8   :  { %207 = dma.vmem_to_hbm [thread:$0]  %s205_s3, 32, %s364_s5, [#allocation3]   ;;  %v186_v62 = vrot.slane %v246_v56, 1  ;;  %v184_v63 = vadd.f32 %v183_v60, %v182_v57  ;;  %v175_v0 = vadd.f32 %v174_v61, %v173_v58  ;;  %vm196_vm7 = vcmask 254976  }
 0x2ca   :  { %v190_v1 = vmul.f32 %v186_v62, %v184_v63  ;;  %v176_v2 = vrot.slane %v175_v0, 1 }
 0x2cc   :  { %v177_v3 = vadd.f32 %v176_v2, %v175_v0  ;;  %v193_v4 = vrot.slane %v190_v1, 7 }
 0x2ce   :  { %v189_v5 = vmul.f32 %v246_v56, %v177_v3 }
 0x2d0   :  { %v194_v6 = vsel %vm135_vm3, %v193_v4, %v189_v5 }
 0x2d1   :  { %197 = vst.msk [vmem:[%s365_s6] sm:$0x3] %vm196_vm7, %v194_v6 }
 0x2d2   :  { %269 = dma.done.wait [#allocation3], 32  }
 0x2d3   :  { %270 = vsyncadd [#allocation3], 4294967264 }
 0x2d4   :  { %215 = vsyncpa [#allocation3], 1 }

</bundles_post_ra>
